<compile_context>
chip_gen: v6e
topology: v6e:2x2x1
jax: 0.10.0
libtpu: 0.0.40
codegen_flags: <defaults>
</compile_context>

<pallas_src>
import functools
import numpy as np

import jax
import jax.numpy as jnp
from jax.experimental import pallas as pl
from jax.experimental.pallas import tpu as pltpu


WINDOW_SIZE = 11


def _gaussian_1d(window_size: int, sigma: float = 1.5) -> np.ndarray:
    """Same 1D Gaussian as PyTorch gaussian(); normalized to sum to 1 (f32)."""
    x = np.arange(window_size, dtype=np.float64)
    g = np.exp(-((x - window_size // 2) ** 2) / (2.0 * sigma ** 2))
    return (g / g.sum()).astype(np.float32)


def _band_matrices(window_size: int, h: int, w: int, sigma: float = 1.5):
    """Banded matrices implementing the separable 'valid' Gaussian conv.

    Bw: (W, OW)  so  y[n,h,o] = sum_w x[n,h,w] * Bw[w,o]  (lane/width pass)
    Bh: (OH, H)  so  z[n,p,o] = sum_h Bh[p,h] * y[n,h,o]  (sublane/height pass)
    """
    g = _gaussian_1d(window_size, sigma)
    oh, ow = h - window_size + 1, w - window_size + 1
    bw = np.zeros((w, ow), np.float32)
    for o in range(ow):
        bw[o:o + window_size, o] = g
    bh = np.zeros((oh, h), np.float32)
    for p in range(oh):
        bh[p, p:p + window_size] = g
    return bw, bh


def _vmem_capacity_bytes() -> int:
    try:
        return int(pltpu.get_tpu_info().vmem_capacity_bytes)
    except Exception:
        return 64 * 1024 * 1024   # conservative default (v7x per-TC VMEM)


def _choose_tiling(n: int, h: int, w: int):
    """Pick tile_n as a divisor of n (no padding) sized to the VMEM budget."""
    cap = _vmem_capacity_bytes()
    frac = 0.55 if cap <= 64 * 1024 * 1024 else 0.75   # v7x vs v5e/v6e
    budget = int(cap * frac)
    per_plane = h * w * 4
    # 2 inputs x 2 pipeline buffers + ~6 live full-plane f32 intermediates.
    cap_by_vmem = max(1, budget // (10 * per_plane))
    tile_cap = min(n, cap_by_vmem)
    if n > 1:
        # >= 2 grid steps so both v7x TensorCores get work.
        tile_cap = min(tile_cap, max(1, n // 2))
    divisors = [d for d in range(1, n + 1) if n % d == 0 and d <= tile_cap]
    even_steps = [d for d in divisors if (n // d) % 2 == 0]
    tile_n = max(even_steps) if even_steps else max(divisors)
    return tile_n, budget


def _ssim_kernel(c2_ref, bw_ref, bh_ref, img1_ref, img2_ref, o_ref):
    # c2_ref: (1,) f32 in SMEM.  bw: (W, OW), bh: (OH, H) band matrices in VMEM.
    # img refs: (TILE_N, H, W) f32 in VMEM.
    a = img1_ref[...]
    b = img2_ref[...]
    t, h, w = a.shape
    ow = bw_ref.shape[1]
    oh = bh_ref.shape[0]
    c2 = c2_ref[0]

    # Broadcast the tiny band matrices across the plane (batch) axis so both
    # separable passes are batched MXU matmuls (same pattern as bqd,bkd->bqk).
    bw = jnp.broadcast_to(bw_ref[...], (t, w, ow))
    bh = jnp.broadcast_to(bh_ref[...], (t, oh, h))
    dn = (((2,), (1,)), ((0,), (0,)))   # contract last lhs dim with middle rhs dim

    def gconv(x):
        # Width (lane) pass: (t,h,w) x (t,w,ow) -> (t,h,ow)
        y = jax.lax.dot_general(x, bw, dn,
                                precision=jax.lax.Precision.HIGHEST,
                                preferred_element_type=jnp.float32)
        # Height (sublane) pass: (t,oh,h) x (t,h,ow) -> (t,oh,ow)
        return jax.lax.dot_general(bh, y, dn,
                                   precision=jax.lax.Precision.HIGHEST,
                                   preferred_element_type=jnp.float32)

    # Narrow live ranges: mu1/mu2 -> v1 (drops E[xy]) -> v2 (drops E[xx], E[yy]).
    mu1 = gconv(a)
    mu2 = gconv(b)
    v1 = 2.0 * (gconv(a * b) - mu1 * mu2) + c2
    v2 = (gconv(a * a) - mu1 * mu1) + (gconv(b * b) - mu2 * mu2) + c2

    # EUP approximate reciprocal + one Newton refinement (~f32 accuracy).
    inv = pl.reciprocal(v2, approx=True)
    inv = inv * (2.0 - v2 * inv)
    ratio = v1 * inv

    # Per-tile partial sum, broadcast across a full 128-lane row (unmasked vst).
    o_ref[...] = jnp.full((1, 1, 128), jnp.sum(ratio), dtype=jnp.float32)


@functools.partial(jax.jit, static_argnames=("window_size", "val_range"))
def ssim_train_forward(img1: jax.Array, img2: jax.Array,
                       window_size: int = WINDOW_SIZE,
                       val_range=None) -> jax.Array:
    """Equivalent of SSIM_train()(img1, img2). Inputs NCHW float32. Returns scalar."""
    assert img1.shape == img2.shape and img1.ndim == 4
    bsz, ch, h, w = img1.shape
    ws = min(window_size, h, w)           # matches real_size in ssim_train
    n = bsz * ch
    oh, ow = h - ws + 1, w - ws + 1

    # Depthwise conv with one shared window -> treat B*C planes independently.
    x1 = img1.reshape(n, h, w).astype(jnp.float32)
    x2 = img2.reshape(n, h, w).astype(jnp.float32)

    # Dynamic-range selection (val_range=None branch), hoisted out of the kernel.
    # Passing a static val_range skips this extra full HBM pass over img1.
    if val_range is None:
        max_val = jnp.where(jnp.max(x1) > 128.0, 255.0, 1.0)
        min_val = jnp.where(jnp.min(x1) < -0.5, -1.0, 0.0)
        l_range = max_val - min_val
    else:
        l_range = jnp.float32(val_range)
    c2 = jnp.reshape((0.03 * l_range) ** 2, (1,)).astype(jnp.float32)

    bw_np, bh_np = _band_matrices(ws, h, w)
    bw = jnp.asarray(bw_np)
    bh = jnp.asarray(bh_np)

    # Tile over the plane axis with a divisor of n (no padding, no masking).
    tile_n, vmem_budget = _choose_tiling(n, h, w)
    num_tiles = n // tile_n

    partials = pl.pallas_call(
        _ssim_kernel,
        out_shape=jax.ShapeDtypeStruct((num_tiles, 1, 128), jnp.float32),
        grid=(num_tiles,),
        in_specs=[
            pl.BlockSpec(memory_space=pltpu.MemorySpace.SMEM),       # C2 scalar
            pl.BlockSpec((w, ow), lambda i: (0, 0)),                 # Bw band matrix
            pl.BlockSpec((oh, h), lambda i: (0, 0)),                 # Bh band matrix
            pl.BlockSpec((tile_n, h, w), lambda i: (i, 0, 0)),       # img1 tile
            pl.BlockSpec((tile_n, h, w), lambda i: (i, 0, 0)),       # img2 tile
        ],
        out_specs=pl.BlockSpec((1, 1, 128), lambda i: (i, 0, 0)),
        compiler_params=pltpu.CompilerParams(
            dimension_semantics=("parallel",),
            vmem_limit_bytes=vmem_budget,
        ),
    )(c2, bw, bh, x1, x2)

    cs = jnp.sum(partials[:, 0, 0]) / float(n * oh * ow)
    return (1.0 - cs).astype(jnp.float32)


def _ssim_train_reference(img1, img2, window_size: int = WINDOW_SIZE):
    """Pure-JAX reference (2D window, direct divide) for validation."""
    bsz, ch, h, w = img1.shape
    n = bsz * ch
    a = img1.reshape(n, h, w).astype(jnp.float32)
    b = img2.reshape(n, h, w).astype(jnp.float32)
    g = _gaussian_1d(window_size)
    win = np.outer(g, g).astype(np.float32)
    oh, ow = h - window_size + 1, w - window_size + 1

    max_val = jnp.where(jnp.max(a) > 128.0, 255.0, 1.0)
    min_val = jnp.where(jnp.min(a) < -0.5, -1.0, 0.0)
    c2 = (0.03 * (max_val - min_val)) ** 2

    mu1 = jnp.zeros((n, oh, ow)); mu2 = jnp.zeros((n, oh, ow))
    e11 = jnp.zeros((n, oh, ow)); e22 = jnp.zeros((n, oh, ow))
    e12 = jnp.zeros((n, oh, ow))
    for dy in range(window_size):
        for dx in range(window_size):
            c = float(win[dy, dx])
            sa = a[:, dy:dy + oh, dx:dx + ow]
            sb = b[:, dy:dy + oh, dx:dx + ow]
            mu1 += c * sa; mu2 += c * sb
            e11 += c * sa * sa; e22 += c * sb * sb; e12 += c * sa * sb
    v1 = 2.0 * (e12 - mu1 * mu2) + c2
    v2 = (e11 - mu1 * mu1) + (e22 - mu2 * mu2) + c2
    return 1.0 - jnp.mean(v1 / v2)


if __name__ == "__main__":
    key = jax.random.PRNGKey(0)
    k1, k2 = jax.random.split(key)
    B, C, H, W = 2, 4, 16, 16
    img1 = jax.random.uniform(k1, (B, C, H, W), dtype=jnp.float32)
    img2 = jax.random.uniform(k2, (B, C, H, W), dtype=jnp.float32)

    out = ssim_train_forward(img1, img2)
    jax.block_until_ready(out)

    ref = _ssim_train_reference(img1, img2)
    jax.block_until_ready(ref)
    # Tolerance accounts for the MXU f32 pass decomposition and the EUP
    # reciprocal + Newton step (both ~1e-7 relative); 1e-4 still catches any
    # indexing / weighting bug by orders of magnitude.
    np.testing.assert_allclose(np.asarray(out), np.asarray(ref),
                               rtol=1e-4, atol=1e-4)

    print("KERNEL_OK")
</pallas_src>

<mosaic_0001>
module attributes {stable_mosaic.version = 11 : i64} {
  func.func @_ssim_kernel(%arg0: i32, %arg1: memref<1xf32, #tpu.memory_space<smem>>, %arg2: memref<16x6xf32, #tpu.memory_space<vmem>>, %arg3: memref<6x16xf32, #tpu.memory_space<vmem>>, %arg4: memref<4x16x16xf32, #tpu.memory_space<vmem>>, %arg5: memref<4x16x16xf32, #tpu.memory_space<vmem>>, %arg6: memref<1x1x128xf32, #tpu.memory_space<vmem>>) attributes {dimension_semantics = [#tpu.dimension_semantics<parallel>], iteration_bounds = array<i64: 2>, scalar_prefetch = 0 : i64, scratch_operands = 0 : i64, tpu.core_type = #tpu.core_type<tc>, window_params = [{transform_indices = @transform_0, window_bounds = array<i64: 1>}, {pipeline_mode = #tpu.pipeline_mode<synchronous>, transform_indices = @transform_1, window_bounds = array<i64: 16, 6>}, {pipeline_mode = #tpu.pipeline_mode<synchronous>, transform_indices = @transform_2, window_bounds = array<i64: 6, 16>}, {transform_indices = @transform_3, window_bounds = array<i64: 4, 16, 16>}, {transform_indices = @transform_4, window_bounds = array<i64: 4, 16, 16>}, {transform_indices = @transform_5, window_bounds = array<i64: 1, 1, 128>}]} {
    %c0 = arith.constant 0 : index
    %c0_0 = arith.constant 0 : index
    %c0_1 = arith.constant 0 : index
    %0 = vector.load %arg4[%c0, %c0_0, %c0_1] : memref<4x16x16xf32, #tpu.memory_space<vmem>>, vector<4x16x16xf32>
    %c0_2 = arith.constant 0 : index
    %c0_3 = arith.constant 0 : index
    %c0_4 = arith.constant 0 : index
    %1 = vector.load %arg5[%c0_2, %c0_3, %c0_4] : memref<4x16x16xf32, #tpu.memory_space<vmem>>, vector<4x16x16xf32>
    %c0_5 = arith.constant 0 : index
    %2 = memref.load %arg1[%c0_5] : memref<1xf32, #tpu.memory_space<smem>>
    %c0_6 = arith.constant 0 : index
    %c0_7 = arith.constant 0 : index
    %3 = vector.load %arg2[%c0_6, %c0_7] : memref<16x6xf32, #tpu.memory_space<vmem>>, vector<16x6xf32>
    %4 = vector.shape_cast %3 : vector<16x6xf32> to vector<1x16x6xf32>
    %5 = vector.broadcast %4 : vector<1x16x6xf32> to vector<4x16x6xf32>
    %c0_8 = arith.constant 0 : index
    %c0_9 = arith.constant 0 : index
    %6 = vector.load %arg3[%c0_8, %c0_9] : memref<6x16xf32, #tpu.memory_space<vmem>>, vector<6x16xf32>
    %7 = vector.shape_cast %6 : vector<6x16xf32> to vector<1x6x16xf32>
    %8 = vector.broadcast %7 : vector<1x6x16xf32> to vector<4x6x16xf32>
    %cst = arith.constant dense<0.000000e+00> : vector<4x16x6xf32>
    %9 = tpu.matmul %0, %5, %cst {dimension_numbers = #tpu.dot_dimension_numbers<[2], [1], [1], [2], [0, 0, 0, 1, 1, 2], [0], [0]>, precision = #tpu.contract_precision<fp32>} : vector<4x16x16xf32>, vector<4x16x6xf32>, vector<4x16x6xf32> -> vector<4x16x6xf32>
    %cst_10 = arith.constant dense<0.000000e+00> : vector<4x6x6xf32>
    %10 = tpu.matmul %8, %9, %cst_10 {dimension_numbers = #tpu.dot_dimension_numbers<[2], [1], [1], [2], [0, 0, 0, 1, 1, 2], [0], [0]>, precision = #tpu.contract_precision<fp32>} : vector<4x6x16xf32>, vector<4x16x6xf32>, vector<4x6x6xf32> -> vector<4x6x6xf32>
    %cst_11 = arith.constant dense<0.000000e+00> : vector<4x16x6xf32>
    %11 = tpu.matmul %1, %5, %cst_11 {dimension_numbers = #tpu.dot_dimension_numbers<[2], [1], [1], [2], [0, 0, 0, 1, 1, 2], [0], [0]>, precision = #tpu.contract_precision<fp32>} : vector<4x16x16xf32>, vector<4x16x6xf32>, vector<4x16x6xf32> -> vector<4x16x6xf32>
    %cst_12 = arith.constant dense<0.000000e+00> : vector<4x6x6xf32>
    %12 = tpu.matmul %8, %11, %cst_12 {dimension_numbers = #tpu.dot_dimension_numbers<[2], [1], [1], [2], [0, 0, 0, 1, 1, 2], [0], [0]>, precision = #tpu.contract_precision<fp32>} : vector<4x6x16xf32>, vector<4x16x6xf32>, vector<4x6x6xf32> -> vector<4x6x6xf32>
    %13 = arith.mulf %0, %1 : vector<4x16x16xf32>
    %cst_13 = arith.constant dense<0.000000e+00> : vector<4x16x6xf32>
    %14 = tpu.matmul %13, %5, %cst_13 {dimension_numbers = #tpu.dot_dimension_numbers<[2], [1], [1], [2], [0, 0, 0, 1, 1, 2], [0], [0]>, precision = #tpu.contract_precision<fp32>} : vector<4x16x16xf32>, vector<4x16x6xf32>, vector<4x16x6xf32> -> vector<4x16x6xf32>
    %cst_14 = arith.constant dense<0.000000e+00> : vector<4x6x6xf32>
    %15 = tpu.matmul %8, %14, %cst_14 {dimension_numbers = #tpu.dot_dimension_numbers<[2], [1], [1], [2], [0, 0, 0, 1, 1, 2], [0], [0]>, precision = #tpu.contract_precision<fp32>} : vector<4x6x16xf32>, vector<4x16x6xf32>, vector<4x6x6xf32> -> vector<4x6x6xf32>
    %16 = arith.mulf %10, %12 : vector<4x6x6xf32>
    %17 = arith.subf %15, %16 : vector<4x6x6xf32>
    %cst_15 = arith.constant 2.000000e+00 : f32
    %18 = vector.broadcast %cst_15 : f32 to vector<4x6x6xf32>
    %19 = arith.mulf %18, %17 : vector<4x6x6xf32>
    %20 = vector.broadcast %2 : f32 to vector<4x6x6xf32>
    %21 = arith.addf %19, %20 : vector<4x6x6xf32>
    %22 = arith.mulf %0, %0 : vector<4x16x16xf32>
    %cst_16 = arith.constant dense<0.000000e+00> : vector<4x16x6xf32>
    %23 = tpu.matmul %22, %5, %cst_16 {dimension_numbers = #tpu.dot_dimension_numbers<[2], [1], [1], [2], [0, 0, 0, 1, 1, 2], [0], [0]>, precision = #tpu.contract_precision<fp32>} : vector<4x16x16xf32>, vector<4x16x6xf32>, vector<4x16x6xf32> -> vector<4x16x6xf32>
    %cst_17 = arith.constant dense<0.000000e+00> : vector<4x6x6xf32>
    %24 = tpu.matmul %8, %23, %cst_17 {dimension_numbers = #tpu.dot_dimension_numbers<[2], [1], [1], [2], [0, 0, 0, 1, 1, 2], [0], [0]>, precision = #tpu.contract_precision<fp32>} : vector<4x6x16xf32>, vector<4x16x6xf32>, vector<4x6x6xf32> -> vector<4x6x6xf32>
    %25 = arith.mulf %10, %10 : vector<4x6x6xf32>
    %26 = arith.subf %24, %25 : vector<4x6x6xf32>
    %27 = arith.mulf %1, %1 : vector<4x16x16xf32>
    %cst_18 = arith.constant dense<0.000000e+00> : vector<4x16x6xf32>
    %28 = tpu.matmul %27, %5, %cst_18 {dimension_numbers = #tpu.dot_dimension_numbers<[2], [1], [1], [2], [0, 0, 0, 1, 1, 2], [0], [0]>, precision = #tpu.contract_precision<fp32>} : vector<4x16x16xf32>, vector<4x16x6xf32>, vector<4x16x6xf32> -> vector<4x16x6xf32>
    %cst_19 = arith.constant dense<0.000000e+00> : vector<4x6x6xf32>
    %29 = tpu.matmul %8, %28, %cst_19 {dimension_numbers = #tpu.dot_dimension_numbers<[2], [1], [1], [2], [0, 0, 0, 1, 1, 2], [0], [0]>, precision = #tpu.contract_precision<fp32>} : vector<4x6x16xf32>, vector<4x16x6xf32>, vector<4x6x6xf32> -> vector<4x6x6xf32>
    %30 = arith.mulf %12, %12 : vector<4x6x6xf32>
    %31 = arith.subf %29, %30 : vector<4x6x6xf32>
    %32 = arith.addf %26, %31 : vector<4x6x6xf32>
    %33 = vector.broadcast %2 : f32 to vector<4x6x6xf32>
    %34 = arith.addf %32, %33 : vector<4x6x6xf32>
    %35 = tpu.reciprocal %34 {approx = true} : vector<4x6x6xf32> -> vector<4x6x6xf32>
    %36 = arith.mulf %34, %35 : vector<4x6x6xf32>
    %cst_20 = arith.constant 2.000000e+00 : f32
    %37 = vector.broadcast %cst_20 : f32 to vector<4x6x6xf32>
    %38 = arith.subf %37, %36 : vector<4x6x6xf32>
    %39 = arith.mulf %35, %38 : vector<4x6x6xf32>
    %40 = arith.mulf %21, %39 : vector<4x6x6xf32>
    %41 = vector.shape_cast %40 : vector<4x6x6xf32> to vector<1x4x6x6xf32>
    %cst_21 = arith.constant dense<0.000000e+00> : vector<1xf32>
    %42 = vector.multi_reduction <add>, %41, %cst_21 [1, 2, 3] : vector<1x4x6x6xf32> to vector<1xf32>
    %43 = vector.shape_cast %42 : vector<1xf32> to vector<1x1x1x1xf32>
    %44 = vector.extract %43[0, 0, 0, 0] : f32 from vector<1x1x1x1xf32>
    %45 = vector.broadcast %44 : f32 to vector<1x1x128xf32>
    %c0_22 = arith.constant 0 : index
    %c0_23 = arith.constant 0 : index
    %c0_24 = arith.constant 0 : index
    %46 = vector.load %arg6[%c0_22, %c0_23, %c0_24] : memref<1x1x128xf32, #tpu.memory_space<vmem>>, vector<1x1x128xf32>
    tpu.vector_store %arg6[%c0_22, %c0_23, %c0_24], %45 {strides = array<i32>} : memref<1x1x128xf32, #tpu.memory_space<vmem>>, vector<1x1x128xf32>,
    return
  }
  func.func @transform_0(%arg0: i32) -> i32 {
    %c0_i32 = arith.constant 0 : i32
    %c0_i32_0 = arith.constant 0 : i32
    return %c0_i32 : i32
  }
  func.func @transform_1(%arg0: i32) -> (i32, i32) {
    %c0_i32 = arith.constant 0 : i32
    %c0_i32_0 = arith.constant 0 : i32
    %c0_i32_1 = arith.constant 0 : i32
    return %c0_i32, %c0_i32_0 : i32, i32
  }
  func.func @transform_2(%arg0: i32) -> (i32, i32) {
    %c0_i32 = arith.constant 0 : i32
    %c0_i32_0 = arith.constant 0 : i32
    %c0_i32_1 = arith.constant 0 : i32
    return %c0_i32, %c0_i32_0 : i32, i32
  }
  func.func @transform_3(%arg0: i32) -> (i32, i32, i32) {
    %c0_i32 = arith.constant 0 : i32
    %c0_i32_0 = arith.constant 0 : i32
    %c0_i32_1 = arith.constant 0 : i32
    return %arg0, %c0_i32, %c0_i32_0 : i32, i32, i32
  }
  func.func @transform_4(%arg0: i32) -> (i32, i32, i32) {
    %c0_i32 = arith.constant 0 : i32
    %c0_i32_0 = arith.constant 0 : i32
    %c0_i32_1 = arith.constant 0 : i32
    return %arg0, %c0_i32, %c0_i32_0 : i32, i32, i32
  }
  func.func @transform_5(%arg0: i32) -> (i32, i32, i32) {
    %c0_i32 = arith.constant 0 : i32
    %c0_i32_0 = arith.constant 0 : i32
    %c0_i32_1 = arith.constant 0 : i32
    return %arg0, %c0_i32, %c0_i32_0 : i32, i32, i32
  }
}

</mosaic_0001>

<bundles_post_ra>
// kernel: ssim_train_forward.1
= control target key start
LH: loop header
LB: loop body
LE: loop exit
PB: predicated region body
PF: predicated region fallthrough
CT: control target
= control target key end

     0   :  { %s24645_s0 = inlined_call_operand.<no memory space> [shape: f32[1], index: 0, kind: input, shape index: {}]   ;;  %s24646_s1 = inlined_call_operand.vmem [shape: f32[16,6], index: 1, kind: input, shape index: {}]   ;;  %s24647_s2 = inlined_call_operand.vmem [shape: f32[6,16], index: 2, kind: input, shape index: {}]   ;;  %s24648_s3 = inlined_call_operand.vmem [shape: f32[8,16,16], index: 3, kind: input, shape index: {}]   ;;  %s24649_s4 = inlined_call_operand.hbm [shape: f32[8,16,16], index: 4, kind: input, shape index: {}]   ;;  %s24650_s5 = inlined_call_operand.vmem [shape: f32[2,1,128], index: 5, kind: output, shape index: {}]  }
   0x1   :  { %10 = sst [smem:[#allocation2]] %s24645_s0 }
   0x2   :  { %11 = vsyncpa [#allocation4], 0 }
   0x3   :  { %13 = vsyncpa [#allocation4 + $0x1], 0  ;;  %s22532_s20 = smov 0   ;;  %s22534_s21 = smov 0  }
   0x4   :  { %s22536_s22 = smov 0   ;;  %s22538_s23 = smov 0  }
   0x5 LB: > { %s22551_s0 = sadd.s32 4294967295, %s22492_s23   ;;  %s22554_s24 = sadd.s32 1, %s22492_s23   ;;  %s22492_s23 = sphi %s22538_s23, %s24659_s23   ;;  %s22488_s22 = sphi %s22536_s22, %s24658_s22   ;;  %s22484_s21 = sphi %s22534_s21, %s24657_s21   ;;  %s22480_s20 = sphi %s22532_s20, %s24656_s20  }
   0x6   : > { %s112_s25 = ssub.s32 %s22492_s23, %s22554_s24  ;;  %s115_s26 = sadd.s32 1, %s22488_s22 }
   0x7   : > { %p113_p0 = scmp.eq.s32.totalorder %s112_s25, 0  ;;  %p122_p1 = scmp.ne.s32.totalorder %s22488_s22, %s22484_s21 }
   0x8   : > { %p123_p2 = scmp.eq.s32.totalorder %s22492_s23, 0  ;;  %p128_p3 = scmp.ne.s32.totalorder %s22484_s21, %s22480_s20 }
   0x9   : > { %s22564_s27 = scalar_select %p113_p0, %s22488_s22, %s115_s26  }
   0xa   : > { %p124_p4 = por %p123_p2, %p122_p1  ;;  %p129_p5 = scmp.eq.s32.totalorder %s22551_s0, 0 }
   0xb   : > { %p22353_p6 = scmp.lt.s32.totalorder %s22492_s23, 2  ;;  %s197_s29 = sand.u32 1, %s22488_s22  }
   0xc   : > { %p22568_p7 = por %p129_p5, %p128_p3  ;;  %s19811_s30 = sshll.u32 %s197_s29, 6 }
   0xd   : > { %s19823_s6 = sshll.u32 %s22492_s23, 10  ;;  %s201_s10 = scalar_lea.vmem [#allocation3], %s19811_s30 }
   0xe   : > { %s24652_s28 = scalar_select %p22568_p7, 1, 0 }
   0xf   : > { %s22577_s9 = scalar_lea.hbm %s24649_s4, %s19823_s6  ;;  %s209_s11 = sshll.u32 %s201_s10, 4  ;;  %s22579_s11 = int_to_ptr.vmem [resolvable:$true] %s209_s11 }
  0x10   : > { %p22581_p8 = pnand %p22353_p6, %p124_p4  ;;  %s22586_s13 = scalar_lea.sflag [#allocation4], %s197_s29 }
  0x11   : > { %s22430_s14 = scalar_lea.hbm %s22577_s9, 1024  ;;  %s22435_s17 = scalar_lea.hbm %s24649_s4, 2048 }
  0x12   : > { %p22431_p10 = scmp.ne.s32.totalorder %s22577_s9, %s22430_s14  ;;  %p22432_p11 = pneg %p22581_p8 }
  0x13   : > { %p22436_p0 = scmp.lt.s32.totalorder %s22577_s9, %s24649_s4  ;;  %p22437_p1 = scmp.lt.s32.totalorder %s22435_s17, %s22430_s14 }
  0x14   : > { %p22433_p12 = pnand %p22432_p11, %p22431_p10 }
  0x15   : > { %p22438_p2 = por %p22437_p1, %p22436_p0 }
  0x16   : > { %p22434_p13 = pneg %p22433_p12 }
  0x18   : > { %p22439_p3 = pnand %p22438_p2, %p22434_p13 }
  0x1a   : > { %22442 = shalt.err (!%p22439_p3)
}
  0x1b   : > { %s22443_s20 = scalar_lea.vmem %s22579_s11, 1024  ;;  %s22494_s25 = smov [#allocation3]  }
  0x1c   : > { %p22444_p4 = scmp.ne.s32.totalorder %s22579_s11, %s22443_s20  ;;  %s22448_s26 = sshll.u32 %s22494_s25, 4  ;;  %s22449_s26 = int_to_ptr.vmem [resolvable:$false] %s22448_s26 }
  0x1d   : > { %s22450_s29 = scalar_lea.vmem %s22449_s26, 2048  ;;  %p22451_p10 = scmp.lt.s32.totalorder %s22579_s11, %s22449_s26 }
  0x1e   : > { %p22446_p5 = pnand %p22444_p4, %p22432_p11  ;;  %p22452_p12 = scmp.lt.s32.totalorder %s22450_s29, %s22443_s20 }
  0x20   : > { %p22447_p6 = pneg %p22446_p5  ;;  %p22453_p9 = por %p22452_p12, %p22451_p10 }
  0x22   : > { %p22454_p7 = pnand %p22453_p9, %p22447_p6 }
  0x24   : > { %22457 = shalt.err (!%p22454_p7)
}
  0x25   : > { %s22495_s30 = smov 128   ;;  %s22496_s6 = smov 8  }
  0x26   : > { %22352 = dma.hbm_to_vmem [thread:$0]  (!%p22581_p8), %s22577_s9, 1024, %s22579_s11, %s22586_s13, %s22495_s30, %s22495_s30, %s22496_s6  }
  0x27   : > { %p217_p11 = scmp.lt.s32.totalorder %s22492_s23, 3  ;;  %p24654_p13 = scmp.ge.s32.totalorder %s22492_s23, 1 }
  0x29   : > { %p218_p0 = pnand %p24654_p13, %p217_p11 }
  0x2a   : > { %s223_s7 = sand.u32 (!%p218_p0), 1, %s22484_s21   ;;  %p24655_p7 = scmp.ne.s32.totalorder (!%p218_p0), %s24652_s28, 0 }
  0x2b   : > { %221 = sbr.rel (%p218_p0) target bundleno = 1932 (0x78c), region = 40  ;;  %s19816_s8 = sshll.u32 (!%p218_p0), %s223_s7, 6 }
  0x2c   : > { %s224_s10 = scalar_lea.sflag (!%p218_p0), [#allocation4], %s223_s7  ;;  %s22611_s14 = scalar_lea.vmem (!%p218_p0), [#allocation3], %s19816_s8 }
  0x30   : > { %22475 = dma.done.wait (%p24655_p7), %s224_s10, 1024  }
  0x31   : > { %22477 = vsyncadd (%p24655_p7), %s224_s10, 4294966272  ;;  %s19817_s15 = sshll.u32 %s22551_s0, 2  ;;  %vm289_vm0 = vcmask 130048   ;;  %v286_v0 = vld [vmem:[%s24646_s1] sm:$0xff]  ;;  %v287_v1 = vld [vmem:[%s24646_s1 + $0x8] sm:$0xff]  ;;  %vm22498_vm1 = vmmov 0  }
  0x32   : > { %p259_p9 = scmp.lt.s32.totalorder %s19817_s15, 7  ;;  %v22630_v3 = vand.u32 4294901760, %v287_v1  ;;  %v22632_v4 = vand.u32 4294901760, %v286_v0  ;;  %s285_s20 = sld [smem:[#allocation2]]  ;;  %vm19718_vm2 = vcmask 46080  }
  0x33   : > { %p266_p8 = scmp.lt.s32.totalorder %s22551_s0, 1 }
  0x34   : > { %s24661_s15 = smov (!%p259_p9, %s19817_s15), 7  ;;  %v22640_v9 = vsub.f32 %v287_v1, %v22630_v3  ;;  %v22643_v10 = vsub.f32 %v286_v0, %v22632_v4  ;;  %20665 = vmatprep.subr.mxu0 %v22630_v3 }
  0x35   : > { %s19824_s9 = sshll.u32 %s24661_s15, 4  ;;  %20666 = vmatpush3.msra.mxu0 %v22630_v3  ;;  %s24663_s0 = smov (!%p266_p8, %s22551_s0), 1 }
  0x36   : > { %s22621_s12 = scalar_lea.vmem %s24648_s3, %s19824_s9  ;;  %20667 = vmatprep.subr.mxu0 %v22632_v4  ;;  %v22655_v15 = vand.u32 4294901760, %v22640_v9  ;;  %v22659_v17 = vand.u32 4294901760, %v22643_v10  ;;  %s268_s29 = scalar_lea.vmem %s24650_s5, %s24663_s0 }
  0x37   : > { %v269_v2 = vld [vmem:[%s22621_s12] sm:$0xff]  ;;  %v270_v6 = vld [vmem:[%s22621_s12 + $0x8] sm:$0xff]  ;;  %v271_v12 = vld [vmem:[%s22621_s12 + $0x10] sm:$0xff]  ;;  %20668 = vmatpush3.msra.mxu0 %v22632_v4 }
  0x38   : > { %v291_v5 = vsel %vm289_vm0, %v269_v2, 0  ;;  %v294_v8 = vsel %vm289_vm0, %v270_v6, 0  ;;  %v272_v14 = vld [vmem:[%s22621_s12 + $0x18] sm:$0xff]  ;;  %v799_v19 = vsel %vm289_vm0, %v271_v12, 0  ;;  %v415_v20 = vsub.f32 %v22640_v9, %v22655_v15  ;;  %20679 = vmatprep.subr.mxu0 %v22640_v9  ;;  %v273_v37 = vld [vmem:[%s22621_s12 + $0x20] sm:$0xff]  ;;  %v274_v39 = vld [vmem:[%s22621_s12 + $0x28] sm:$0xff] }
  0x39   : > { %v22636_v7 = vand.u32 4294901760, %v291_v5  ;;  %v22646_v11 = vand.u32 4294901760, %v294_v8  ;;  %v422_v22 = vsub.f32 %v22643_v10, %v22659_v17  ;;  %v802_v23 = vsel %vm289_vm0, %v272_v14, 0  ;;  %v275_v51 = vld [vmem:[%s22621_s12 + $0x30] sm:$0xff]  ;;  %v276_v53 = vld [vmem:[%s22621_s12 + $0x38] sm:$0xff] }
  0x3a   : > { %v22669_v25 = vand.u32 4294901760, %v415_v20  ;;  %v22673_v28 = vand.u32 4294901760, %v799_v19  ;;  %v22675_v30 = vand.u32 4294901760, %v802_v23  ;;  %v1307_v40 = vsel %vm289_vm0, %v273_v37, 0 }
  0x3b   : > { %v364_v13 = vsub.f32 %v291_v5, %v22636_v7  ;;  %20676 = vmatprep.mubr.f32.mxu1 %v22636_v7  ;;  %v374_v16 = vsub.f32 %v294_v8, %v22646_v11  ;;  %v22671_v27 = vand.u32 4294901760, %v422_v22  ;;  %v1310_v42 = vsel %vm289_vm0, %v274_v39, 0 }
  0x3c   : > { %20672 = vmatprep.subr.mxu1 %v22669_v25  ;;  %v22681_v32 = vsub.f32 %v799_v19, %v22673_v28  ;;  %v22686_v33 = vsub.f32 %v802_v23, %v22675_v30  ;;  %v22718_v44 = vand.u32 4294901760, %v1307_v40  ;;  %v22722_v45 = vand.u32 4294901760, %v1310_v42 }
  0x3d   : > { %v365_v18 = vand.u32 4294901760, %v364_v13  ;;  %v375_v21 = vand.u32 4294901760, %v374_v16  ;;  %20673 = vmatpush3.msra.mxu1 %v22669_v25  ;;  %v1815_v54 = vsel %vm289_vm0, %v275_v51, 0  ;;  %v1818_v56 = vsel %vm289_vm0, %v276_v53, 0 }
  0x3e   : > { %20674 = vmatprep.subr.mxu1 %v22671_v27  ;;  %v873_v34 = vand.u32 4294901760, %v22681_v32  ;;  %v883_v35 = vand.u32 4294901760, %v22686_v33  ;;  %v22729_v46 = vsub.f32 %v1307_v40, %v22718_v44  ;;  %v22734_v47 = vsub.f32 %v1310_v42, %v22722_v45 }
  0x3f   : > { %v366_v24 = vsub.f32 %v364_v13, %v365_v18  ;;  %v376_v26 = vsub.f32 %v374_v16, %v375_v21  ;;  %20675 = vmatpush3.msra.mxu1 %v22671_v27  ;;  %v22768_v58 = vand.u32 4294901760, %v1815_v54  ;;  %v22772_v59 = vand.u32 4294901760, %v1818_v56 }
  0x40   : > { %20677 = vmatmul.mubr.f32.vlgmr.msra.gmra.mxu1 %v22646_v11  ;;  %20686 = vmatprep.subr.mxu1 %v22630_v3  ;;  %v874_v36 = vsub.f32 %v22681_v32, %v873_v34  ;;  %v884_v38 = vsub.f32 %v22686_v33, %v883_v35  ;;  %v1381_v48 = vand.u32 4294901760, %v22729_v46  ;;  %v1391_v49 = vand.u32 4294901760, %v22734_v47 }
  0x41   : > { %v367_v29 = vand.u32 4294901760, %v366_v24  ;;  %v377_v31 = vand.u32 4294901760, %v376_v26  ;;  %20687 = vmatpush3.msra.mxu1 %v22630_v3  ;;  %20690 = vmatprep.mubr.f32.mxu1 %v365_v18  ;;  %v1888_v60 = vsub.f32 %v1815_v54, %v22768_v58  ;;  %v1898_v61 = vsub.f32 %v1818_v56, %v22772_v59 }
  0x42   : > { %20688 = vmatprep.subr.mxu1 %v22632_v4  ;;  %v875_v41 = vand.u32 4294901760, %v874_v36  ;;  %v885_v43 = vand.u32 4294901760, %v884_v38  ;;  %v1382_v50 = vsub.f32 %v22729_v46, %v1381_v48  ;;  %v1392_v52 = vsub.f32 %v22734_v47, %v1391_v49 }
  0x43   : > { %20669 = vmatprep.mubr.f32.mxu0 %v367_v29  ;;  %20689 = vmatpush3.msra.mxu1 %v22632_v4  ;;  %v1889_v62 = vand.u32 4294901760, %v1888_v60  ;;  %v1899_v63 = vand.u32 4294901760, %v1898_v61  ;;  %v22497_v6 = vmov 0.0  }
  0x44   : > { %20670 = vmatmul.mubr.f32.vlgmr.msra.gmra.mxu0 %v377_v31  ;;  %20691 = vmatmul.mubr.f32.vlgmr.msra.gmra.mxu1 %v375_v21  ;;  %v1383_v55 = vand.u32 4294901760, %v1382_v50  ;;  %v1393_v57 = vand.u32 4294901760, %v1392_v52 }
  0x45   : > { %20680 = vmatpush3.msra.mxu0 %v22640_v9  ;;  %20683 = vmatprep.mubr.f32.mxu0 %v364_v13  ;;  %v1890_v0 = vsub.f32 %v1888_v60, %v1889_v62  ;;  %v1900_v1 = vsub.f32 %v1898_v61, %v1899_v63 }
  0x46   : > { %20681 = vmatprep.subr.mxu0 %v22643_v10  ;;  %20700 = vmatprep.subr.mxu1 %v22630_v3 }
  0x47   : > { %20682 = vmatpush3.msra.mxu0 %v22643_v10  ;;  %20701 = vmatpush3.msra.mxu1 %v22630_v3  ;;  %v1891_v2 = vand.u32 4294901760, %v1890_v0  ;;  %v1901_v5 = vand.u32 4294901760, %v1900_v1 }
  0x48   : > { %20684 = vmatmul.mubr.f32.vlgmr.msra.gmra.mxu0 %v374_v16  ;;  %20693 = vmatprep.subr.mxu0 %v22655_v15 }
  0x49   : > { %20694 = vmatpush3.msra.mxu0 %v22655_v15  ;;  %20697 = vmatprep.mubr.f32.mxu0 %v22636_v7 }
  0x4a   : > { %20695 = vmatprep.subr.mxu0 %v22659_v17  ;;  %20702 = vmatprep.subr.mxu1 %v22632_v4 }
  0x4b   : > { %20696 = vmatpush3.msra.mxu0 %v22659_v17  ;;  %20703 = vmatpush3.msra.mxu1 %v22632_v4 }
  0x4c   : > { %20698 = vmatmul.mubr.f32.vlgmr.msra.gmra.mxu0 %v22646_v11  ;;  %20707 = vmatprep.subr.mxu0 %v22630_v3 }
  0x4d   : > { %20704 = vmatprep.mubr.f32.mxu1 %v22636_v7  ;;  %20708 = vmatpush3.msra.mxu0 %v22630_v3  ;;  %v288_v7 = vld [vmem:[%s24647_s2] sm:$0x3f] }
  0x4e   : > { %20705 = vmatmul.mubr.f32.vlgmr.msra.gmra.mxu1 %v22646_v11  ;;  %20709 = vmatprep.subr.mxu0 %v22632_v4  ;;  %v2323_v8 = vsel %vm289_vm0, %v288_v7, 0 }
  0x4f   : > { %20714 = vmatprep.subr.mxu1 %v22669_v25  ;;  %20710 = vmatpush3.msra.mxu0 %v22632_v4  ;;  %v22843_v14 = vand.u32 4294901760, %v2323_v8 }
  0x50   : > { %20711 = vmatprep.mubr.f32.mxu0 %v875_v41  ;;  %20715 = vmatpush3.msra.mxu1 %v22669_v25 }
  0x51   : > { %20712 = vmatmul.mubr.f32.vlgmr.msra.gmra.mxu0 %v885_v43  ;;  %20716 = vmatprep.subr.mxu1 %v22671_v27  ;;  %v22846_v22 = vsub.f32 %v2323_v8, %v22843_v14 }
  0x52   : > { %20721 = vmatprep.subr.mxu0 %v22640_v9  ;;  %20717 = vmatpush3.msra.mxu1 %v22671_v27 }
  0x53   : > { %20718 = vmatprep.mubr.f32.mxu1 %v22673_v28  ;;  %20722 = vmatpush3.msra.mxu0 %v22640_v9 }
  0x54   : > { %20719 = vmatmul.mubr.f32.vlgmr.msra.gmra.mxu1 %v22675_v30  ;;  %20723 = vmatprep.subr.mxu0 %v22643_v10 }
  0x55   : > { %20728 = vmatprep.subr.mxu1 %v22630_v3  ;;  %20724 = vmatpush3.msra.mxu0 %v22643_v10 }
  0x56   : > { %20725 = vmatprep.mubr.f32.mxu0 %v22681_v32  ;;  %20729 = vmatpush3.msra.mxu1 %v22630_v3 }
  0x57   : > { %20726 = vmatmul.mubr.f32.vlgmr.msra.gmra.mxu0 %v22686_v33  ;;  %20730 = vmatprep.subr.mxu1 %v22632_v4 }
  0x58   : > { %20735 = vmatprep.subr.mxu0 %v22655_v15  ;;  %20731 = vmatpush3.msra.mxu1 %v22632_v4 }
  0x59   : > { %20732 = vmatprep.mubr.f32.mxu1 %v873_v34  ;;  %20736 = vmatpush3.msra.mxu0 %v22655_v15 }
  0x5a   : > { %20733 = vmatmul.mubr.f32.vlgmr.msra.gmra.mxu1 %v883_v35  ;;  %20737 = vmatprep.subr.mxu0 %v22659_v17 }
  0x5b   : > { %20742 = vmatprep.subr.mxu1 %v22630_v3  ;;  %20738 = vmatpush3.msra.mxu0 %v22659_v17 }
  0x5c   : > { %20739 = vmatprep.mubr.f32.mxu0 %v22673_v28  ;;  %20743 = vmatpush3.msra.mxu1 %v22630_v3 }
  0x5d   : > { %20740 = vmatmul.mubr.f32.vlgmr.msra.gmra.mxu0 %v22675_v30  ;;  %20744 = vmatprep.subr.mxu1 %v22632_v4 }
  0x5e   : > { %20749 = vmatprep.subr.mxu0 %v22630_v3  ;;  %20745 = vmatpush3.msra.mxu1 %v22632_v4 }
  0x5f   : > { %20746 = vmatprep.mubr.f32.mxu1 %v22673_v28  ;;  %20750 = vmatpush3.msra.mxu0 %v22630_v3 }
  0x60   : > { %20747 = vmatmul.mubr.f32.vlgmr.msra.gmra.mxu1 %v22675_v30  ;;  %20751 = vmatprep.subr.mxu0 %v22632_v4  ;;  %v22849_v30 = vand.u32 4294901760, %v22846_v22 }
  0x61   : > { %20756 = vmatprep.subr.mxu1 %v22669_v25  ;;  %20752 = vmatpush3.msra.mxu0 %v22632_v4 }
  0x62   : > { %20753 = vmatprep.mubr.f32.mxu0 %v1383_v55  ;;  %20757 = vmatpush3.msra.mxu1 %v22669_v25  ;;  %v2395_v37 = vsub.f32 %v22846_v22, %v22849_v30 }
  0x63   : > { %20754 = vmatmul.mubr.f32.vlgmr.msra.gmra.mxu0 %v1393_v57  ;;  %20758 = vmatprep.subr.mxu1 %v22671_v27 }
  0x64   : > { %20763 = vmatprep.subr.mxu0 %v22640_v9  ;;  %20759 = vmatpush3.msra.mxu1 %v22671_v27  ;;  %v22855_v43 = vand.u32 4294901760, %v2395_v37 }
  0x65   : > { %20760 = vmatprep.mubr.f32.mxu1 %v22718_v44  ;;  %20764 = vmatpush3.msra.mxu0 %v22640_v9 }
  0x66   : > { %20761 = vmatmul.mubr.f32.vlgmr.msra.gmra.mxu1 %v22722_v45  ;;  %20765 = vmatprep.subr.mxu0 %v22643_v10 }
  0x67   : > { %20770 = vmatprep.subr.mxu1 %v22630_v3  ;;  %20766 = vmatpush3.msra.mxu0 %v22643_v10 }
  0x68   : > { %20767 = vmatprep.mubr.f32.mxu0 %v22729_v46  ;;  %20771 = vmatpush3.msra.mxu1 %v22630_v3 }
  0x69   : > { %20768 = vmatmul.mubr.f32.vlgmr.msra.gmra.mxu0 %v22734_v47  ;;  %20772 = vmatprep.subr.mxu1 %v22632_v4 }
  0x6a   : > { %20777 = vmatprep.subr.mxu0 %v22655_v15  ;;  %20773 = vmatpush3.msra.mxu1 %v22632_v4 }
  0x6b   : > { %20774 = vmatprep.mubr.f32.mxu1 %v1381_v48  ;;  %20778 = vmatpush3.msra.mxu0 %v22655_v15 }
  0x6c   : > { %20775 = vmatmul.mubr.f32.vlgmr.msra.gmra.mxu1 %v1391_v49  ;;  %20779 = vmatprep.subr.mxu0 %v22659_v17 }
  0x6d   : > { %20784 = vmatprep.subr.mxu1 %v22630_v3  ;;  %20780 = vmatpush3.msra.mxu0 %v22659_v17 }
  0x6e   : > { %20781 = vmatprep.mubr.f32.mxu0 %v22718_v44  ;;  %20785 = vmatpush3.msra.mxu1 %v22630_v3 }
  0x6f   : > { %20782 = vmatmul.mubr.f32.vlgmr.msra.gmra.mxu0 %v22722_v45  ;;  %20786 = vmatprep.subr.mxu1 %v22632_v4 }
  0x70   : > { %20791 = vmatprep.subr.mxu0 %v22630_v3  ;;  %20787 = vmatpush3.msra.mxu1 %v22632_v4 }
  0x71   : > { %20788 = vmatprep.mubr.f32.mxu1 %v22718_v44  ;;  %20792 = vmatpush3.msra.mxu0 %v22630_v3 }
  0x72   : > { %20789 = vmatmul.mubr.f32.vlgmr.msra.gmra.mxu1 %v22722_v45  ;;  %20793 = vmatprep.subr.mxu0 %v22632_v4 }
  0x73   : > { %20798 = vmatprep.subr.mxu1 %v22669_v25  ;;  %20794 = vmatpush3.msra.mxu0 %v22632_v4 }
  0x74   : > { %20795 = vmatprep.mubr.f32.mxu0 %v1891_v2  ;;  %20799 = vmatpush3.msra.mxu1 %v22669_v25 }
  0x75   : > { %20796 = vmatmul.mubr.f32.vlgmr.msra.gmra.mxu0 %v1901_v5  ;;  %20800 = vmatprep.subr.mxu1 %v22671_v27 }
  0x76   : > { %20805 = vmatprep.subr.mxu0 %v22640_v9  ;;  %20801 = vmatpush3.msra.mxu1 %v22671_v27 }
  0x77   : > { %20802 = vmatprep.mubr.f32.mxu1 %v22768_v58  ;;  %20806 = vmatpush3.msra.mxu0 %v22640_v9 }
  0x78   : > { %20803 = vmatmul.mubr.f32.vlgmr.msra.gmra.mxu1 %v22772_v59  ;;  %20807 = vmatprep.subr.mxu0 %v22643_v10 }
  0x79   : > { %20812 = vmatprep.subr.mxu1 %v22630_v3  ;;  %20808 = vmatpush3.msra.mxu0 %v22643_v10 }
  0x7a   : > { %20809 = vmatprep.mubr.f32.mxu0 %v1888_v60  ;;  %20813 = vmatpush3.msra.mxu1 %v22630_v3 }
  0x7b   : > { %20810 = vmatmul.mubr.f32.vlgmr.msra.gmra.mxu0 %v1898_v61  ;;  %20814 = vmatprep.subr.mxu1 %v22632_v4 }
  0x7c   : > { %20819 = vmatprep.subr.mxu0 %v22655_v15  ;;  %20815 = vmatpush3.msra.mxu1 %v22632_v4 }
  0x7d   : > { %20816 = vmatprep.mubr.f32.mxu1 %v1889_v62  ;;  %20820 = vmatpush3.msra.mxu0 %v22655_v15 }
  0x7e   : > { %20817 = vmatmul.mubr.f32.vlgmr.msra.gmra.mxu1 %v1899_v63  ;;  %20821 = vmatprep.subr.mxu0 %v22659_v17 }
  0x7f   : > { %20826 = vmatprep.subr.mxu1 %v22630_v3  ;;  %20822 = vmatpush3.msra.mxu0 %v22659_v17 }
  0x80   : > { %20823 = vmatprep.mubr.f32.mxu0 %v22768_v58  ;;  %20827 = vmatpush3.msra.mxu1 %v22630_v3 }
  0x81   : > { %20824 = vmatmul.mubr.f32.vlgmr.msra.gmra.mxu0 %v22772_v59  ;;  %20828 = vmatprep.subr.mxu1 %v22632_v4 }
  0x82   : > { %20829 = vmatpush3.msra.mxu1 %v22632_v4  ;;  %20830 = vmatprep.mubr.f32.mxu1 %v22768_v58 }
  0x83   : > { %20831 = vmatmul.mubr.f32.vlgmr.msra.gmra.mxu1 %v22772_v59  ;;  %20833 = vmatprep.subr.mxu0 %v22497_v6 }
  0x84   : > { %20840 = vmatprep.subr.mxu1 %v22497_v6  ;;  %20837 = vmatprep.mubr.msk.f32.mxu0 %vm22498_vm1, %v22497_v6 }
  0x85   : > { %20844 = vmatprep.mubr.msk.f32.mxu1 %vm22498_vm1, %v22497_v6 }
 0x100   : > { %v20678_v13 = vpop.f32.mrf.mxu1 }
 0x102   : > { %v460_v18 = vpop.f32.mrf.mxu1 }
 0x104   : > { %v20671_v11 = vpop.f32.mrf.mxu0  ;;  %v20692_v26 = vpop.f32.mrf.mxu1 }
 0x105   : > { %v467_v16 = vadd.f32 %v20678_v13, %v20671_v11 }
 0x106   : > { %v369_v12 = vpop.f32.mrf.mxu0  ;;  %v624_v29 = vpop.f32.mrf.mxu1 }
 0x107   : > { %v461_v19 = vadd.f32 %v460_v18, %v369_v12 }
 0x108   : > { %v20685_v20 = vpop.f32.mrf.mxu0 }
 0x109   : > { %v550_v21 = vadd.f32 %v20685_v20, %v467_v16 }
 0x10a   : > { %v542_v23 = vpop.f32.mrf.mxu0 }
 0x10b   : > { %v543_v24 = vadd.f32 %v542_v23, %v461_v19  ;;  %v633_v28 = vadd.f32 %v20692_v26, %v550_v21 }
 0x10c   : > { %v20699_v32 = vpop.f32.mrf.mxu0 }
 0x10d   : > { %v625_v31 = vadd.f32 %v624_v29, %v543_v24  ;;  %v716_v33 = vadd.f32 %v20699_v32, %v633_v28 }
 0x10e   : > { %v709_v34 = vpop.f32.mrf.mxu0  ;;  %v20706_v36 = vpop.f32.mrf.mxu1 }
 0x10f   : > { %v710_v35 = vadd.f32 %v709_v34, %v625_v31  ;;  %v795_v38 = vadd.f32 %v20706_v36, %v716_v33 }
 0x110   : > { %v788_v39 = vpop.f32.mrf.mxu1 }
 0x111   : > { %v22853_v40 = vand.u32 4294901760, %v795_v38  ;;  %v789_v41 = vadd.f32 %v788_v39, %v710_v35  ;;  %v20713_v42 = vpop.f32.mrf.mxu0 }
 0x113   : > { %v2432_v44 = vsub.f32 %v795_v38, %v22853_v40  ;;  %v22858_v45 = vand.u32 4294901760, %v789_v41  ;;  %v877_v46 = vpop.f32.mrf.mxu0  ;;  %20834 = vmatpush3.msra.mxu0 %v22853_v40 }
 0x114   : > { %v20720_v47 = vpop.f32.mrf.mxu1  ;;  %20835 = vmatprep.subr.mxu0 %v22497_v6 }
 0x115   : > { %v2433_v48 = vand.u32 4294901760, %v2432_v44  ;;  %v2439_v49 = vsub.f32 %v789_v41, %v22858_v45  ;;  %v975_v50 = vadd.f32 %v20720_v47, %v20713_v42  ;;  %20836 = vmatpush3.msra.mxu0 %v22858_v45 }
 0x116   : > { %v968_v51 = vpop.f32.mrf.mxu1  ;;  %20847 = vmatprep.subr.mxu0 %v22497_v6  ;;  %20838 = vmatmul.mubr.f32.vlgmr.msra.gmra.mxu0 %v22855_v43 }
 0x117   : > { %v2434_v52 = vsub.f32 %v2432_v44, %v2433_v48  ;;  %v2440_v53 = vand.u32 4294901760, %v2439_v49  ;;  %v969_v54 = vadd.f32 %v968_v51, %v877_v46  ;;  %v20727_v55 = vpop.f32.mrf.mxu0  ;;  %20848 = vmatpush3.msra.mxu0 %v2432_v44  ;;  %20851 = vmatprep.mubr.msk.f32.mxu0 %vm22498_vm1, %v22497_v6 }
 0x118   : > { %v1058_v56 = vadd.f32 %v20727_v55, %v975_v50  ;;  %20849 = vmatprep.subr.mxu0 %v22497_v6 }
 0x119   : > { %v1050_v57 = vpop.f32.mrf.mxu0  ;;  %20850 = vmatpush3.msra.mxu0 %v2439_v49  ;;  %v2435_v58 = vand.u32 4294901760, %v2434_v52  ;;  %v2441_v59 = vsub.f32 %v2439_v49, %v2440_v53 }
 0x11a   : > { %v1051_v60 = vadd.f32 %v1050_v57, %v969_v54  ;;  %v20734_v61 = vpop.f32.mrf.mxu1  ;;  %20861 = vmatprep.subr.mxu0 %v22497_v6  ;;  %20852 = vmatmul.mubr.f32.vlgmr.msra.gmra.mxu0 %v22846_v22 }
 0x11b   : > { %v1141_v62 = vadd.f32 %v20734_v61, %v1058_v56  ;;  %20841 = vmatpush3.msra.mxu1 %v2435_v58  ;;  %20862 = vmatpush3.msra.mxu0 %v2433_v48  ;;  %v2442_v63 = vand.u32 4294901760, %v2441_v59 }
 0x11c   : > { %v1132_v0 = vpop.f32.mrf.mxu1  ;;  %20842 = vmatprep.subr.mxu1 %v22497_v6  ;;  %20863 = vmatprep.subr.mxu0 %v22497_v6 }
 0x11d   : > { %v1133_v1 = vadd.f32 %v1132_v0, %v1051_v60  ;;  %v20741_v2 = vpop.f32.mrf.mxu0  ;;  %20843 = vmatpush3.msra.mxu1 %v2442_v63  ;;  %20864 = vmatpush3.msra.mxu0 %v2440_v53 }
 0x11e   : > { %v1224_v5 = vadd.f32 %v20741_v2, %v1141_v62  ;;  %20845 = vmatmul.mubr.f32.vlgmr.msra.gmra.mxu1 %v22843_v14  ;;  %20854 = vmatprep.subr.mxu1 %v22497_v6 }
 0x11f   : > { %v1217_v7 = vpop.f32.mrf.mxu0  ;;  %20865 = vmatprep.mubr.msk.f32.mxu0 %vm22498_vm1, %v22497_v6  ;;  %20875 = vmatprep.subr.mxu0 %v22497_v6 }
 0x120   : > { %v1218_v8 = vadd.f32 %v1217_v7, %v1133_v1  ;;  %v20748_v11 = vpop.f32.mrf.mxu1  ;;  %20855 = vmatpush3.msra.mxu1 %v22853_v40  ;;  %20866 = vmatmul.mubr.f32.vlgmr.msra.gmra.mxu0 %v22843_v14 }
 0x121   : > { %v1303_v12 = vadd.f32 %v20748_v11, %v1224_v5  ;;  %20856 = vmatprep.subr.mxu1 %v22497_v6  ;;  %20858 = vmatprep.mubr.msk.f32.mxu1 %vm22498_vm1, %v22497_v6 }
 0x122   : > { %v1296_v13 = vpop.f32.mrf.mxu1  ;;  %20857 = vmatpush3.msra.mxu1 %v22858_v45  ;;  %20879 = vmatprep.mubr.msk.f32.mxu0 %vm22498_vm1, %v22497_v6 }
 0x123   : > { %v22886_v16 = vand.u32 4294901760, %v1303_v12  ;;  %v1297_v18 = vadd.f32 %v1296_v13, %v1218_v8  ;;  %v20755_v19 = vpop.f32.mrf.mxu0  ;;  %20859 = vmatmul.mubr.f32.vlgmr.msra.gmra.mxu1 %v22849_v30  ;;  %20868 = vmatprep.subr.mxu1 %v22497_v6 }
 0x124   : > { %20869 = vmatpush3.msra.mxu1 %v22853_v40  ;;  %20872 = vmatprep.mubr.msk.f32.mxu1 %vm22498_vm1, %v22497_v6 }
 0x125   : > { %v2891_v20 = vsub.f32 %v1303_v12, %v22886_v16  ;;  %v22894_v21 = vand.u32 4294901760, %v1297_v18  ;;  %v1385_v23 = vpop.f32.mrf.mxu0  ;;  %20876 = vmatpush3.msra.mxu0 %v22886_v16  ;;  %20870 = vmatprep.subr.mxu1 %v22497_v6 }
 0x126   : > { %v20762_v24 = vpop.f32.mrf.mxu1  ;;  %20877 = vmatprep.subr.mxu0 %v22497_v6  ;;  %20871 = vmatpush3.msra.mxu1 %v22858_v45 }
 0x127   : > { %v2892_v26 = vand.u32 4294901760, %v2891_v20  ;;  %v2898_v28 = vsub.f32 %v1297_v18, %v22894_v21  ;;  %v1483_v29 = vadd.f32 %v20762_v24, %v20755_v19  ;;  %20878 = vmatpush3.msra.mxu0 %v22894_v21  ;;  %20873 = vmatmul.mubr.f32.vlgmr.msra.gmra.mxu1 %v22843_v14 }
 0x128   : > { %v1476_v31 = vpop.f32.mrf.mxu1  ;;  %20889 = vmatprep.subr.mxu0 %v22497_v6  ;;  %20880 = vmatmul.mubr.f32.vlgmr.msra.gmra.mxu0 %v22855_v43 }
 0x129   : > { %v2893_v32 = vsub.f32 %v2891_v20, %v2892_v26  ;;  %v2899_v33 = vand.u32 4294901760, %v2898_v28  ;;  %v1477_v34 = vadd.f32 %v1476_v31, %v1385_v23  ;;  %v20769_v35 = vpop.f32.mrf.mxu0  ;;  %20890 = vmatpush3.msra.mxu0 %v2891_v20  ;;  %20882 = vmatprep.subr.mxu1 %v22497_v6 }
 0x12a   : > { %v1566_v36 = vadd.f32 %v20769_v35, %v1483_v29  ;;  %20891 = vmatprep.subr.mxu0 %v22497_v6  ;;  %20893 = vmatprep.mubr.msk.f32.mxu0 %vm22498_vm1, %v22497_v6 }
 0x12b   : > { %v1558_v37 = vpop.f32.mrf.mxu0  ;;  %20892 = vmatpush3.msra.mxu0 %v2898_v28  ;;  %v2894_v38 = vand.u32 4294901760, %v2893_v32  ;;  %v2900_v39 = vsub.f32 %v2898_v28, %v2899_v33  ;;  %20886 = vmatprep.mubr.msk.f32.mxu1 %vm22498_vm1, %v22497_v6  ;;  %v277_v28 = vld [vmem:[%s22611_s14] sm:$0xff]  ;;  %v278_v32 = vld [vmem:[%s22611_s14 + $0x8] sm:$0xff] }
 0x12c   : > { %v1559_v40 = vadd.f32 %v1558_v37, %v1477_v34  ;;  %v20776_v41 = vpop.f32.mrf.mxu1  ;;  %20903 = vmatprep.subr.mxu0 %v22497_v6  ;;  %20894 = vmatmul.mubr.f32.vlgmr.msra.gmra.mxu0 %v22846_v22 }
 0x12d   : > { %v1649_v42 = vadd.f32 %v20776_v41, %v1566_v36  ;;  %20883 = vmatpush3.msra.mxu1 %v2894_v38  ;;  %20904 = vmatpush3.msra.mxu0 %v2892_v26  ;;  %v2901_v44 = vand.u32 4294901760, %v2900_v39  ;;  %v4162_v38 = vsel %vm289_vm0, %v277_v28, 0  ;;  %v4165_v39 = vsel %vm289_vm0, %v278_v32, 0 }
 0x12e   : > { %v1640_v45 = vpop.f32.mrf.mxu1  ;;  %20884 = vmatprep.subr.mxu1 %v22497_v6  ;;  %20905 = vmatprep.subr.mxu0 %v22497_v6 }
 0x12f   : > { %v1641_v46 = vadd.f32 %v1640_v45, %v1559_v40  ;;  %v20783_v47 = vpop.f32.mrf.mxu0  ;;  %20885 = vmatpush3.msra.mxu1 %v2901_v44  ;;  %20906 = vmatpush3.msra.mxu0 %v2899_v33 }
 0x130   : > { %v1732_v48 = vadd.f32 %v20783_v47, %v1649_v42  ;;  %20887 = vmatmul.mubr.f32.vlgmr.msra.gmra.mxu1 %v22843_v14  ;;  %20896 = vmatprep.subr.mxu1 %v22497_v6  ;;  %v22979_v42 = vand.u32 4294901760, %v4162_v38 }
 0x131   : > { %v1725_v49 = vpop.f32.mrf.mxu0  ;;  %20907 = vmatprep.mubr.msk.f32.mxu0 %vm22498_vm1, %v22497_v6  ;;  %20917 = vmatprep.subr.mxu0 %v22497_v6 }
 0x132   : > { %v1726_v50 = vadd.f32 %v1725_v49, %v1641_v46  ;;  %v20790_v51 = vpop.f32.mrf.mxu1  ;;  %20897 = vmatpush3.msra.mxu1 %v22886_v16  ;;  %20908 = vmatmul.mubr.f32.vlgmr.msra.gmra.mxu0 %v22843_v14  ;;  %v22982_v46 = vand.u32 4294901760, %v4165_v39  ;;  %v22991_v49 = vsub.f32 %v4162_v38, %v22979_v42 }
 0x133   : > { %v1811_v52 = vadd.f32 %v20790_v51, %v1732_v48  ;;  %20898 = vmatprep.subr.mxu1 %v22497_v6  ;;  %20900 = vmatprep.mubr.msk.f32.mxu1 %vm22498_vm1, %v22497_v6 }
 0x134   : > { %v1804_v53 = vpop.f32.mrf.mxu1  ;;  %20899 = vmatpush3.msra.mxu1 %v22894_v21  ;;  %20921 = vmatprep.mubr.msk.f32.mxu0 %vm22498_vm1, %v22497_v6 }
 0x135   : > { %v22928_v54 = vand.u32 4294901760, %v1811_v52  ;;  %v1805_v55 = vadd.f32 %v1804_v53, %v1726_v50  ;;  %v20797_v56 = vpop.f32.mrf.mxu0  ;;  %20901 = vmatmul.mubr.f32.vlgmr.msra.gmra.mxu1 %v22849_v30  ;;  %20910 = vmatprep.subr.mxu1 %v22497_v6 }
 0x136   : > { %20911 = vmatpush3.msra.mxu1 %v22886_v16  ;;  %20914 = vmatprep.mubr.msk.f32.mxu1 %vm22498_vm1, %v22497_v6 }
 0x137   : > { %v3350_v57 = vsub.f32 %v1811_v52, %v22928_v54  ;;  %v22936_v58 = vand.u32 4294901760, %v1805_v55  ;;  %v1893_v59 = vpop.f32.mrf.mxu0  ;;  %20918 = vmatpush3.msra.mxu0 %v22928_v54  ;;  %20912 = vmatprep.subr.mxu1 %v22497_v6  ;;  %v22995_v52 = vsub.f32 %v4165_v39, %v22982_v46 }
 0x138   : > { %v20804_v60 = vpop.f32.mrf.mxu1  ;;  %20919 = vmatprep.subr.mxu0 %v22497_v6  ;;  %20913 = vmatpush3.msra.mxu1 %v22894_v21 }
 0x139   : > { %v3351_v61 = vand.u32 4294901760, %v3350_v57  ;;  %v3357_v62 = vsub.f32 %v1805_v55, %v22936_v58  ;;  %v1991_v63 = vadd.f32 %v20804_v60, %v20797_v56  ;;  %20920 = vmatpush3.msra.mxu0 %v22936_v58  ;;  %20915 = vmatmul.mubr.f32.vlgmr.msra.gmra.mxu1 %v22843_v14  ;;  %v4246_v55 = vand.u32 4294901760, %v22995_v52 }
 0x13a   : > { %v1984_v0 = vpop.f32.mrf.mxu1  ;;  %20931 = vmatprep.subr.mxu0 %v22497_v6  ;;  %20922 = vmatmul.mubr.f32.vlgmr.msra.gmra.mxu0 %v22855_v43 }
 0x13b   : > { %v3352_v1 = vsub.f32 %v3350_v57, %v3351_v61  ;;  %v3358_v2 = vand.u32 4294901760, %v3357_v62  ;;  %v1985_v5 = vadd.f32 %v1984_v0, %v1893_v59  ;;  %v20811_v7 = vpop.f32.mrf.mxu0  ;;  %20932 = vmatpush3.msra.mxu0 %v3350_v57  ;;  %20924 = vmatprep.subr.mxu1 %v22497_v6  ;;  %v279_v57 = vld [vmem:[%s22611_s14 + $0x10] sm:$0xff]  ;;  %v280_v59 = vld [vmem:[%s22611_s14 + $0x18] sm:$0xff] }
 0x13c   : > { %v2074_v8 = vadd.f32 %v20811_v7, %v1991_v63  ;;  %20933 = vmatprep.subr.mxu0 %v22497_v6  ;;  %20935 = vmatprep.mubr.msk.f32.mxu0 %vm22498_vm1, %v22497_v6  ;;  %v4670_v60 = vsel %vm289_vm0, %v279_v57, 0 }
 0x13d   : > { %v2066_v11 = vpop.f32.mrf.mxu0  ;;  %20934 = vmatpush3.msra.mxu0 %v3357_v62  ;;  %v3353_v12 = vand.u32 4294901760, %v3352_v1  ;;  %v3359_v13 = vsub.f32 %v3357_v62, %v3358_v2  ;;  %20928 = vmatprep.mubr.msk.f32.mxu1 %vm22498_vm1, %v22497_v6  ;;  %v4673_v62 = vsel %vm289_vm0, %v280_v59, 0  ;;  %v23029_v0 = vand.u32 4294901760, %v4670_v60 }
 0x13e   : > { %v2067_v16 = vadd.f32 %v2066_v11, %v1985_v5  ;;  %v20818_v18 = vpop.f32.mrf.mxu1  ;;  %20945 = vmatprep.subr.mxu0 %v22497_v6  ;;  %20936 = vmatmul.mubr.f32.vlgmr.msra.gmra.mxu0 %v22846_v22  ;;  %v23034_v1 = vand.u32 4294901760, %v4673_v62 }
 0x13f   : > { %v2157_v19 = vadd.f32 %v20818_v18, %v2074_v8  ;;  %20925 = vmatpush3.msra.mxu1 %v3353_v12  ;;  %20946 = vmatpush3.msra.mxu0 %v3351_v61  ;;  %v3360_v20 = vand.u32 4294901760, %v3359_v13  ;;  %v281_v12 = vld [vmem:[%s22611_s14 + $0x20] sm:$0xff] }
 0x140   : > { %v2148_v21 = vpop.f32.mrf.mxu1  ;;  %20926 = vmatprep.subr.mxu1 %v22497_v6  ;;  %20947 = vmatprep.subr.mxu0 %v22497_v6  ;;  %v23046_v5 = vsub.f32 %v4673_v62, %v23034_v1  ;;  %v5178_v18 = vsel %vm289_vm0, %v281_v12, 0 }
 0x141   : > { %v2149_v23 = vadd.f32 %v2148_v21, %v2067_v16  ;;  %v20825_v24 = vpop.f32.mrf.mxu0  ;;  %20927 = vmatpush3.msra.mxu1 %v3360_v20  ;;  %20948 = vmatpush3.msra.mxu0 %v3358_v2  ;;  %v23041_v2 = vsub.f32 %v4670_v60, %v23029_v0  ;;  %v282_v16 = vld [vmem:[%s22611_s14 + $0x28] sm:$0xff] }
 0x142   : > { %v2240_v26 = vadd.f32 %v20825_v24, %v2157_v19  ;;  %20929 = vmatmul.mubr.f32.vlgmr.msra.gmra.mxu1 %v22843_v14  ;;  %20938 = vmatprep.subr.mxu1 %v22497_v6  ;;  %v4754_v8 = vand.u32 4294901760, %v23046_v5  ;;  %v5181_v20 = vsel %vm289_vm0, %v282_v16, 0 }
 0x143   : > { %v2233_v29 = vpop.f32.mrf.mxu0  ;;  %v20832_v31 = vpop.f32.mrf.mxu1  ;;  %20949 = vmatprep.mubr.msk.f32.mxu0 %vm22498_vm1, %v22497_v6  ;;  %20959 = vmatprep.subr.mxu0 %v22497_v6  ;;  %v4744_v7 = vand.u32 4294901760, %v23041_v2  ;;  %v23088_v24 = vand.u32 4294901760, %v5181_v20 }
 0x144   : > { %v2234_v33 = vadd.f32 %v2233_v29, %v2149_v23  ;;  %v2319_v34 = vadd.f32 %v20832_v31, %v2240_v26  ;;  %20939 = vmatpush3.msra.mxu1 %v22928_v54  ;;  %20950 = vmatmul.mubr.f32.vlgmr.msra.gmra.mxu0 %v22843_v14  ;;  %v4755_v13 = vsub.f32 %v23046_v5, %v4754_v8  ;;  %v23084_v23 = vand.u32 4294901760, %v5178_v18 }
 0x145   : > { %v2312_v35 = vpop.f32.mrf.mxu1  ;;  %20940 = vmatprep.subr.mxu1 %v22497_v6  ;;  %20942 = vmatprep.mubr.msk.f32.mxu1 %vm22498_vm1, %v22497_v6  ;;  %v4745_v11 = vsub.f32 %v23041_v2, %v4744_v7  ;;  %v23100_v28 = vsub.f32 %v5181_v20, %v23088_v24 }
 0x146   : > { %v3731_v36 = vand.u32 4294901760, %v2319_v34  ;;  %v2313_v37 = vadd.f32 %v2312_v35, %v2234_v33  ;;  %20941 = vmatpush3.msra.mxu1 %v22936_v58  ;;  %20963 = vmatprep.mubr.msk.f32.mxu0 %vm22498_vm1, %v22497_v6  ;;  %v4756_v21 = vand.u32 4294901760, %v4755_v13  ;;  %v23095_v26 = vsub.f32 %v5178_v18, %v23084_v23  ;;  %v283_v33 = vld [vmem:[%s22611_s14 + $0x30] sm:$0xff]  ;;  %v284_v35 = vld [vmem:[%s22611_s14 + $0x38] sm:$0xff] }
 0x147   : > { %20943 = vmatmul.mubr.f32.vlgmr.msra.gmra.mxu1 %v22849_v30  ;;  %20952 = vmatprep.subr.mxu1 %v22497_v6  ;;  %v4746_v19 = vand.u32 4294901760, %v4745_v11  ;;  %v5262_v31 = vand.u32 4294901760, %v23100_v28  ;;  %v5689_v38 = vsel %vm289_vm0, %v284_v35, 0 }
 0x148   : > { %v3809_v40 = vsub.f32 %v2319_v34, %v3731_v36  ;;  %v3734_v41 = vand.u32 4294901760, %v2313_v37  ;;  %20960 = vmatpush3.msra.mxu0 %v3731_v36  ;;  %20953 = vmatpush3.msra.mxu1 %v22928_v54  ;;  %v4236_v54 = vand.u32 4294901760, %v22991_v49  ;;  %v5252_v29 = vand.u32 4294901760, %v23095_v26 }
 0x149   : > { %20961 = vmatprep.subr.mxu0 %v22497_v6  ;;  %20954 = vmatprep.subr.mxu1 %v22497_v6  ;;  %v5263_v34 = vsub.f32 %v23100_v28, %v5262_v31 }
 0x14a   : > { %v3810_v44 = vand.u32 4294901760, %v3809_v40  ;;  %v3816_v45 = vsub.f32 %v2313_v37, %v3734_v41  ;;  %20962 = vmatpush3.msra.mxu0 %v3734_v41  ;;  %20955 = vmatpush3.msra.mxu1 %v22936_v58  ;;  %v4237_v56 = vsub.f32 %v22991_v49, %v4236_v54  ;;  %v4247_v58 = vsub.f32 %v22995_v52, %v4246_v55 }
 0x14b   : > { %20973 = vmatprep.subr.mxu0 %v22497_v6  ;;  %20964 = vmatmul.mubr.f32.vlgmr.msra.gmra.mxu0 %v22855_v43  ;;  %v5253_v32 = vsub.f32 %v23095_v26, %v5252_v29  ;;  %v5264_v39 = vand.u32 4294901760, %v5263_v34 }
 0x14c   : > { %v3811_v47 = vsub.f32 %v3809_v40, %v3810_v44  ;;  %v3817_v48 = vand.u32 4294901760, %v3816_v45  ;;  %20974 = vmatpush3.msra.mxu0 %v3809_v40  ;;  %20956 = vmatprep.mubr.msk.f32.mxu1 %vm22498_vm1, %v22497_v6  ;;  %v4238_v61 = vand.u32 4294901760, %v4237_v56  ;;  %v4248_v63 = vand.u32 4294901760, %v4247_v58 }
 0x14d   : > { %20975 = vmatprep.subr.mxu0 %v22497_v6  ;;  %20957 = vmatmul.mubr.f32.vlgmr.msra.gmra.mxu1 %v22843_v14  ;;  %v5254_v37 = vand.u32 4294901760, %v5253_v32 }
 0x14e   : > { %20976 = vmatpush3.msra.mxu0 %v3816_v45  ;;  %20966 = vmatprep.subr.mxu1 %v22497_v6  ;;  %v3812_v50 = vand.u32 4294901760, %v3811_v47  ;;  %v3818_v51 = vsub.f32 %v3816_v45, %v3817_v48 }
 0x14f   : > { %20977 = vmatprep.mubr.msk.f32.mxu0 %vm22498_vm1, %v22497_v6  ;;  %20987 = vmatprep.subr.mxu0 %v22497_v6 }
 0x150   : > { %20967 = vmatpush3.msra.mxu1 %v3812_v50  ;;  %20978 = vmatmul.mubr.f32.vlgmr.msra.gmra.mxu0 %v22846_v22  ;;  %v3819_v53 = vand.u32 4294901760, %v3818_v51 }
 0x151   : > { %20988 = vmatpush3.msra.mxu0 %v3810_v44  ;;  %20968 = vmatprep.subr.mxu1 %v22497_v6 }
 0x152   : > { %20989 = vmatprep.subr.mxu0 %v22497_v6  ;;  %20969 = vmatpush3.msra.mxu1 %v3819_v53 }
 0x153   : > { %20970 = vmatprep.mubr.msk.f32.mxu1 %vm22498_vm1, %v22497_v6  ;;  %20990 = vmatpush3.msra.mxu0 %v3817_v48 }
 0x154   : > { %20971 = vmatmul.mubr.f32.vlgmr.msra.gmra.mxu1 %v22843_v14  ;;  %20980 = vmatprep.subr.mxu1 %v22497_v6 }
 0x155   : > { %20981 = vmatpush3.msra.mxu1 %v3731_v36  ;;  %20984 = vmatprep.mubr.msk.f32.mxu1 %vm22498_vm1, %v22497_v6 }
 0x156   : > { %20982 = vmatprep.subr.mxu1 %v22497_v6  ;;  %20991 = vmatprep.mubr.msk.f32.mxu0 %vm22498_vm1, %v22497_v6 }
 0x157   : > { %20983 = vmatpush3.msra.mxu1 %v3734_v41  ;;  %20992 = vmatmul.mubr.f32.vlgmr.msra.gmra.mxu0 %v22843_v14 }
 0x158   : > { %20985 = vmatmul.mubr.f32.vlgmr.msra.gmra.mxu1 %v22849_v30  ;;  %20994 = vmatprep.subr.mxu1 %v22497_v6 }
 0x159   : > { %21001 = vmatprep.subr.mxu0 %v22630_v3  ;;  %20995 = vmatpush3.msra.mxu1 %v3731_v36  ;;  %v5686_v36 = vsel %vm289_vm0, %v283_v33, 0 }
 0x15a   : > { %21002 = vmatpush3.msra.mxu0 %v22630_v3  ;;  %20996 = vmatprep.subr.mxu1 %v22497_v6  ;;  %v23136_v40 = vand.u32 4294901760, %v5686_v36 }
 0x15b   : > { %21003 = vmatprep.subr.mxu0 %v22632_v4  ;;  %20997 = vmatpush3.msra.mxu1 %v3734_v41  ;;  %v23140_v41 = vand.u32 4294901760, %v5689_v38 }
 0x15c   : > { %20998 = vmatprep.mubr.msk.f32.mxu1 %vm22498_vm1, %v22497_v6  ;;  %21004 = vmatpush3.msra.mxu0 %v22632_v4 }
 0x15d   : > { %21005 = vmatprep.mubr.f32.mxu0 %v4238_v61  ;;  %20999 = vmatmul.mubr.f32.vlgmr.msra.gmra.mxu1 %v22843_v14  ;;  %v5769_v44 = vsub.f32 %v5689_v38, %v23140_v41 }
 0x15e   : > { %21006 = vmatmul.mubr.f32.vlgmr.msra.gmra.mxu0 %v4248_v63  ;;  %21008 = vmatprep.subr.mxu1 %v22669_v25 }
 0x15f   : > { %21015 = vmatprep.subr.mxu0 %v22640_v9  ;;  %21009 = vmatpush3.msra.mxu1 %v22669_v25 }
 0x160   : > { %21016 = vmatpush3.msra.mxu0 %v22640_v9  ;;  %21010 = vmatprep.subr.mxu1 %v22671_v27 }
 0x161   : > { %21017 = vmatprep.subr.mxu0 %v22643_v10  ;;  %21011 = vmatpush3.msra.mxu1 %v22671_v27 }
 0x162   : > { %21012 = vmatprep.mubr.f32.mxu1 %v22979_v42  ;;  %21018 = vmatpush3.msra.mxu0 %v22643_v10 }
 0x163   : > { %21019 = vmatprep.mubr.f32.mxu0 %v22991_v49  ;;  %21013 = vmatmul.mubr.f32.vlgmr.msra.gmra.mxu1 %v22982_v46 }
 0x164   : > { %21020 = vmatmul.mubr.f32.vlgmr.msra.gmra.mxu0 %v22995_v52  ;;  %21022 = vmatprep.subr.mxu1 %v22630_v3 }
 0x165   : > { %21029 = vmatprep.subr.mxu0 %v22655_v15  ;;  %21023 = vmatpush3.msra.mxu1 %v22630_v3 }
 0x166   : > { %21030 = vmatpush3.msra.mxu0 %v22655_v15  ;;  %21024 = vmatprep.subr.mxu1 %v22632_v4 }
 0x167   : > { %21031 = vmatprep.subr.mxu0 %v22659_v17  ;;  %21025 = vmatpush3.msra.mxu1 %v22632_v4 }
 0x168   : > { %21026 = vmatprep.mubr.f32.mxu1 %v4236_v54  ;;  %21032 = vmatpush3.msra.mxu0 %v22659_v17 }
 0x169   : > { %21033 = vmatprep.mubr.f32.mxu0 %v22979_v42  ;;  %21027 = vmatmul.mubr.f32.vlgmr.msra.gmra.mxu1 %v4246_v55 }
 0x16a   : > { %21034 = vmatmul.mubr.f32.vlgmr.msra.gmra.mxu0 %v22982_v46  ;;  %21036 = vmatprep.subr.mxu1 %v22630_v3 }
 0x16b   : > { %21043 = vmatprep.subr.mxu0 %v22630_v3  ;;  %21037 = vmatpush3.msra.mxu1 %v22630_v3 }
 0x16c   : > { %21044 = vmatpush3.msra.mxu0 %v22630_v3  ;;  %21038 = vmatprep.subr.mxu1 %v22632_v4 }
 0x16d   : > { %21045 = vmatprep.subr.mxu0 %v22632_v4  ;;  %21039 = vmatpush3.msra.mxu1 %v22632_v4 }
 0x16e   : > { %21040 = vmatprep.mubr.f32.mxu1 %v22979_v42  ;;  %21046 = vmatpush3.msra.mxu0 %v22632_v4  ;;  %v5759_v42 = vsub.f32 %v5686_v36, %v23136_v40 }
 0x16f   : > { %21047 = vmatprep.mubr.f32.mxu0 %v4746_v19  ;;  %21041 = vmatmul.mubr.f32.vlgmr.msra.gmra.mxu1 %v22982_v46  ;;  %v5770_v46 = vand.u32 4294901760, %v5769_v44 }
 0x170   : > { %21048 = vmatmul.mubr.f32.vlgmr.msra.gmra.mxu0 %v4756_v21  ;;  %21050 = vmatprep.subr.mxu1 %v22669_v25  ;;  %v5760_v45 = vand.u32 4294901760, %v5759_v42 }
 0x171   : > { %21057 = vmatprep.subr.mxu0 %v22640_v9  ;;  %21051 = vmatpush3.msra.mxu1 %v22669_v25  ;;  %v5771_v48 = vsub.f32 %v5769_v44, %v5770_v46 }
 0x172   : > { %21058 = vmatpush3.msra.mxu0 %v22640_v9  ;;  %21052 = vmatprep.subr.mxu1 %v22671_v27  ;;  %v5761_v47 = vsub.f32 %v5759_v42, %v5760_v45 }
 0x173   : > { %21059 = vmatprep.subr.mxu0 %v22643_v10  ;;  %21053 = vmatpush3.msra.mxu1 %v22671_v27  ;;  %v5772_v50 = vand.u32 4294901760, %v5771_v48 }
 0x174   : > { %21054 = vmatprep.mubr.f32.mxu1 %v23029_v0  ;;  %21060 = vmatpush3.msra.mxu0 %v22643_v10  ;;  %v5762_v49 = vand.u32 4294901760, %v5761_v47 }
 0x175   : > { %21061 = vmatprep.mubr.f32.mxu0 %v23041_v2  ;;  %21055 = vmatmul.mubr.f32.vlgmr.msra.gmra.mxu1 %v23034_v1 }
 0x176   : > { %21062 = vmatmul.mubr.f32.vlgmr.msra.gmra.mxu0 %v23046_v5  ;;  %21064 = vmatprep.subr.mxu1 %v22630_v3 }
 0x177   : > { %21071 = vmatprep.subr.mxu0 %v22655_v15  ;;  %21065 = vmatpush3.msra.mxu1 %v22630_v3 }
 0x178   : > { %21072 = vmatpush3.msra.mxu0 %v22655_v15  ;;  %21066 = vmatprep.subr.mxu1 %v22632_v4 }
 0x179   : > { %21073 = vmatprep.subr.mxu0 %v22659_v17  ;;  %21067 = vmatpush3.msra.mxu1 %v22632_v4 }
 0x17a   : > { %21068 = vmatprep.mubr.f32.mxu1 %v4744_v7  ;;  %21074 = vmatpush3.msra.mxu0 %v22659_v17 }
 0x17b   : > { %21075 = vmatprep.mubr.f32.mxu0 %v23029_v0  ;;  %21069 = vmatmul.mubr.f32.vlgmr.msra.gmra.mxu1 %v4754_v8 }
 0x17c   : > { %21076 = vmatmul.mubr.f32.vlgmr.msra.gmra.mxu0 %v23034_v1  ;;  %21078 = vmatprep.subr.mxu1 %v22630_v3 }
 0x17d   : > { %21085 = vmatprep.subr.mxu0 %v22630_v3  ;;  %21079 = vmatpush3.msra.mxu1 %v22630_v3 }
 0x17e   : > { %21086 = vmatpush3.msra.mxu0 %v22630_v3  ;;  %21080 = vmatprep.subr.mxu1 %v22632_v4 }
 0x17f   : > { %21087 = vmatprep.subr.mxu0 %v22632_v4  ;;  %21081 = vmatpush3.msra.mxu1 %v22632_v4 }
 0x180   : > { %21082 = vmatprep.mubr.f32.mxu1 %v23029_v0  ;;  %21088 = vmatpush3.msra.mxu0 %v22632_v4 }
 0x181   : > { %21089 = vmatprep.mubr.f32.mxu0 %v5254_v37  ;;  %21083 = vmatmul.mubr.f32.vlgmr.msra.gmra.mxu1 %v23034_v1 }
 0x182   : > { %21090 = vmatmul.mubr.f32.vlgmr.msra.gmra.mxu0 %v5264_v39  ;;  %21092 = vmatprep.subr.mxu1 %v22669_v25 }
 0x183   : > { %21099 = vmatprep.subr.mxu0 %v22640_v9  ;;  %21093 = vmatpush3.msra.mxu1 %v22669_v25 }
 0x184   : > { %21100 = vmatpush3.msra.mxu0 %v22640_v9  ;;  %21094 = vmatprep.subr.mxu1 %v22671_v27 }
 0x185   : > { %21101 = vmatprep.subr.mxu0 %v22643_v10  ;;  %21095 = vmatpush3.msra.mxu1 %v22671_v27 }
 0x186   : > { %21096 = vmatprep.mubr.f32.mxu1 %v23084_v23  ;;  %21102 = vmatpush3.msra.mxu0 %v22643_v10 }
 0x187   : > { %21103 = vmatprep.mubr.f32.mxu0 %v23095_v26  ;;  %21097 = vmatmul.mubr.f32.vlgmr.msra.gmra.mxu1 %v23088_v24 }
 0x188   : > { %21104 = vmatmul.mubr.f32.vlgmr.msra.gmra.mxu0 %v23100_v28  ;;  %21106 = vmatprep.subr.mxu1 %v22630_v3 }
 0x189   : > { %21113 = vmatprep.subr.mxu0 %v22655_v15  ;;  %21107 = vmatpush3.msra.mxu1 %v22630_v3 }
 0x18a   : > { %21114 = vmatpush3.msra.mxu0 %v22655_v15  ;;  %21108 = vmatprep.subr.mxu1 %v22632_v4 }
 0x18b   : > { %21115 = vmatprep.subr.mxu0 %v22659_v17  ;;  %21109 = vmatpush3.msra.mxu1 %v22632_v4 }
 0x18c   : > { %21110 = vmatprep.mubr.f32.mxu1 %v5252_v29  ;;  %21116 = vmatpush3.msra.mxu0 %v22659_v17 }
 0x18d   : > { %21117 = vmatprep.mubr.f32.mxu0 %v23084_v23  ;;  %21111 = vmatmul.mubr.f32.vlgmr.msra.gmra.mxu1 %v5262_v31 }
 0x18e   : > { %21118 = vmatmul.mubr.f32.vlgmr.msra.gmra.mxu0 %v23088_v24  ;;  %21120 = vmatprep.subr.mxu1 %v22630_v3 }
 0x18f   : > { %21127 = vmatprep.subr.mxu0 %v22630_v3  ;;  %21121 = vmatpush3.msra.mxu1 %v22630_v3 }
 0x190   : > { %21128 = vmatpush3.msra.mxu0 %v22630_v3  ;;  %21122 = vmatprep.subr.mxu1 %v22632_v4 }
 0x191   : > { %21129 = vmatprep.subr.mxu0 %v22632_v4  ;;  %21123 = vmatpush3.msra.mxu1 %v22632_v4 }
 0x192   : > { %21124 = vmatprep.mubr.f32.mxu1 %v23084_v23  ;;  %21130 = vmatpush3.msra.mxu0 %v22632_v4 }
 0x193   : > { %21131 = vmatprep.mubr.f32.mxu0 %v5762_v49  ;;  %21125 = vmatmul.mubr.f32.vlgmr.msra.gmra.mxu1 %v23088_v24 }
 0x194   : > { %21132 = vmatmul.mubr.f32.vlgmr.msra.gmra.mxu0 %v5772_v50  ;;  %21134 = vmatprep.subr.mxu1 %v22669_v25 }
 0x195   : > { %21141 = vmatprep.subr.mxu0 %v22640_v9  ;;  %21135 = vmatpush3.msra.mxu1 %v22669_v25 }
 0x196   : > { %21142 = vmatpush3.msra.mxu0 %v22640_v9  ;;  %21136 = vmatprep.subr.mxu1 %v22671_v27 }
 0x197   : > { %21143 = vmatprep.subr.mxu0 %v22643_v10  ;;  %21137 = vmatpush3.msra.mxu1 %v22671_v27 }
 0x198   : > { %21138 = vmatprep.mubr.f32.mxu1 %v23136_v40  ;;  %21144 = vmatpush3.msra.mxu0 %v22643_v10 }
 0x199   : > { %21145 = vmatprep.mubr.f32.mxu0 %v5759_v42  ;;  %21139 = vmatmul.mubr.f32.vlgmr.msra.gmra.mxu1 %v23140_v41 }
 0x19a   : > { %21146 = vmatmul.mubr.f32.vlgmr.msra.gmra.mxu0 %v5769_v44  ;;  %21148 = vmatprep.subr.mxu1 %v22630_v3 }
 0x19b   : > { %21155 = vmatprep.subr.mxu0 %v22655_v15  ;;  %21149 = vmatpush3.msra.mxu1 %v22630_v3 }
 0x19c   : > { %21156 = vmatpush3.msra.mxu0 %v22655_v15  ;;  %21150 = vmatprep.subr.mxu1 %v22632_v4 }
 0x19d   : > { %21157 = vmatprep.subr.mxu0 %v22659_v17  ;;  %21151 = vmatpush3.msra.mxu1 %v22632_v4 }
 0x19e   : > { %21152 = vmatprep.mubr.f32.mxu1 %v5760_v45  ;;  %21158 = vmatpush3.msra.mxu0 %v22659_v17 }
 0x19f   : > { %21159 = vmatprep.mubr.f32.mxu0 %v23136_v40  ;;  %21153 = vmatmul.mubr.f32.vlgmr.msra.gmra.mxu1 %v5770_v46 }
 0x1a0   : > { %21160 = vmatmul.mubr.f32.vlgmr.msra.gmra.mxu0 %v23140_v41  ;;  %21162 = vmatprep.subr.mxu1 %v22630_v3 }
 0x1a1   : > { %21163 = vmatpush3.msra.mxu1 %v22630_v3  ;;  %21166 = vmatprep.mubr.f32.mxu1 %v23136_v40 }
 0x1a2   : > { %21164 = vmatprep.subr.mxu1 %v22632_v4  ;;  %21169 = vmatprep.subr.mxu0 %v22497_v6 }
 0x1a3   : > { %21165 = vmatpush3.msra.mxu1 %v22632_v4  ;;  %21173 = vmatprep.mubr.msk.f32.mxu0 %vm22498_vm1, %v22497_v6 }
 0x1a4   : > { %21167 = vmatmul.mubr.f32.vlgmr.msra.gmra.mxu1 %v23140_v41  ;;  %21176 = vmatprep.subr.mxu1 %v22497_v6 }
 0x1a5   : > { %21180 = vmatprep.mubr.msk.f32.mxu1 %vm22498_vm1, %v22497_v6 }
 0x1d6   : > { %v2398_v51 = vpop.f32.mrf.mxu0 }
 0x1d8   : > { %v20839_v52 = vpop.f32.mrf.mxu0 }
 0x1da   : > { %v2555_v53 = vpop.f32.mrf.mxu0 }
 0x1dc   : > { %v20853_v54 = vpop.f32.mrf.mxu0 }
 0x1de   : > { %v2479_v55 = vpop.f32.mrf.mxu1 }
 0x1df   : > { %v2480_v56 = vadd.f32 %v2479_v55, %v2398_v51 }
 0x1e0   : > { %v20846_v57 = vpop.f32.mrf.mxu1  ;;  %v2707_v58 = vpop.f32.mrf.mxu0 }
 0x1e1   : > { %v2556_v59 = vadd.f32 %v2555_v53, %v2480_v56 }
 0x1e2   : > { %v20867_v60 = vpop.f32.mrf.mxu0 }
 0x1e3   : > { %v2630_v61 = vpop.f32.mrf.mxu1 }
 0x1e4   : > { %v2631_v62 = vadd.f32 %v2630_v61, %v2556_v59 }
 0x1e5   : > { %v20860_v63 = vpop.f32.mrf.mxu1 }
 0x1e6   : > { %v2708_v0 = vadd.f32 %v2707_v58, %v2631_v62 }
 0x1e7   : > { %v2780_v1 = vpop.f32.mrf.mxu1 }
 0x1e8   : > { %v23209_v2 = vadd.f32 %v2780_v1, %v2708_v0  ;;  %v2857_v5 = vpop.f32.mrf.mxu0 }
 0x1e9   : > { %v20874_v7 = vpop.f32.mrf.mxu1 }
 0x1ea   : > { %v20881_v8 = vpop.f32.mrf.mxu0 }
 0x1ec   : > { %v3014_v11 = vpop.f32.mrf.mxu0 }
 0x1ee   : > { %v20895_v12 = vpop.f32.mrf.mxu0 }
 0x1f0   : > { %v2938_v13 = vpop.f32.mrf.mxu1 }
 0x1f1   : > { %v2939_v16 = vadd.f32 %v2938_v13, %v2857_v5 }
 0x1f2   : > { %v20888_v18 = vpop.f32.mrf.mxu1  ;;  %v3166_v19 = vpop.f32.mrf.mxu0 }
 0x1f3   : > { %v3015_v20 = vadd.f32 %v3014_v11, %v2939_v16 }
 0x1f4   : > { %v20909_v21 = vpop.f32.mrf.mxu0 }
 0x1f5   : > { %v3089_v23 = vpop.f32.mrf.mxu1 }
 0x1f6   : > { %v3090_v24 = vadd.f32 %v3089_v23, %v3015_v20 }
 0x1f7   : > { %v20902_v26 = vpop.f32.mrf.mxu1 }
 0x1f8   : > { %v3167_v28 = vadd.f32 %v3166_v19, %v3090_v24 }
 0x1f9   : > { %v3239_v29 = vpop.f32.mrf.mxu1 }
 0x1fa   : > { %v23211_v31 = vadd.f32 %v3239_v29, %v3167_v28  ;;  %v3316_v32 = vpop.f32.mrf.mxu0 }
 0x1fb   : > { %v20916_v33 = vpop.f32.mrf.mxu1 }
 0x1fc   : > { %v20923_v34 = vpop.f32.mrf.mxu0 }
 0x1fe   : > { %v3473_v35 = vpop.f32.mrf.mxu0 }
 0x200   : > { %v20937_v36 = vpop.f32.mrf.mxu0 }
 0x202   : > { %v3397_v37 = vpop.f32.mrf.mxu1 }
 0x203   : > { %v3398_v38 = vadd.f32 %v3397_v37, %v3316_v32 }
 0x204   : > { %v20930_v39 = vpop.f32.mrf.mxu1  ;;  %v3625_v40 = vpop.f32.mrf.mxu0 }
 0x205   : > { %v3474_v41 = vadd.f32 %v3473_v35, %v3398_v38 }
 0x206   : > { %v20951_v42 = vpop.f32.mrf.mxu0 }
 0x207   : > { %v3548_v44 = vpop.f32.mrf.mxu1 }
 0x208   : > { %v3549_v45 = vadd.f32 %v3548_v44, %v3474_v41 }
 0x209   : > { %v20944_v46 = vpop.f32.mrf.mxu1 }
 0x20a   : > { %v3626_v47 = vadd.f32 %v3625_v40, %v3549_v45 }
 0x20b   : > { %v3775_v48 = vpop.f32.mrf.mxu0 }
 0x20d   : > { %v3698_v49 = vpop.f32.mrf.mxu1  ;;  %v20965_v50 = vpop.f32.mrf.mxu0 }
 0x20e   : > { %v23213_v51 = vadd.f32 %v3698_v49, %v3626_v47 }
 0x20f   : > { %v20958_v52 = vpop.f32.mrf.mxu1 }
 0x210   : > { %v3932_v53 = vpop.f32.mrf.mxu0 }
 0x212   : > { %v20979_v54 = vpop.f32.mrf.mxu0 }
 0x214   : > { %v3856_v55 = vpop.f32.mrf.mxu1 }
 0x215   : > { %v3857_v56 = vadd.f32 %v3856_v55, %v3775_v48 }
 0x216   : > { %v20972_v57 = vpop.f32.mrf.mxu1 }
 0x217   : > { %v3933_v58 = vadd.f32 %v3932_v53, %v3857_v56  ;;  %v4084_v59 = vpop.f32.mrf.mxu0 }
 0x218   : > { %v4007_v60 = vpop.f32.mrf.mxu1 }
 0x219   : > { %v4008_v61 = vadd.f32 %v4007_v60, %v3933_v58  ;;  %v20993_v62 = vpop.f32.mrf.mxu0 }
 0x21a   : > { %v20986_v63 = vpop.f32.mrf.mxu1 }
 0x21b   : > { %v4085_v0 = vadd.f32 %v4084_v59, %v4008_v61 }
 0x21d   : > { %v4157_v1 = vpop.f32.mrf.mxu1 }
 0x21e   : > { %v23215_v5 = vadd.f32 %v4157_v1, %v4085_v0  ;;  %v21007_v7 = vpop.f32.mrf.mxu0 }
 0x21f   : > { %v21000_v8 = vpop.f32.mrf.mxu1 }
 0x220   : > { %v4240_v11 = vpop.f32.mrf.mxu0 }
 0x223   : > { %v21014_v12 = vpop.f32.mrf.mxu1 }
 0x224   : > { %v4338_v13 = vadd.f32 %v21014_v12, %v21007_v7  ;;  %v21021_v16 = vpop.f32.mrf.mxu0 }
 0x225   : > { %v4331_v18 = vpop.f32.mrf.mxu1 }
 0x226   : > { %v4421_v19 = vadd.f32 %v21021_v16, %v4338_v13  ;;  %v4332_v20 = vadd.f32 %v4331_v18, %v4240_v11  ;;  %v4413_v21 = vpop.f32.mrf.mxu0 }
 0x228   : > { %v4414_v23 = vadd.f32 %v4413_v21, %v4332_v20 }
 0x229   : > { %v21028_v24 = vpop.f32.mrf.mxu1 }
 0x22a   : > { %v4504_v26 = vadd.f32 %v21028_v24, %v4421_v19  ;;  %v21035_v28 = vpop.f32.mrf.mxu0 }
 0x22b   : > { %v4495_v29 = vpop.f32.mrf.mxu1 }
 0x22c   : > { %v4587_v32 = vadd.f32 %v21035_v28, %v4504_v26  ;;  %v4496_v33 = vadd.f32 %v4495_v29, %v4414_v23  ;;  %v4580_v34 = vpop.f32.mrf.mxu0 }
 0x22e   : > { %v4581_v35 = vadd.f32 %v4580_v34, %v4496_v33 }
 0x22f   : > { %v21042_v36 = vpop.f32.mrf.mxu1 }
 0x230   : > { %v4666_v37 = vadd.f32 %v21042_v36, %v4587_v32  ;;  %v21049_v38 = vpop.f32.mrf.mxu0 }
 0x231   : > { %v4659_v39 = vpop.f32.mrf.mxu1 }
 0x232   : > { %v23217_v40 = vand.u32 4294901760, %v4666_v37  ;;  %v4660_v41 = vadd.f32 %v4659_v39, %v4581_v35  ;;  %v4748_v42 = vpop.f32.mrf.mxu0 }
 0x234   : > { %v6300_v44 = vsub.f32 %v4666_v37, %v23217_v40  ;;  %v23220_v45 = vand.u32 4294901760, %v4660_v41  ;;  %21170 = vmatpush3.msra.mxu0 %v23217_v40 }
 0x235   : > { %v21056_v46 = vpop.f32.mrf.mxu1  ;;  %21171 = vmatprep.subr.mxu0 %v22497_v6 }
 0x236   : > { %v6301_v47 = vand.u32 4294901760, %v6300_v44  ;;  %v6307_v48 = vsub.f32 %v4660_v41, %v23220_v45  ;;  %v4846_v49 = vadd.f32 %v21056_v46, %v21049_v38  ;;  %v21063_v50 = vpop.f32.mrf.mxu0  ;;  %21172 = vmatpush3.msra.mxu0 %v23220_v45 }
 0x237   : > { %v4839_v52 = vpop.f32.mrf.mxu1  ;;  %21183 = vmatprep.subr.mxu0 %v22497_v6  ;;  %21174 = vmatmul.mubr.f32.vlgmr.msra.gmra.mxu0 %v22855_v43 }
 0x238   : > { %v6302_v53 = vsub.f32 %v6300_v44, %v6301_v47  ;;  %v6308_v54 = vand.u32 4294901760, %v6307_v48  ;;  %v4929_v55 = vadd.f32 %v21063_v50, %v4846_v49  ;;  %v4840_v56 = vadd.f32 %v4839_v52, %v4748_v42  ;;  %v4921_v57 = vpop.f32.mrf.mxu0  ;;  %21184 = vmatpush3.msra.mxu0 %v6300_v44  ;;  %21187 = vmatprep.mubr.msk.f32.mxu0 %vm22498_vm1, %v22497_v6 }
 0x239   : > { %21185 = vmatprep.subr.mxu0 %v22497_v6 }
 0x23a   : > { %v4922_v58 = vadd.f32 %v4921_v57, %v4840_v56  ;;  %21186 = vmatpush3.msra.mxu0 %v6307_v48  ;;  %v6303_v59 = vand.u32 4294901760, %v6302_v53  ;;  %v6309_v60 = vsub.f32 %v6307_v48, %v6308_v54 }
 0x23b   : > { %v21070_v61 = vpop.f32.mrf.mxu1  ;;  %21197 = vmatprep.subr.mxu0 %v22497_v6  ;;  %21188 = vmatmul.mubr.f32.vlgmr.msra.gmra.mxu0 %v22846_v22 }
 0x23c   : > { %v5012_v62 = vadd.f32 %v21070_v61, %v4929_v55  ;;  %v21077_v63 = vpop.f32.mrf.mxu0  ;;  %21177 = vmatpush3.msra.mxu1 %v6303_v59  ;;  %21198 = vmatpush3.msra.mxu0 %v6301_v47  ;;  %v6310_v0 = vand.u32 4294901760, %v6309_v60 }
 0x23d   : > { %v5003_v1 = vpop.f32.mrf.mxu1  ;;  %21178 = vmatprep.subr.mxu1 %v22497_v6  ;;  %21199 = vmatprep.subr.mxu0 %v22497_v6 }
 0x23e   : > { %v5095_v7 = vadd.f32 %v21077_v63, %v5012_v62  ;;  %v5004_v8 = vadd.f32 %v5003_v1, %v4922_v58  ;;  %v5088_v11 = vpop.f32.mrf.mxu0  ;;  %21179 = vmatpush3.msra.mxu1 %v6310_v0  ;;  %21200 = vmatpush3.msra.mxu0 %v6308_v54 }
 0x23f   : > { %21181 = vmatmul.mubr.f32.vlgmr.msra.gmra.mxu1 %v22843_v14  ;;  %21190 = vmatprep.subr.mxu1 %v22497_v6 }
 0x240   : > { %v5089_v12 = vadd.f32 %v5088_v11, %v5004_v8  ;;  %21201 = vmatprep.mubr.msk.f32.mxu0 %vm22498_vm1, %v22497_v6  ;;  %21211 = vmatprep.subr.mxu0 %v22497_v6 }
 0x241   : > { %v21084_v13 = vpop.f32.mrf.mxu1  ;;  %21191 = vmatpush3.msra.mxu1 %v23217_v40  ;;  %21202 = vmatmul.mubr.f32.vlgmr.msra.gmra.mxu0 %v22843_v14 }
 0x242   : > { %v5174_v16 = vadd.f32 %v21084_v13, %v5095_v7  ;;  %v21091_v18 = vpop.f32.mrf.mxu0  ;;  %21192 = vmatprep.subr.mxu1 %v22497_v6  ;;  %21194 = vmatprep.mubr.msk.f32.mxu1 %vm22498_vm1, %v22497_v6 }
 0x243   : > { %v5167_v19 = vpop.f32.mrf.mxu1  ;;  %21193 = vmatpush3.msra.mxu1 %v23220_v45  ;;  %21215 = vmatprep.mubr.msk.f32.mxu0 %vm22498_vm1, %v22497_v6 }
 0x244   : > { %v23248_v20 = vand.u32 4294901760, %v5174_v16  ;;  %v5168_v21 = vadd.f32 %v5167_v19, %v5089_v12  ;;  %v5256_v23 = vpop.f32.mrf.mxu0  ;;  %21195 = vmatmul.mubr.f32.vlgmr.msra.gmra.mxu1 %v22849_v30  ;;  %21204 = vmatprep.subr.mxu1 %v22497_v6 }
 0x245   : > { %21205 = vmatpush3.msra.mxu1 %v23217_v40  ;;  %21208 = vmatprep.mubr.msk.f32.mxu1 %vm22498_vm1, %v22497_v6 }
 0x246   : > { %v6759_v24 = vsub.f32 %v5174_v16, %v23248_v20  ;;  %v23256_v26 = vand.u32 4294901760, %v5168_v21  ;;  %21212 = vmatpush3.msra.mxu0 %v23248_v20  ;;  %21206 = vmatprep.subr.mxu1 %v22497_v6 }
 0x247   : > { %v21098_v28 = vpop.f32.mrf.mxu1  ;;  %21213 = vmatprep.subr.mxu0 %v22497_v6  ;;  %21207 = vmatpush3.msra.mxu1 %v23220_v45 }
 0x248   : > { %v6760_v29 = vand.u32 4294901760, %v6759_v24  ;;  %v6766_v32 = vsub.f32 %v5168_v21, %v23256_v26  ;;  %v5354_v33 = vadd.f32 %v21098_v28, %v21091_v18  ;;  %v21105_v34 = vpop.f32.mrf.mxu0  ;;  %21214 = vmatpush3.msra.mxu0 %v23256_v26  ;;  %21209 = vmatmul.mubr.f32.vlgmr.msra.gmra.mxu1 %v22843_v14 }
 0x249   : > { %v5347_v35 = vpop.f32.mrf.mxu1  ;;  %21225 = vmatprep.subr.mxu0 %v22497_v6  ;;  %21216 = vmatmul.mubr.f32.vlgmr.msra.gmra.mxu0 %v22855_v43 }
 0x24a   : > { %v6761_v36 = vsub.f32 %v6759_v24, %v6760_v29  ;;  %v6767_v37 = vand.u32 4294901760, %v6766_v32  ;;  %v5437_v38 = vadd.f32 %v21105_v34, %v5354_v33  ;;  %v5348_v39 = vadd.f32 %v5347_v35, %v5256_v23  ;;  %v5429_v40 = vpop.f32.mrf.mxu0  ;;  %21226 = vmatpush3.msra.mxu0 %v6759_v24  ;;  %21218 = vmatprep.subr.mxu1 %v22497_v6 }
 0x24b   : > { %21227 = vmatprep.subr.mxu0 %v22497_v6  ;;  %21229 = vmatprep.mubr.msk.f32.mxu0 %vm22498_vm1, %v22497_v6 }
 0x24c   : > { %v5430_v41 = vadd.f32 %v5429_v40, %v5348_v39  ;;  %21228 = vmatpush3.msra.mxu0 %v6766_v32  ;;  %v6762_v42 = vand.u32 4294901760, %v6761_v36  ;;  %v6768_v44 = vsub.f32 %v6766_v32, %v6767_v37  ;;  %21222 = vmatprep.mubr.msk.f32.mxu1 %vm22498_vm1, %v22497_v6  ;;  %v22398_v36 = vld [vmem:[%s22621_s12] sm:$0xff]  ;;  %v22400_v40 = vld [vmem:[%s22621_s12 + $0x8] sm:$0xff] }
 0x24d   : > { %v21112_v45 = vpop.f32.mrf.mxu1  ;;  %21239 = vmatprep.subr.mxu0 %v22497_v6  ;;  %21230 = vmatmul.mubr.f32.vlgmr.msra.gmra.mxu0 %v22846_v22 }
 0x24e   : > { %v5520_v46 = vadd.f32 %v21112_v45, %v5437_v38  ;;  %v21119_v47 = vpop.f32.mrf.mxu0  ;;  %21219 = vmatpush3.msra.mxu1 %v6762_v42  ;;  %21240 = vmatpush3.msra.mxu0 %v6760_v29  ;;  %v6769_v48 = vand.u32 4294901760, %v6768_v44 }
 0x24f   : > { %v5511_v49 = vpop.f32.mrf.mxu1  ;;  %21220 = vmatprep.subr.mxu1 %v22497_v6  ;;  %21241 = vmatprep.subr.mxu0 %v22497_v6 }
 0x250   : > { %v5603_v50 = vadd.f32 %v21119_v47, %v5520_v46  ;;  %v5512_v52 = vadd.f32 %v5511_v49, %v5430_v41  ;;  %v5596_v53 = vpop.f32.mrf.mxu0  ;;  %21221 = vmatpush3.msra.mxu1 %v6769_v48  ;;  %21242 = vmatpush3.msra.mxu0 %v6767_v37  ;;  %v22399_v37 = vld [vmem:[%s22611_s14] sm:$0xff]  ;;  %v22401_v41 = vld [vmem:[%s22611_s14 + $0x8] sm:$0xff] }
 0x251   : > { %21223 = vmatmul.mubr.f32.vlgmr.msra.gmra.mxu1 %v22843_v14  ;;  %21232 = vmatprep.subr.mxu1 %v22497_v6  ;;  %v8029_v38 = vmul.f32 %v22399_v37, %v22398_v36  ;;  %v8030_v42 = vmul.f32 %v22401_v41, %v22400_v40  ;;  %v22406_v37 = vld [vmem:[%s22621_s12 + $0x20] sm:$0xff]  ;;  %v22408_v41 = vld [vmem:[%s22621_s12 + $0x28] sm:$0xff] }
 0x252   : > { %v5597_v54 = vadd.f32 %v5596_v53, %v5512_v52  ;;  %21243 = vmatprep.mubr.msk.f32.mxu0 %vm22498_vm1, %v22497_v6  ;;  %21253 = vmatprep.subr.mxu0 %v22497_v6 }
 0x253   : > { %v21126_v55 = vpop.f32.mrf.mxu1  ;;  %21233 = vmatpush3.msra.mxu1 %v23248_v20  ;;  %21244 = vmatmul.mubr.f32.vlgmr.msra.gmra.mxu0 %v22843_v14  ;;  %v8041_v52 = vsel %vm289_vm0, %v8030_v42, 0  ;;  %v22409_v42 = vld [vmem:[%s22611_s14 + $0x28] sm:$0xff] }
 0x254   : > { %v5682_v56 = vadd.f32 %v21126_v55, %v5603_v50  ;;  %v21133_v57 = vpop.f32.mrf.mxu0  ;;  %21234 = vmatprep.subr.mxu1 %v22497_v6  ;;  %21236 = vmatprep.mubr.msk.f32.mxu1 %vm22498_vm1, %v22497_v6  ;;  %v8038_v50 = vsel %vm289_vm0, %v8029_v38, 0  ;;  %v22407_v38 = vld [vmem:[%s22611_s14 + $0x20] sm:$0xff] }
 0x255   : > { %v5675_v58 = vpop.f32.mrf.mxu1  ;;  %21235 = vmatpush3.msra.mxu1 %v23256_v26  ;;  %21257 = vmatprep.mubr.msk.f32.mxu0 %vm22498_vm1, %v22497_v6  ;;  %v23349_v55 = vand.u32 4294901760, %v8038_v50 }
 0x256   : > { %v23290_v59 = vand.u32 4294901760, %v5682_v56  ;;  %v5676_v60 = vadd.f32 %v5675_v58, %v5597_v54  ;;  %v5764_v61 = vpop.f32.mrf.mxu0  ;;  %21237 = vmatmul.mubr.f32.vlgmr.msra.gmra.mxu1 %v22849_v30  ;;  %21246 = vmatprep.subr.mxu1 %v22497_v6  ;;  %v23354_v58 = vand.u32 4294901760, %v8041_v52 }
 0x257   : > { %21247 = vmatpush3.msra.mxu1 %v23248_v20  ;;  %21250 = vmatprep.mubr.msk.f32.mxu1 %vm22498_vm1, %v22497_v6 }
 0x258   : > { %v7218_v62 = vsub.f32 %v5682_v56, %v23290_v59  ;;  %v23298_v63 = vand.u32 4294901760, %v5676_v60  ;;  %21254 = vmatpush3.msra.mxu0 %v23290_v59  ;;  %21248 = vmatprep.subr.mxu1 %v22497_v6 }
 0x259   : > { %v21140_v0 = vpop.f32.mrf.mxu1  ;;  %21255 = vmatprep.subr.mxu0 %v22497_v6  ;;  %21249 = vmatpush3.msra.mxu1 %v23256_v26 }
 0x25a   : > { %v7219_v1 = vand.u32 4294901760, %v7218_v62  ;;  %v7225_v7 = vsub.f32 %v5676_v60, %v23298_v63  ;;  %v5862_v8 = vadd.f32 %v21140_v0, %v21133_v57  ;;  %v21147_v11 = vpop.f32.mrf.mxu0  ;;  %21256 = vmatpush3.msra.mxu0 %v23298_v63  ;;  %21251 = vmatmul.mubr.f32.vlgmr.msra.gmra.mxu1 %v22843_v14  ;;  %v23367_v0 = vsub.f32 %v8041_v52, %v23354_v58 }
 0x25b   : > { %v5855_v12 = vpop.f32.mrf.mxu1  ;;  %21267 = vmatprep.subr.mxu0 %v22497_v6  ;;  %21258 = vmatmul.mubr.f32.vlgmr.msra.gmra.mxu0 %v22855_v43 }
 0x25c   : > { %v7220_v13 = vsub.f32 %v7218_v62, %v7219_v1  ;;  %v7226_v16 = vand.u32 4294901760, %v7225_v7  ;;  %v5945_v18 = vadd.f32 %v21147_v11, %v5862_v8  ;;  %v5856_v19 = vadd.f32 %v5855_v12, %v5764_v61  ;;  %v5937_v20 = vpop.f32.mrf.mxu0  ;;  %21268 = vmatpush3.msra.mxu0 %v7218_v62  ;;  %21260 = vmatprep.subr.mxu1 %v22497_v6  ;;  %v22402_v11 = vld [vmem:[%s22621_s12 + $0x10] sm:$0xff] }
 0x25d   : > { %21269 = vmatprep.subr.mxu0 %v22497_v6  ;;  %21271 = vmatprep.mubr.msk.f32.mxu0 %vm22498_vm1, %v22497_v6  ;;  %v23363_v61 = vsub.f32 %v8038_v50, %v23349_v55  ;;  %v8122_v8 = vand.u32 4294901760, %v23367_v0  ;;  %v22403_v12 = vld [vmem:[%s22611_s14 + $0x10] sm:$0xff] }
 0x25e   : > { %v5938_v21 = vadd.f32 %v5937_v20, %v5856_v19  ;;  %21270 = vmatpush3.msra.mxu0 %v7225_v7  ;;  %v7221_v23 = vand.u32 4294901760, %v7220_v13  ;;  %v7227_v24 = vsub.f32 %v7225_v7, %v7226_v16  ;;  %21264 = vmatprep.mubr.msk.f32.mxu1 %vm22498_vm1, %v22497_v6  ;;  %v8031_v13 = vmul.f32 %v22403_v12, %v22402_v11  ;;  %v22405_v19 = vld [vmem:[%s22611_s14 + $0x18] sm:$0xff] }
 0x25f   : > { %v21154_v26 = vpop.f32.mrf.mxu1  ;;  %21281 = vmatprep.subr.mxu0 %v22497_v6  ;;  %21272 = vmatmul.mubr.f32.vlgmr.msra.gmra.mxu0 %v22846_v22  ;;  %v8112_v7 = vand.u32 4294901760, %v23363_v61 }
 0x260   : > { %v6028_v28 = vadd.f32 %v21154_v26, %v5945_v18  ;;  %v21161_v29 = vpop.f32.mrf.mxu0  ;;  %21261 = vmatpush3.msra.mxu1 %v7221_v23  ;;  %21282 = vmatpush3.msra.mxu0 %v7219_v1  ;;  %v7228_v32 = vand.u32 4294901760, %v7227_v24  ;;  %v22404_v18 = vld [vmem:[%s22621_s12 + $0x18] sm:$0xff]  ;;  %v8546_v23 = vsel %vm289_vm0, %v8031_v13, 0 }
 0x261   : > { %v6019_v33 = vpop.f32.mrf.mxu1  ;;  %21262 = vmatprep.subr.mxu1 %v22497_v6  ;;  %21283 = vmatprep.subr.mxu0 %v22497_v6  ;;  %v8032_v20 = vmul.f32 %v22405_v19, %v22404_v18 }
 0x262   : > { %v6111_v34 = vadd.f32 %v21161_v29, %v6028_v28  ;;  %v6020_v35 = vadd.f32 %v6019_v33, %v5938_v21  ;;  %21263 = vmatpush3.msra.mxu1 %v7228_v32  ;;  %21284 = vmatpush3.msra.mxu0 %v7226_v16  ;;  %v6104_v39 = vpop.f32.mrf.mxu0  ;;  %v8113_v16 = vsub.f32 %v23363_v61, %v8112_v7  ;;  %v23409_v29 = vand.u32 4294901760, %v8546_v23 }
 0x263   : > { %21265 = vmatmul.mubr.f32.vlgmr.msra.gmra.mxu1 %v22843_v14  ;;  %21274 = vmatprep.subr.mxu1 %v22497_v6  ;;  %v8123_v21 = vsub.f32 %v23367_v0, %v8122_v8  ;;  %v8549_v26 = vsel %vm289_vm0, %v8032_v20, 0 }
 0x264   : > { %v6105_v44 = vadd.f32 %v6104_v39, %v6020_v35  ;;  %v21168_v45 = vpop.f32.mrf.mxu1  ;;  %21285 = vmatprep.mubr.msk.f32.mxu0 %vm22498_vm1, %v22497_v6  ;;  %21295 = vmatprep.subr.mxu0 %v22497_v6  ;;  %v8114_v24 = vand.u32 4294901760, %v8113_v16  ;;  %v23414_v32 = vand.u32 4294901760, %v8549_v26  ;;  %v23421_v33 = vsub.f32 %v8546_v23, %v23409_v29 }
 0x265   : > { %v6190_v46 = vadd.f32 %v21168_v45, %v6111_v34  ;;  %21275 = vmatpush3.msra.mxu1 %v23290_v59  ;;  %21286 = vmatmul.mubr.f32.vlgmr.msra.gmra.mxu0 %v22843_v14  ;;  %v8124_v28 = vand.u32 4294901760, %v8123_v21  ;;  %v8033_v39 = vmul.f32 %v22407_v38, %v22406_v37 }
 0x266   : > { %v6183_v47 = vpop.f32.mrf.mxu1  ;;  %21276 = vmatprep.subr.mxu1 %v22497_v6  ;;  %21278 = vmatprep.mubr.msk.f32.mxu1 %vm22498_vm1, %v22497_v6  ;;  %v23426_v34 = vsub.f32 %v8549_v26, %v23414_v32  ;;  %v8620_v35 = vand.u32 4294901760, %v23421_v33 }
 0x267   : > { %v23333_v48 = vand.u32 4294901760, %v6190_v46  ;;  %v6184_v49 = vadd.f32 %v6183_v47, %v6105_v44  ;;  %21277 = vmatpush3.msra.mxu1 %v23298_v63  ;;  %21299 = vmatprep.mubr.msk.f32.mxu0 %vm22498_vm1, %v22497_v6  ;;  %v8034_v44 = vmul.f32 %v22409_v42, %v22408_v41 }
 0x268   : > { %21279 = vmatmul.mubr.f32.vlgmr.msra.gmra.mxu1 %v22849_v30  ;;  %21288 = vmatprep.subr.mxu1 %v22497_v6  ;;  %v8630_v36 = vand.u32 4294901760, %v23426_v34  ;;  %v8621_v40 = vsub.f32 %v23421_v33, %v8620_v35 }
 0x269   : > { %v7677_v53 = vsub.f32 %v6190_v46, %v23333_v48  ;;  %v23343_v54 = vand.u32 4294901760, %v6184_v49  ;;  %21296 = vmatpush3.msra.mxu0 %v23333_v48  ;;  %21289 = vmatpush3.msra.mxu1 %v23290_v59  ;;  %v9054_v46 = vsel %vm289_vm0, %v8033_v39, 0 }
 0x26a   : > { %21297 = vmatprep.subr.mxu0 %v22497_v6  ;;  %21290 = vmatprep.subr.mxu1 %v22497_v6  ;;  %v8631_v45 = vsub.f32 %v23426_v34, %v8630_v36  ;;  %v8622_v47 = vand.u32 4294901760, %v8621_v40  ;;  %v23470_v50 = vand.u32 4294901760, %v9054_v46 }
 0x26b   : > { %v7678_v56 = vand.u32 4294901760, %v7677_v53  ;;  %v7684_v57 = vsub.f32 %v6184_v49, %v23343_v54  ;;  %21298 = vmatpush3.msra.mxu0 %v23343_v54  ;;  %21291 = vmatpush3.msra.mxu1 %v23298_v63 }
 0x26c   : > { %21309 = vmatprep.subr.mxu0 %v22497_v6  ;;  %21300 = vmatmul.mubr.f32.vlgmr.msra.gmra.mxu0 %v22855_v43  ;;  %v8632_v49 = vand.u32 4294901760, %v8631_v45 }
 0x26d   : > { %v7679_v59 = vsub.f32 %v7677_v53, %v7678_v56  ;;  %v7685_v60 = vand.u32 4294901760, %v7684_v57  ;;  %21310 = vmatpush3.msra.mxu0 %v7677_v53  ;;  %21292 = vmatprep.mubr.msk.f32.mxu1 %vm22498_vm1, %v22497_v6  ;;  %v23481_v53 = vsub.f32 %v9054_v46, %v23470_v50 }
 0x26e   : > { %21311 = vmatprep.subr.mxu0 %v22497_v6  ;;  %21293 = vmatmul.mubr.f32.vlgmr.msra.gmra.mxu1 %v22843_v14 }
 0x26f   : > { %21312 = vmatpush3.msra.mxu0 %v7684_v57  ;;  %21302 = vmatprep.subr.mxu1 %v22497_v6  ;;  %v7680_v62 = vand.u32 4294901760, %v7679_v59  ;;  %v7686_v63 = vsub.f32 %v7684_v57, %v7685_v60  ;;  %v22410_v57 = vld [vmem:[%s22621_s12 + $0x30] sm:$0xff] }
 0x270   : > { %21313 = vmatprep.mubr.msk.f32.mxu0 %vm22498_vm1, %v22497_v6  ;;  %21323 = vmatprep.subr.mxu0 %v22497_v6 }
 0x271   : > { %21303 = vmatpush3.msra.mxu1 %v7680_v62  ;;  %21314 = vmatmul.mubr.f32.vlgmr.msra.gmra.mxu0 %v22846_v22  ;;  %v7687_v1 = vand.u32 4294901760, %v7686_v63 }
 0x272   : > { %21324 = vmatpush3.msra.mxu0 %v7678_v56  ;;  %21304 = vmatprep.subr.mxu1 %v22497_v6 }
 0x273   : > { %21325 = vmatprep.subr.mxu0 %v22497_v6  ;;  %21305 = vmatpush3.msra.mxu1 %v7687_v1 }
 0x274   : > { %21306 = vmatprep.mubr.msk.f32.mxu1 %vm22498_vm1, %v22497_v6  ;;  %21326 = vmatpush3.msra.mxu0 %v7685_v60  ;;  %v22412_v60 = vld [vmem:[%s22621_s12 + $0x38] sm:$0xff] }
 0x275   : > { %21307 = vmatmul.mubr.f32.vlgmr.msra.gmra.mxu1 %v22843_v14  ;;  %21316 = vmatprep.subr.mxu1 %v22497_v6 }
 0x276   : > { %21317 = vmatpush3.msra.mxu1 %v23333_v48  ;;  %21320 = vmatprep.mubr.msk.f32.mxu1 %vm22498_vm1, %v22497_v6 }
 0x277   : > { %21318 = vmatprep.subr.mxu1 %v22497_v6  ;;  %21327 = vmatprep.mubr.msk.f32.mxu0 %vm22498_vm1, %v22497_v6 }
 0x278   : > { %21319 = vmatpush3.msra.mxu1 %v23343_v54  ;;  %21328 = vmatmul.mubr.f32.vlgmr.msra.gmra.mxu0 %v22843_v14 }
 0x279   : > { %21321 = vmatmul.mubr.f32.vlgmr.msra.gmra.mxu1 %v22849_v30  ;;  %21330 = vmatprep.subr.mxu1 %v22497_v6 }
 0x27a   : > { %21337 = vmatprep.subr.mxu0 %v22630_v3  ;;  %21331 = vmatpush3.msra.mxu1 %v23333_v48  ;;  %v9057_v48 = vsel %vm289_vm0, %v8034_v44, 0 }
 0x27b   : > { %21338 = vmatpush3.msra.mxu0 %v22630_v3  ;;  %21332 = vmatprep.subr.mxu1 %v22497_v6  ;;  %v23474_v52 = vand.u32 4294901760, %v9057_v48 }
 0x27c   : > { %21339 = vmatprep.subr.mxu0 %v22632_v4  ;;  %21333 = vmatpush3.msra.mxu1 %v23343_v54 }
 0x27d   : > { %21334 = vmatprep.mubr.msk.f32.mxu1 %vm22498_vm1, %v22497_v6  ;;  %21340 = vmatpush3.msra.mxu0 %v22632_v4  ;;  %v23486_v54 = vsub.f32 %v9057_v48, %v23474_v52 }
 0x27e   : > { %21341 = vmatprep.mubr.f32.mxu0 %v8114_v24  ;;  %21335 = vmatmul.mubr.f32.vlgmr.msra.gmra.mxu1 %v22843_v14 }
 0x27f   : > { %21342 = vmatmul.mubr.f32.vlgmr.msra.gmra.mxu0 %v8124_v28  ;;  %21344 = vmatprep.subr.mxu1 %v22669_v25  ;;  %v9138_v56 = vand.u32 4294901760, %v23486_v54 }
 0x280   : > { %21351 = vmatprep.subr.mxu0 %v22640_v9  ;;  %21345 = vmatpush3.msra.mxu1 %v22669_v25 }
 0x281   : > { %21352 = vmatpush3.msra.mxu0 %v22640_v9  ;;  %21346 = vmatprep.subr.mxu1 %v22671_v27 }
 0x282   : > { %21353 = vmatprep.subr.mxu0 %v22643_v10  ;;  %21347 = vmatpush3.msra.mxu1 %v22671_v27 }
 0x283   : > { %21348 = vmatprep.mubr.f32.mxu1 %v23349_v55  ;;  %21354 = vmatpush3.msra.mxu0 %v22643_v10 }
 0x284   : > { %21355 = vmatprep.mubr.f32.mxu0 %v23363_v61  ;;  %21349 = vmatmul.mubr.f32.vlgmr.msra.gmra.mxu1 %v23354_v58  ;;  %v22413_v61 = vld [vmem:[%s22611_s14 + $0x38] sm:$0xff] }
 0x285   : > { %21356 = vmatmul.mubr.f32.vlgmr.msra.gmra.mxu0 %v23367_v0  ;;  %21358 = vmatprep.subr.mxu1 %v22630_v3  ;;  %v8036_v62 = vmul.f32 %v22413_v61, %v22412_v60  ;;  %v9139_v0 = vsub.f32 %v23486_v54, %v9138_v56 }
 0x286   : > { %21365 = vmatprep.subr.mxu0 %v22655_v15  ;;  %21359 = vmatpush3.msra.mxu1 %v22630_v3 }
 0x287   : > { %21366 = vmatpush3.msra.mxu0 %v22655_v15  ;;  %21360 = vmatprep.subr.mxu1 %v22632_v4  ;;  %v9140_v11 = vand.u32 4294901760, %v9139_v0 }
 0x288   : > { %21367 = vmatprep.subr.mxu0 %v22659_v17  ;;  %21361 = vmatpush3.msra.mxu1 %v22632_v4 }
 0x289   : > { %21362 = vmatprep.mubr.f32.mxu1 %v8112_v7  ;;  %21368 = vmatpush3.msra.mxu0 %v22659_v17 }
 0x28a   : > { %21369 = vmatprep.mubr.f32.mxu0 %v23349_v55  ;;  %21363 = vmatmul.mubr.f32.vlgmr.msra.gmra.mxu1 %v8122_v8  ;;  %v9565_v8 = vsel %vm289_vm0, %v8036_v62, 0 }
 0x28b   : > { %21370 = vmatmul.mubr.f32.vlgmr.msra.gmra.mxu0 %v23354_v58  ;;  %21372 = vmatprep.subr.mxu1 %v22630_v3  ;;  %v23534_v13 = vand.u32 4294901760, %v9565_v8 }
 0x28c   : > { %21379 = vmatprep.subr.mxu0 %v22630_v3  ;;  %21373 = vmatpush3.msra.mxu1 %v22630_v3 }
 0x28d   : > { %21380 = vmatpush3.msra.mxu0 %v22630_v3  ;;  %21374 = vmatprep.subr.mxu1 %v22632_v4  ;;  %v9645_v18 = vsub.f32 %v9565_v8, %v23534_v13 }
 0x28e   : > { %21381 = vmatprep.subr.mxu0 %v22632_v4  ;;  %21375 = vmatpush3.msra.mxu1 %v22632_v4 }
 0x28f   : > { %21376 = vmatprep.mubr.f32.mxu1 %v23349_v55  ;;  %21382 = vmatpush3.msra.mxu0 %v22632_v4  ;;  %v9128_v55 = vand.u32 4294901760, %v23481_v53  ;;  %v9646_v20 = vand.u32 4294901760, %v9645_v18 }
 0x290   : > { %21383 = vmatprep.mubr.f32.mxu0 %v8622_v47  ;;  %21377 = vmatmul.mubr.f32.vlgmr.msra.gmra.mxu1 %v23354_v58  ;;  %v22411_v58 = vld [vmem:[%s22611_s14 + $0x30] sm:$0xff] }
 0x291   : > { %21384 = vmatmul.mubr.f32.vlgmr.msra.gmra.mxu0 %v8632_v49  ;;  %21386 = vmatprep.subr.mxu1 %v22669_v25  ;;  %v8035_v59 = vmul.f32 %v22411_v58, %v22410_v57  ;;  %v9129_v63 = vsub.f32 %v23481_v53, %v9128_v55  ;;  %v9647_v23 = vsub.f32 %v9645_v18, %v9646_v20 }
 0x292   : > { %21393 = vmatprep.subr.mxu0 %v22640_v9  ;;  %21387 = vmatpush3.msra.mxu1 %v22669_v25 }
 0x293   : > { %21394 = vmatpush3.msra.mxu0 %v22640_v9  ;;  %21388 = vmatprep.subr.mxu1 %v22671_v27  ;;  %v9562_v1 = vsel %vm289_vm0, %v8035_v59, 0  ;;  %v9130_v7 = vand.u32 4294901760, %v9129_v63  ;;  %v9648_v26 = vand.u32 4294901760, %v9647_v23 }
 0x294   : > { %21395 = vmatprep.subr.mxu0 %v22643_v10  ;;  %21389 = vmatpush3.msra.mxu1 %v22671_v27  ;;  %v23530_v12 = vand.u32 4294901760, %v9562_v1 }
 0x295   : > { %21390 = vmatprep.mubr.f32.mxu1 %v23409_v29  ;;  %21396 = vmatpush3.msra.mxu0 %v22643_v10 }
 0x296   : > { %21397 = vmatprep.mubr.f32.mxu0 %v23421_v33  ;;  %21391 = vmatmul.mubr.f32.vlgmr.msra.gmra.mxu1 %v23414_v32  ;;  %v9635_v16 = vsub.f32 %v9562_v1, %v23530_v12 }
 0x297   : > { %21398 = vmatmul.mubr.f32.vlgmr.msra.gmra.mxu0 %v23426_v34  ;;  %21400 = vmatprep.subr.mxu1 %v22630_v3 }
 0x298   : > { %21407 = vmatprep.subr.mxu0 %v22655_v15  ;;  %21401 = vmatpush3.msra.mxu1 %v22630_v3  ;;  %v9636_v19 = vand.u32 4294901760, %v9635_v16 }
 0x299   : > { %21408 = vmatpush3.msra.mxu0 %v22655_v15  ;;  %21402 = vmatprep.subr.mxu1 %v22632_v4 }
 0x29a   : > { %21409 = vmatprep.subr.mxu0 %v22659_v17  ;;  %21403 = vmatpush3.msra.mxu1 %v22632_v4  ;;  %v9637_v21 = vsub.f32 %v9635_v16, %v9636_v19 }
 0x29b   : > { %21404 = vmatprep.mubr.f32.mxu1 %v8620_v35  ;;  %21410 = vmatpush3.msra.mxu0 %v22659_v17 }
 0x29c   : > { %21411 = vmatprep.mubr.f32.mxu0 %v23409_v29  ;;  %21405 = vmatmul.mubr.f32.vlgmr.msra.gmra.mxu1 %v8630_v36  ;;  %v9638_v24 = vand.u32 4294901760, %v9637_v21 }
 0x29d   : > { %21412 = vmatmul.mubr.f32.vlgmr.msra.gmra.mxu0 %v23414_v32  ;;  %21414 = vmatprep.subr.mxu1 %v22630_v3 }
 0x29e   : > { %21421 = vmatprep.subr.mxu0 %v22630_v3  ;;  %21415 = vmatpush3.msra.mxu1 %v22630_v3 }
 0x29f   : > { %21422 = vmatpush3.msra.mxu0 %v22630_v3  ;;  %21416 = vmatprep.subr.mxu1 %v22632_v4 }
 0x2a0   : > { %21423 = vmatprep.subr.mxu0 %v22632_v4  ;;  %21417 = vmatpush3.msra.mxu1 %v22632_v4 }
 0x2a1   : > { %21418 = vmatprep.mubr.f32.mxu1 %v23409_v29  ;;  %21424 = vmatpush3.msra.mxu0 %v22632_v4 }
 0x2a2   : > { %21425 = vmatprep.mubr.f32.mxu0 %v9130_v7  ;;  %21419 = vmatmul.mubr.f32.vlgmr.msra.gmra.mxu1 %v23414_v32 }
 0x2a3   : > { %21426 = vmatmul.mubr.f32.vlgmr.msra.gmra.mxu0 %v9140_v11  ;;  %21428 = vmatprep.subr.mxu1 %v22669_v25 }
 0x2a4   : > { %21435 = vmatprep.subr.mxu0 %v22640_v9  ;;  %21429 = vmatpush3.msra.mxu1 %v22669_v25 }
 0x2a5   : > { %21436 = vmatpush3.msra.mxu0 %v22640_v9  ;;  %21430 = vmatprep.subr.mxu1 %v22671_v27 }
 0x2a6   : > { %21437 = vmatprep.subr.mxu0 %v22643_v10  ;;  %21431 = vmatpush3.msra.mxu1 %v22671_v27 }
 0x2a7   : > { %21432 = vmatprep.mubr.f32.mxu1 %v23470_v50  ;;  %21438 = vmatpush3.msra.mxu0 %v22643_v10 }
 0x2a8   : > { %21439 = vmatprep.mubr.f32.mxu0 %v23481_v53  ;;  %21433 = vmatmul.mubr.f32.vlgmr.msra.gmra.mxu1 %v23474_v52 }
 0x2a9   : > { %21440 = vmatmul.mubr.f32.vlgmr.msra.gmra.mxu0 %v23486_v54  ;;  %21442 = vmatprep.subr.mxu1 %v22630_v3 }
 0x2aa   : > { %21449 = vmatprep.subr.mxu0 %v22655_v15  ;;  %21443 = vmatpush3.msra.mxu1 %v22630_v3 }
 0x2ab   : > { %21450 = vmatpush3.msra.mxu0 %v22655_v15  ;;  %21444 = vmatprep.subr.mxu1 %v22632_v4 }
 0x2ac   : > { %21451 = vmatprep.subr.mxu0 %v22659_v17  ;;  %21445 = vmatpush3.msra.mxu1 %v22632_v4 }
 0x2ad   : > { %21446 = vmatprep.mubr.f32.mxu1 %v9128_v55  ;;  %21452 = vmatpush3.msra.mxu0 %v22659_v17 }
 0x2ae   : > { %21453 = vmatprep.mubr.f32.mxu0 %v23470_v50  ;;  %21447 = vmatmul.mubr.f32.vlgmr.msra.gmra.mxu1 %v9138_v56 }
 0x2af   : > { %21454 = vmatmul.mubr.f32.vlgmr.msra.gmra.mxu0 %v23474_v52  ;;  %21456 = vmatprep.subr.mxu1 %v22630_v3 }
 0x2b0   : > { %21463 = vmatprep.subr.mxu0 %v22630_v3  ;;  %21457 = vmatpush3.msra.mxu1 %v22630_v3 }
 0x2b1   : > { %21464 = vmatpush3.msra.mxu0 %v22630_v3  ;;  %21458 = vmatprep.subr.mxu1 %v22632_v4 }
 0x2b2   : > { %21465 = vmatprep.subr.mxu0 %v22632_v4  ;;  %21459 = vmatpush3.msra.mxu1 %v22632_v4 }
 0x2b3   : > { %21460 = vmatprep.mubr.f32.mxu1 %v23470_v50  ;;  %21466 = vmatpush3.msra.mxu0 %v22632_v4 }
 0x2b4   : > { %21467 = vmatprep.mubr.f32.mxu0 %v9638_v24  ;;  %21461 = vmatmul.mubr.f32.vlgmr.msra.gmra.mxu1 %v23474_v52 }
 0x2b5   : > { %21468 = vmatmul.mubr.f32.vlgmr.msra.gmra.mxu0 %v9648_v26  ;;  %21470 = vmatprep.subr.mxu1 %v22669_v25 }
 0x2b6   : > { %21477 = vmatprep.subr.mxu0 %v22640_v9  ;;  %21471 = vmatpush3.msra.mxu1 %v22669_v25 }
 0x2b7   : > { %21478 = vmatpush3.msra.mxu0 %v22640_v9  ;;  %21472 = vmatprep.subr.mxu1 %v22671_v27 }
 0x2b8   : > { %21479 = vmatprep.subr.mxu0 %v22643_v10  ;;  %21473 = vmatpush3.msra.mxu1 %v22671_v27 }
 0x2b9   : > { %21474 = vmatprep.mubr.f32.mxu1 %v23530_v12  ;;  %21480 = vmatpush3.msra.mxu0 %v22643_v10 }
 0x2ba   : > { %21481 = vmatprep.mubr.f32.mxu0 %v9635_v16  ;;  %21475 = vmatmul.mubr.f32.vlgmr.msra.gmra.mxu1 %v23534_v13 }
 0x2bb   : > { %21482 = vmatmul.mubr.f32.vlgmr.msra.gmra.mxu0 %v9645_v18  ;;  %21484 = vmatprep.subr.mxu1 %v22630_v3 }
 0x2bc   : > { %21491 = vmatprep.subr.mxu0 %v22655_v15  ;;  %21485 = vmatpush3.msra.mxu1 %v22630_v3 }
 0x2bd   : > { %21492 = vmatpush3.msra.mxu0 %v22655_v15  ;;  %21486 = vmatprep.subr.mxu1 %v22632_v4 }
 0x2be   : > { %21493 = vmatprep.subr.mxu0 %v22659_v17  ;;  %21487 = vmatpush3.msra.mxu1 %v22632_v4 }
 0x2bf   : > { %21488 = vmatprep.mubr.f32.mxu1 %v9636_v19  ;;  %21494 = vmatpush3.msra.mxu0 %v22659_v17 }
 0x2c0   : > { %21495 = vmatprep.mubr.f32.mxu0 %v23530_v12  ;;  %21489 = vmatmul.mubr.f32.vlgmr.msra.gmra.mxu1 %v9646_v20 }
 0x2c1   : > { %21496 = vmatmul.mubr.f32.vlgmr.msra.gmra.mxu0 %v23534_v13  ;;  %21498 = vmatprep.subr.mxu1 %v22630_v3 }
 0x2c2   : > { %21499 = vmatpush3.msra.mxu1 %v22630_v3  ;;  %21502 = vmatprep.mubr.f32.mxu1 %v23530_v12 }
 0x2c3   : > { %21500 = vmatprep.subr.mxu1 %v22632_v4  ;;  %21505 = vmatprep.subr.mxu0 %v22497_v6 }
 0x2c4   : > { %21501 = vmatpush3.msra.mxu1 %v22632_v4  ;;  %21509 = vmatprep.mubr.msk.f32.mxu0 %vm22498_vm1, %v22497_v6 }
 0x2c5   : > { %21503 = vmatmul.mubr.f32.vlgmr.msra.gmra.mxu1 %v23534_v13  ;;  %21512 = vmatprep.subr.mxu1 %v22497_v6 }
 0x2c6   : > { %21516 = vmatprep.mubr.msk.f32.mxu1 %vm22498_vm1, %v22497_v6 }
 0x2f7   : > { %v6266_v28 = vpop.f32.mrf.mxu0 }
 0x2f9   : > { %v21175_v29 = vpop.f32.mrf.mxu0 }
 0x2fb   : > { %v6423_v32 = vpop.f32.mrf.mxu0 }
 0x2fd   : > { %v21189_v33 = vpop.f32.mrf.mxu0 }
 0x2ff   : > { %v6347_v34 = vpop.f32.mrf.mxu1 }
 0x300   : > { %v6348_v35 = vadd.f32 %v6347_v34, %v6266_v28 }
 0x301   : > { %v21182_v36 = vpop.f32.mrf.mxu1  ;;  %v6575_v37 = vpop.f32.mrf.mxu0 }
 0x302   : > { %v6424_v38 = vadd.f32 %v6423_v32, %v6348_v35 }
 0x303   : > { %v21203_v39 = vpop.f32.mrf.mxu0 }
 0x304   : > { %v6498_v40 = vpop.f32.mrf.mxu1 }
 0x305   : > { %v6499_v41 = vadd.f32 %v6498_v40, %v6424_v38 }
 0x306   : > { %v21196_v42 = vpop.f32.mrf.mxu1 }
 0x307   : > { %v6576_v44 = vadd.f32 %v6575_v37, %v6499_v41 }
 0x308   : > { %v6648_v45 = vpop.f32.mrf.mxu1 }
 0x309   : > { %v23607_v46 = vadd.f32 %v6648_v45, %v6576_v44  ;;  %v6725_v47 = vpop.f32.mrf.mxu0 }
 0x30a   : > { %v21210_v48 = vpop.f32.mrf.mxu1 }
 0x30b   : > { %v23611_v49 = vmul.f32 %v23607_v46, %v23209_v2  ;;  %v21217_v50 = vpop.f32.mrf.mxu0 }
 0x30d   : > { %v6882_v52 = vpop.f32.mrf.mxu0 }
 0x30f   : > { %v21231_v53 = vpop.f32.mrf.mxu0 }
 0x311   : > { %v6806_v54 = vpop.f32.mrf.mxu1 }
 0x312   : > { %v6807_v55 = vadd.f32 %v6806_v54, %v6725_v47 }
 0x313   : > { %v21224_v56 = vpop.f32.mrf.mxu1  ;;  %v7034_v57 = vpop.f32.mrf.mxu0 }
 0x314   : > { %v6883_v58 = vadd.f32 %v6882_v52, %v6807_v55 }
 0x315   : > { %v21245_v59 = vpop.f32.mrf.mxu0 }
 0x316   : > { %v6957_v60 = vpop.f32.mrf.mxu1 }
 0x317   : > { %v6958_v61 = vadd.f32 %v6957_v60, %v6883_v58 }
 0x318   : > { %v21238_v62 = vpop.f32.mrf.mxu1 }
 0x319   : > { %v7035_v63 = vadd.f32 %v7034_v57, %v6958_v61 }
 0x31a   : > { %v7107_v0 = vpop.f32.mrf.mxu1 }
 0x31b   : > { %v23613_v1 = vadd.f32 %v7107_v0, %v7035_v63  ;;  %v7184_v7 = vpop.f32.mrf.mxu0 }
 0x31c   : > { %v21252_v8 = vpop.f32.mrf.mxu1 }
 0x31d   : > { %v23617_v11 = vmul.f32 %v23613_v1, %v23211_v31  ;;  %v21259_v12 = vpop.f32.mrf.mxu0 }
 0x31f   : > { %v7341_v13 = vpop.f32.mrf.mxu0 }
 0x321   : > { %v21273_v16 = vpop.f32.mrf.mxu0 }
 0x323   : > { %v7265_v18 = vpop.f32.mrf.mxu1 }
 0x324   : > { %v7266_v19 = vadd.f32 %v7265_v18, %v7184_v7 }
 0x325   : > { %v21266_v20 = vpop.f32.mrf.mxu1  ;;  %v7493_v21 = vpop.f32.mrf.mxu0 }
 0x326   : > { %v7342_v23 = vadd.f32 %v7341_v13, %v7266_v19 }
 0x327   : > { %v21287_v24 = vpop.f32.mrf.mxu0 }
 0x328   : > { %v7416_v26 = vpop.f32.mrf.mxu1 }
 0x329   : > { %v7417_v28 = vadd.f32 %v7416_v26, %v7342_v23 }
 0x32a   : > { %v21280_v29 = vpop.f32.mrf.mxu1 }
 0x32b   : > { %v7494_v32 = vadd.f32 %v7493_v21, %v7417_v28 }
 0x32c   : > { %v7643_v33 = vpop.f32.mrf.mxu0 }
 0x32e   : > { %v7566_v34 = vpop.f32.mrf.mxu1  ;;  %v21301_v35 = vpop.f32.mrf.mxu0 }
 0x32f   : > { %v23619_v36 = vadd.f32 %v7566_v34, %v7494_v32 }
 0x330   : > { %v21294_v37 = vpop.f32.mrf.mxu1 }
 0x331   : > { %v23623_v38 = vmul.f32 %v23619_v36, %v23213_v51  ;;  %v7800_v39 = vpop.f32.mrf.mxu0 }
 0x333   : > { %v21315_v40 = vpop.f32.mrf.mxu0 }
 0x335   : > { %v7724_v41 = vpop.f32.mrf.mxu1 }
 0x336   : > { %v7725_v42 = vadd.f32 %v7724_v41, %v7643_v33 }
 0x337   : > { %v21308_v44 = vpop.f32.mrf.mxu1 }
 0x338   : > { %v7801_v45 = vadd.f32 %v7800_v39, %v7725_v42  ;;  %v7952_v47 = vpop.f32.mrf.mxu0 }
 0x339   : > { %v7875_v48 = vpop.f32.mrf.mxu1 }
 0x33a   : > { %v7876_v50 = vadd.f32 %v7875_v48, %v7801_v45  ;;  %v21329_v52 = vpop.f32.mrf.mxu0 }
 0x33b   : > { %v21322_v53 = vpop.f32.mrf.mxu1 }
 0x33c   : > { %v7953_v54 = vadd.f32 %v7952_v47, %v7876_v50 }
 0x33e   : > { %v8025_v55 = vpop.f32.mrf.mxu1 }
 0x33f   : > { %v23625_v56 = vadd.f32 %v8025_v55, %v7953_v54  ;;  %v21343_v57 = vpop.f32.mrf.mxu0 }
 0x340   : > { %v21336_v58 = vpop.f32.mrf.mxu1 }
 0x341   : > { %v23629_v59 = vmul.f32 %v23625_v56, %v23215_v5  ;;  %v8116_v60 = vpop.f32.mrf.mxu0 }
 0x344   : > { %v21350_v61 = vpop.f32.mrf.mxu1 }
 0x345   : > { %v8214_v62 = vadd.f32 %v21350_v61, %v21343_v57  ;;  %v21357_v63 = vpop.f32.mrf.mxu0 }
 0x346   : > { %v8207_v0 = vpop.f32.mrf.mxu1 }
 0x347   : > { %v8297_v7 = vadd.f32 %v21357_v63, %v8214_v62  ;;  %v8208_v8 = vadd.f32 %v8207_v0, %v8116_v60  ;;  %v8289_v12 = vpop.f32.mrf.mxu0 }
 0x349   : > { %v8290_v13 = vadd.f32 %v8289_v12, %v8208_v8 }
 0x34a   : > { %v21364_v16 = vpop.f32.mrf.mxu1 }
 0x34b   : > { %v8380_v18 = vadd.f32 %v21364_v16, %v8297_v7  ;;  %v21371_v19 = vpop.f32.mrf.mxu0 }
 0x34c   : > { %v8371_v20 = vpop.f32.mrf.mxu1 }
 0x34d   : > { %v8463_v21 = vadd.f32 %v21371_v19, %v8380_v18  ;;  %v8372_v23 = vadd.f32 %v8371_v20, %v8290_v13  ;;  %v8456_v24 = vpop.f32.mrf.mxu0 }
 0x34f   : > { %v8457_v26 = vadd.f32 %v8456_v24, %v8372_v23 }
 0x350   : > { %v21378_v28 = vpop.f32.mrf.mxu1 }
 0x351   : > { %v8542_v29 = vadd.f32 %v21378_v28, %v8463_v21  ;;  %v21385_v32 = vpop.f32.mrf.mxu0 }
 0x352   : > { %v8535_v33 = vpop.f32.mrf.mxu1 }
 0x353   : > { %v23631_v34 = vand.u32 4294901760, %v8542_v29  ;;  %v8536_v35 = vadd.f32 %v8535_v33, %v8457_v26  ;;  %v8624_v37 = vpop.f32.mrf.mxu0 }
 0x355   : > { %v10176_v39 = vsub.f32 %v8542_v29, %v23631_v34  ;;  %v23634_v40 = vand.u32 4294901760, %v8536_v35  ;;  %21506 = vmatpush3.msra.mxu0 %v23631_v34 }
 0x356   : > { %v21392_v41 = vpop.f32.mrf.mxu1  ;;  %21507 = vmatprep.subr.mxu0 %v22497_v6 }
 0x357   : > { %v10177_v42 = vand.u32 4294901760, %v10176_v39  ;;  %v10183_v44 = vsub.f32 %v8536_v35, %v23634_v40  ;;  %v8722_v45 = vadd.f32 %v21392_v41, %v21385_v32  ;;  %v21399_v47 = vpop.f32.mrf.mxu0  ;;  %21508 = vmatpush3.msra.mxu0 %v23634_v40 }
 0x358   : > { %v8715_v48 = vpop.f32.mrf.mxu1  ;;  %21519 = vmatprep.subr.mxu0 %v22497_v6  ;;  %21510 = vmatmul.mubr.f32.vlgmr.msra.gmra.mxu0 %v22855_v43 }
 0x359   : > { %v10178_v50 = vsub.f32 %v10176_v39, %v10177_v42  ;;  %v10184_v52 = vand.u32 4294901760, %v10183_v44  ;;  %v8805_v53 = vadd.f32 %v21399_v47, %v8722_v45  ;;  %v8716_v54 = vadd.f32 %v8715_v48, %v8624_v37  ;;  %v8797_v55 = vpop.f32.mrf.mxu0  ;;  %21520 = vmatpush3.msra.mxu0 %v10176_v39  ;;  %21523 = vmatprep.mubr.msk.f32.mxu0 %vm22498_vm1, %v22497_v6 }
 0x35a   : > { %21521 = vmatprep.subr.mxu0 %v22497_v6 }
 0x35b   : > { %v8798_v57 = vadd.f32 %v8797_v55, %v8716_v54  ;;  %21522 = vmatpush3.msra.mxu0 %v10183_v44  ;;  %v10179_v58 = vand.u32 4294901760, %v10178_v50  ;;  %v10185_v60 = vsub.f32 %v10183_v44, %v10184_v52 }
 0x35c   : > { %v21406_v61 = vpop.f32.mrf.mxu1  ;;  %21533 = vmatprep.subr.mxu0 %v22497_v6  ;;  %21524 = vmatmul.mubr.f32.vlgmr.msra.gmra.mxu0 %v22846_v22 }
 0x35d   : > { %v8888_v62 = vadd.f32 %v21406_v61, %v8805_v53  ;;  %v21413_v63 = vpop.f32.mrf.mxu0  ;;  %21513 = vmatpush3.msra.mxu1 %v10179_v58  ;;  %21534 = vmatpush3.msra.mxu0 %v10177_v42  ;;  %v10186_v0 = vand.u32 4294901760, %v10185_v60 }
 0x35e   : > { %v8879_v7 = vpop.f32.mrf.mxu1  ;;  %21514 = vmatprep.subr.mxu1 %v22497_v6  ;;  %21535 = vmatprep.subr.mxu0 %v22497_v6 }
 0x35f   : > { %v8971_v8 = vadd.f32 %v21413_v63, %v8888_v62  ;;  %v8880_v12 = vadd.f32 %v8879_v7, %v8798_v57  ;;  %v8964_v13 = vpop.f32.mrf.mxu0  ;;  %21515 = vmatpush3.msra.mxu1 %v10186_v0  ;;  %21536 = vmatpush3.msra.mxu0 %v10184_v52 }
 0x360   : > { %21517 = vmatmul.mubr.f32.vlgmr.msra.gmra.mxu1 %v22843_v14  ;;  %21526 = vmatprep.subr.mxu1 %v22497_v6 }
 0x361   : > { %v8965_v16 = vadd.f32 %v8964_v13, %v8880_v12  ;;  %21537 = vmatprep.mubr.msk.f32.mxu0 %vm22498_vm1, %v22497_v6  ;;  %21547 = vmatprep.subr.mxu0 %v22497_v6 }
 0x362   : > { %v21420_v18 = vpop.f32.mrf.mxu1  ;;  %21527 = vmatpush3.msra.mxu1 %v23631_v34  ;;  %21538 = vmatmul.mubr.f32.vlgmr.msra.gmra.mxu0 %v22843_v14 }
 0x363   : > { %v9050_v19 = vadd.f32 %v21420_v18, %v8971_v8  ;;  %v21427_v20 = vpop.f32.mrf.mxu0  ;;  %21528 = vmatprep.subr.mxu1 %v22497_v6  ;;  %21530 = vmatprep.mubr.msk.f32.mxu1 %vm22498_vm1, %v22497_v6 }
 0x364   : > { %v9043_v21 = vpop.f32.mrf.mxu1  ;;  %21529 = vmatpush3.msra.mxu1 %v23634_v40  ;;  %21551 = vmatprep.mubr.msk.f32.mxu0 %vm22498_vm1, %v22497_v6 }
 0x365   : > { %v23662_v23 = vand.u32 4294901760, %v9050_v19  ;;  %v9044_v24 = vadd.f32 %v9043_v21, %v8965_v16  ;;  %v9132_v26 = vpop.f32.mrf.mxu0  ;;  %21531 = vmatmul.mubr.f32.vlgmr.msra.gmra.mxu1 %v22849_v30  ;;  %21540 = vmatprep.subr.mxu1 %v22497_v6 }
 0x366   : > { %21541 = vmatpush3.msra.mxu1 %v23631_v34  ;;  %21544 = vmatprep.mubr.msk.f32.mxu1 %vm22498_vm1, %v22497_v6 }
 0x367   : > { %v10635_v28 = vsub.f32 %v9050_v19, %v23662_v23  ;;  %v23670_v29 = vand.u32 4294901760, %v9044_v24  ;;  %21548 = vmatpush3.msra.mxu0 %v23662_v23  ;;  %21542 = vmatprep.subr.mxu1 %v22497_v6 }
 0x368   : > { %v21434_v32 = vpop.f32.mrf.mxu1  ;;  %21549 = vmatprep.subr.mxu0 %v22497_v6  ;;  %21543 = vmatpush3.msra.mxu1 %v23634_v40 }
 0x369   : > { %v10636_v33 = vand.u32 4294901760, %v10635_v28  ;;  %v10642_v35 = vsub.f32 %v9044_v24, %v23670_v29  ;;  %v9230_v34 = vadd.f32 %v21434_v32, %v21427_v20  ;;  %v21441_v37 = vpop.f32.mrf.mxu0  ;;  %21550 = vmatpush3.msra.mxu0 %v23670_v29  ;;  %21545 = vmatmul.mubr.f32.vlgmr.msra.gmra.mxu1 %v22843_v14 }
 0x36a   : > { %v9223_v39 = vpop.f32.mrf.mxu1  ;;  %21561 = vmatprep.subr.mxu0 %v22497_v6  ;;  %21552 = vmatmul.mubr.f32.vlgmr.msra.gmra.mxu0 %v22855_v43 }
 0x36b   : > { %v10637_v41 = vsub.f32 %v10635_v28, %v10636_v33  ;;  %v10643_v42 = vand.u32 4294901760, %v10642_v35  ;;  %v9313_v44 = vadd.f32 %v21441_v37, %v9230_v34  ;;  %v9224_v45 = vadd.f32 %v9223_v39, %v9132_v26  ;;  %v9305_v47 = vpop.f32.mrf.mxu0  ;;  %21562 = vmatpush3.msra.mxu0 %v10635_v28  ;;  %21554 = vmatprep.subr.mxu1 %v22497_v6 }
 0x36c   : > { %21563 = vmatprep.subr.mxu0 %v22497_v6  ;;  %21565 = vmatprep.mubr.msk.f32.mxu0 %vm22498_vm1, %v22497_v6 }
 0x36d   : > { %v9306_v40 = vadd.f32 %v9305_v47, %v9224_v45  ;;  %21564 = vmatpush3.msra.mxu0 %v10642_v35  ;;  %v10638_v48 = vand.u32 4294901760, %v10637_v41  ;;  %v10644_v50 = vsub.f32 %v10642_v35, %v10643_v42  ;;  %21558 = vmatprep.mubr.msk.f32.mxu1 %vm22498_vm1, %v22497_v6 }
 0x36e   : > { %v21448_v52 = vpop.f32.mrf.mxu1  ;;  %21575 = vmatprep.subr.mxu0 %v22497_v6  ;;  %21566 = vmatmul.mubr.f32.vlgmr.msra.gmra.mxu0 %v22846_v22 }
 0x36f   : > { %v9396_v53 = vadd.f32 %v21448_v52, %v9313_v44  ;;  %v21455_v54 = vpop.f32.mrf.mxu0  ;;  %21555 = vmatpush3.msra.mxu1 %v10638_v48  ;;  %21576 = vmatpush3.msra.mxu0 %v10636_v33  ;;  %v10645_v55 = vand.u32 4294901760, %v10644_v50  ;;  %v22414_v52 = vld [vmem:[%s22621_s12] sm:$0xff] }
 0x370   : > { %v9387_v57 = vpop.f32.mrf.mxu1  ;;  %21556 = vmatprep.subr.mxu1 %v22497_v6  ;;  %21577 = vmatprep.subr.mxu0 %v22497_v6 }
 0x371   : > { %v9479_v58 = vadd.f32 %v21455_v54, %v9396_v53  ;;  %v9388_v60 = vadd.f32 %v9387_v57, %v9306_v40  ;;  %v9472_v61 = vpop.f32.mrf.mxu0  ;;  %21557 = vmatpush3.msra.mxu1 %v10645_v55  ;;  %21578 = vmatpush3.msra.mxu0 %v10643_v42  ;;  %v11922_v53 = vmul.f32 %v22414_v52, %v22414_v52  ;;  %v22415_v55 = vld [vmem:[%s22621_s12 + $0x8] sm:$0xff] }
 0x372   : > { %21559 = vmatmul.mubr.f32.vlgmr.msra.gmra.mxu1 %v22843_v14  ;;  %21568 = vmatprep.subr.mxu1 %v22497_v6  ;;  %v11923_v57 = vmul.f32 %v22415_v55, %v22415_v55 }
 0x373   : > { %v9473_v62 = vadd.f32 %v9472_v61, %v9388_v60  ;;  %21579 = vmatprep.mubr.msk.f32.mxu0 %vm22498_vm1, %v22497_v6  ;;  %21589 = vmatprep.subr.mxu0 %v22497_v6 }
 0x374   : > { %v21462_v63 = vpop.f32.mrf.mxu1  ;;  %21569 = vmatpush3.msra.mxu1 %v23662_v23  ;;  %21580 = vmatmul.mubr.f32.vlgmr.msra.gmra.mxu0 %v22843_v14 }
 0x375   : > { %v9558_v0 = vadd.f32 %v21462_v63, %v9479_v58  ;;  %v21469_v7 = vpop.f32.mrf.mxu0  ;;  %21570 = vmatprep.subr.mxu1 %v22497_v6  ;;  %21572 = vmatprep.mubr.msk.f32.mxu1 %vm22498_vm1, %v22497_v6 }
 0x376   : > { %v9551_v8 = vpop.f32.mrf.mxu1  ;;  %21571 = vmatpush3.msra.mxu1 %v23670_v29  ;;  %21593 = vmatprep.mubr.msk.f32.mxu0 %vm22498_vm1, %v22497_v6 }
 0x377   : > { %v23704_v12 = vand.u32 4294901760, %v9558_v0  ;;  %v9552_v13 = vadd.f32 %v9551_v8, %v9473_v62  ;;  %v9640_v16 = vpop.f32.mrf.mxu0  ;;  %21573 = vmatmul.mubr.f32.vlgmr.msra.gmra.mxu1 %v22849_v30  ;;  %21582 = vmatprep.subr.mxu1 %v22497_v6  ;;  %v11934_v8 = vsel %vm289_vm0, %v11923_v57, 0 }
 0x378   : > { %21583 = vmatpush3.msra.mxu1 %v23662_v23  ;;  %21586 = vmatprep.mubr.msk.f32.mxu1 %vm22498_vm1, %v22497_v6 }
 0x379   : > { %v11094_v18 = vsub.f32 %v9558_v0, %v23704_v12  ;;  %v23712_v19 = vand.u32 4294901760, %v9552_v13  ;;  %21590 = vmatpush3.msra.mxu0 %v23704_v12  ;;  %21584 = vmatprep.subr.mxu1 %v22497_v6 }
 0x37a   : > { %v21476_v20 = vpop.f32.mrf.mxu1  ;;  %21591 = vmatprep.subr.mxu0 %v22497_v6  ;;  %21585 = vmatpush3.msra.mxu1 %v23670_v29 }
 0x37b   : > { %v11095_v21 = vand.u32 4294901760, %v11094_v18  ;;  %v11101_v24 = vsub.f32 %v9552_v13, %v23712_v19  ;;  %v9738_v23 = vadd.f32 %v21476_v20, %v21469_v7  ;;  %v21483_v26 = vpop.f32.mrf.mxu0  ;;  %21592 = vmatpush3.msra.mxu0 %v23712_v19  ;;  %21587 = vmatmul.mubr.f32.vlgmr.msra.gmra.mxu1 %v22843_v14  ;;  %v11931_v7 = vsel %vm289_vm0, %v11922_v53, 0 }
 0x37c   : > { %v9731_v28 = vpop.f32.mrf.mxu1  ;;  %21603 = vmatprep.subr.mxu0 %v22497_v6  ;;  %21594 = vmatmul.mubr.f32.vlgmr.msra.gmra.mxu0 %v22855_v43  ;;  %v23761_v20 = vand.u32 4294901760, %v11934_v8 }
 0x37d   : > { %v11096_v32 = vsub.f32 %v11094_v18, %v11095_v21  ;;  %v11102_v33 = vand.u32 4294901760, %v11101_v24  ;;  %v9821_v35 = vadd.f32 %v21483_v26, %v9738_v23  ;;  %v9732_v34 = vadd.f32 %v9731_v28, %v9640_v16  ;;  %v9813_v37 = vpop.f32.mrf.mxu0  ;;  %21604 = vmatpush3.msra.mxu0 %v11094_v18  ;;  %21596 = vmatprep.subr.mxu1 %v22497_v6 }
 0x37e   : > { %21605 = vmatprep.subr.mxu0 %v22497_v6  ;;  %21607 = vmatprep.mubr.msk.f32.mxu0 %vm22498_vm1, %v22497_v6  ;;  %v23759_v18 = vand.u32 4294901760, %v11931_v7 }
 0x37f   : > { %v9814_v29 = vadd.f32 %v9813_v37, %v9732_v34  ;;  %21606 = vmatpush3.msra.mxu0 %v11101_v24  ;;  %v11097_v39 = vand.u32 4294901760, %v11096_v32  ;;  %v11103_v41 = vsub.f32 %v11101_v24, %v11102_v33  ;;  %21600 = vmatprep.mubr.msk.f32.mxu1 %vm22498_vm1, %v22497_v6  ;;  %v23775_v32 = vsub.f32 %v11934_v8, %v23761_v20  ;;  %v22416_v37 = vld [vmem:[%s22621_s12 + $0x10] sm:$0xff] }
 0x380   : > { %v21490_v42 = vpop.f32.mrf.mxu1  ;;  %21617 = vmatprep.subr.mxu0 %v22497_v6  ;;  %21608 = vmatmul.mubr.f32.vlgmr.msra.gmra.mxu0 %v22846_v22 }
 0x381   : > { %v9904_v44 = vadd.f32 %v21490_v42, %v9821_v35  ;;  %v21497_v45 = vpop.f32.mrf.mxu0  ;;  %21597 = vmatpush3.msra.mxu1 %v11097_v39  ;;  %21618 = vmatpush3.msra.mxu0 %v11095_v21  ;;  %v11104_v47 = vand.u32 4294901760, %v11103_v41  ;;  %v12015_v34 = vand.u32 4294901760, %v23775_v32  ;;  %v22417_v39 = vld [vmem:[%s22621_s12 + $0x18] sm:$0xff] }
 0x382   : > { %v9895_v40 = vpop.f32.mrf.mxu1  ;;  %21598 = vmatprep.subr.mxu1 %v22497_v6  ;;  %21619 = vmatprep.subr.mxu0 %v22497_v6  ;;  %v11925_v41 = vmul.f32 %v22417_v39, %v22417_v39 }
 0x383   : > { %v9987_v48 = vadd.f32 %v21497_v45, %v9904_v44  ;;  %v9896_v50 = vadd.f32 %v9895_v40, %v9814_v29  ;;  %21599 = vmatpush3.msra.mxu1 %v11104_v47  ;;  %21620 = vmatpush3.msra.mxu0 %v11102_v33  ;;  %v9980_v54 = vpop.f32.mrf.mxu0  ;;  %v11924_v29 = vmul.f32 %v22416_v37, %v22416_v37 }
 0x384   : > { %21601 = vmatmul.mubr.f32.vlgmr.msra.gmra.mxu1 %v22843_v14  ;;  %21610 = vmatprep.subr.mxu1 %v22497_v6  ;;  %v12016_v44 = vsub.f32 %v23775_v32, %v12015_v34  ;;  %v12442_v40 = vsel %vm289_vm0, %v11925_v41, 0 }
 0x385   : > { %v9981_v58 = vadd.f32 %v9980_v54, %v9896_v50  ;;  %v21504_v60 = vpop.f32.mrf.mxu1  ;;  %21621 = vmatprep.mubr.msk.f32.mxu0 %vm22498_vm1, %v22497_v6  ;;  %21631 = vmatprep.subr.mxu0 %v22497_v6  ;;  %v12439_v45 = vsel %vm289_vm0, %v11924_v29, 0  ;;  %v23818_v52 = vand.u32 4294901760, %v12442_v40 }
 0x386   : > { %v10066_v61 = vadd.f32 %v21504_v60, %v9987_v48  ;;  %21611 = vmatpush3.msra.mxu1 %v23704_v12  ;;  %21622 = vmatmul.mubr.f32.vlgmr.msra.gmra.mxu0 %v22843_v14  ;;  %v12017_v48 = vand.u32 4294901760, %v12016_v44  ;;  %v23813_v50 = vand.u32 4294901760, %v12439_v45 }
 0x387   : > { %v10059_v62 = vpop.f32.mrf.mxu1  ;;  %21612 = vmatprep.subr.mxu1 %v22497_v6  ;;  %21614 = vmatprep.mubr.msk.f32.mxu1 %vm22498_vm1, %v22497_v6  ;;  %v23830_v54 = vsub.f32 %v12442_v40, %v23818_v52 }
 0x388   : > { %v23745_v63 = vand.u32 4294901760, %v10066_v61  ;;  %v10060_v0 = vadd.f32 %v10059_v62, %v9981_v58  ;;  %21613 = vmatpush3.msra.mxu1 %v23712_v19  ;;  %21635 = vmatprep.mubr.msk.f32.mxu0 %vm22498_vm1, %v22497_v6  ;;  %v23825_v53 = vsub.f32 %v12439_v45, %v23813_v50  ;;  %v22418_v58 = vld [vmem:[%s22621_s12 + $0x20] sm:$0xff] }
 0x389   : > { %21615 = vmatmul.mubr.f32.vlgmr.msra.gmra.mxu1 %v22849_v30  ;;  %21624 = vmatprep.subr.mxu1 %v22497_v6  ;;  %v12523_v57 = vand.u32 4294901760, %v23830_v54  ;;  %v11926_v60 = vmul.f32 %v22418_v58, %v22418_v58 }
 0x38a   : > { %v11553_v13 = vsub.f32 %v10066_v61, %v23745_v63  ;;  %v11478_v16 = vand.u32 4294901760, %v10060_v0  ;;  %21632 = vmatpush3.msra.mxu0 %v23745_v63  ;;  %21625 = vmatpush3.msra.mxu1 %v23704_v12  ;;  %v23771_v12 = vsub.f32 %v11931_v7, %v23759_v18  ;;  %v12513_v55 = vand.u32 4294901760, %v23825_v53  ;;  %v22419_v61 = vld [vmem:[%s22621_s12 + $0x28] sm:$0xff] }
 0x38b   : > { %21633 = vmatprep.subr.mxu0 %v22497_v6  ;;  %21626 = vmatprep.subr.mxu1 %v22497_v6  ;;  %v11927_v62 = vmul.f32 %v22419_v61, %v22419_v61  ;;  %v12947_v7 = vsel %vm289_vm0, %v11926_v60, 0 }
 0x38c   : > { %v11554_v21 = vand.u32 4294901760, %v11553_v13  ;;  %v11560_v24 = vsub.f32 %v10060_v0, %v11478_v16  ;;  %21634 = vmatpush3.msra.mxu0 %v11478_v16  ;;  %21627 = vmatpush3.msra.mxu1 %v23712_v19  ;;  %v12005_v35 = vand.u32 4294901760, %v23771_v12  ;;  %v12524_v0 = vsub.f32 %v23830_v54, %v12523_v57 }
 0x38d   : > { %21645 = vmatprep.subr.mxu0 %v22497_v6  ;;  %21636 = vmatmul.mubr.f32.vlgmr.msra.gmra.mxu0 %v22855_v43 }
 0x38e   : > { %v11555_v23 = vsub.f32 %v11553_v13, %v11554_v21  ;;  %v11561_v26 = vand.u32 4294901760, %v11560_v24  ;;  %21646 = vmatpush3.msra.mxu0 %v11553_v13  ;;  %21628 = vmatprep.mubr.msk.f32.mxu1 %vm22498_vm1, %v22497_v6  ;;  %v12006_v42 = vsub.f32 %v23771_v12, %v12005_v35  ;;  %v12950_v13 = vsel %vm289_vm0, %v11927_v62, 0 }
 0x38f   : > { %21647 = vmatprep.subr.mxu0 %v22497_v6  ;;  %21629 = vmatmul.mubr.f32.vlgmr.msra.gmra.mxu1 %v22843_v14 }
 0x390   : > { %21648 = vmatpush3.msra.mxu0 %v11560_v24  ;;  %21638 = vmatprep.subr.mxu1 %v22497_v6  ;;  %v11556_v19 = vand.u32 4294901760, %v11555_v23  ;;  %v11562_v28 = vsub.f32 %v11560_v24, %v11561_v26  ;;  %v12007_v47 = vand.u32 4294901760, %v12006_v42  ;;  %v23876_v24 = vand.u32 4294901760, %v12950_v13 }
 0x391   : > { %21649 = vmatprep.mubr.msk.f32.mxu0 %vm22498_vm1, %v22497_v6  ;;  %21659 = vmatprep.subr.mxu0 %v22497_v6 }
 0x392   : > { %21639 = vmatpush3.msra.mxu1 %v11556_v19  ;;  %21650 = vmatmul.mubr.f32.vlgmr.msra.gmra.mxu0 %v22846_v22  ;;  %v11563_v33 = vand.u32 4294901760, %v11562_v28  ;;  %v22421_v28 = vld [vmem:[%s22621_s12 + $0x38] sm:$0xff] }
 0x393   : > { %21660 = vmatpush3.msra.mxu0 %v11554_v21  ;;  %21640 = vmatprep.subr.mxu1 %v22497_v6  ;;  %v23872_v21 = vand.u32 4294901760, %v12947_v7 }
 0x394   : > { %21661 = vmatprep.subr.mxu0 %v22497_v6  ;;  %21641 = vmatpush3.msra.mxu1 %v11563_v33 }
 0x395   : > { %21642 = vmatprep.mubr.msk.f32.mxu1 %vm22498_vm1, %v22497_v6  ;;  %21662 = vmatpush3.msra.mxu0 %v11561_v26  ;;  %v23883_v23 = vsub.f32 %v12947_v7, %v23872_v21 }
 0x396   : > { %21643 = vmatmul.mubr.f32.vlgmr.msra.gmra.mxu1 %v22843_v14  ;;  %21652 = vmatprep.subr.mxu1 %v22497_v6 }
 0x397   : > { %21653 = vmatpush3.msra.mxu1 %v23745_v63  ;;  %21656 = vmatprep.mubr.msk.f32.mxu1 %vm22498_vm1, %v22497_v6 }
 0x398   : > { %21654 = vmatprep.subr.mxu1 %v22497_v6  ;;  %21663 = vmatprep.mubr.msk.f32.mxu0 %vm22498_vm1, %v22497_v6 }
 0x399   : > { %21655 = vmatpush3.msra.mxu1 %v11478_v16  ;;  %21664 = vmatmul.mubr.f32.vlgmr.msra.gmra.mxu0 %v22843_v14 }
 0x39a   : > { %21657 = vmatmul.mubr.f32.vlgmr.msra.gmra.mxu1 %v22849_v30  ;;  %21666 = vmatprep.subr.mxu1 %v22497_v6 }
 0x39b   : > { %21673 = vmatprep.subr.mxu0 %v22630_v3  ;;  %21667 = vmatpush3.msra.mxu1 %v23745_v63  ;;  %v12514_v63 = vsub.f32 %v23825_v53, %v12513_v55 }
 0x39c   : > { %21674 = vmatpush3.msra.mxu0 %v22630_v3  ;;  %21668 = vmatprep.subr.mxu1 %v22497_v6 }
 0x39d   : > { %21675 = vmatprep.subr.mxu0 %v22632_v4  ;;  %21669 = vmatpush3.msra.mxu1 %v11478_v16  ;;  %v12515_v8 = vand.u32 4294901760, %v12514_v63  ;;  %v12525_v16 = vand.u32 4294901760, %v12524_v0 }
 0x39e   : > { %21670 = vmatprep.mubr.msk.f32.mxu1 %vm22498_vm1, %v22497_v6  ;;  %21676 = vmatpush3.msra.mxu0 %v22632_v4 }
 0x39f   : > { %21677 = vmatprep.mubr.f32.mxu0 %v12007_v47  ;;  %21671 = vmatmul.mubr.f32.vlgmr.msra.gmra.mxu1 %v22843_v14 }
 0x3a0   : > { %21678 = vmatmul.mubr.f32.vlgmr.msra.gmra.mxu0 %v12017_v48  ;;  %21680 = vmatprep.subr.mxu1 %v22669_v25 }
 0x3a1   : > { %21687 = vmatprep.subr.mxu0 %v22640_v9  ;;  %21681 = vmatpush3.msra.mxu1 %v22669_v25 }
 0x3a2   : > { %21688 = vmatpush3.msra.mxu0 %v22640_v9  ;;  %21682 = vmatprep.subr.mxu1 %v22671_v27 }
 0x3a3   : > { %21689 = vmatprep.subr.mxu0 %v22643_v10  ;;  %21683 = vmatpush3.msra.mxu1 %v22671_v27 }
 0x3a4   : > { %21684 = vmatprep.mubr.f32.mxu1 %v23759_v18  ;;  %21690 = vmatpush3.msra.mxu0 %v22643_v10 }
 0x3a5   : > { %21691 = vmatprep.mubr.f32.mxu0 %v23771_v12  ;;  %21685 = vmatmul.mubr.f32.vlgmr.msra.gmra.mxu1 %v23761_v20  ;;  %v22420_v12 = vld [vmem:[%s22621_s12 + $0x30] sm:$0xff] }
 0x3a6   : > { %21692 = vmatmul.mubr.f32.vlgmr.msra.gmra.mxu0 %v23775_v32  ;;  %21694 = vmatprep.subr.mxu1 %v22630_v3  ;;  %v11928_v19 = vmul.f32 %v22420_v12, %v22420_v12  ;;  %v11929_v32 = vmul.f32 %v22421_v28, %v22421_v28 }
 0x3a7   : > { %21701 = vmatprep.subr.mxu0 %v22655_v15  ;;  %21695 = vmatpush3.msra.mxu1 %v22630_v3 }
 0x3a8   : > { %21702 = vmatpush3.msra.mxu0 %v22655_v15  ;;  %21696 = vmatprep.subr.mxu1 %v22632_v4  ;;  %v13458_v29 = vsel %vm289_vm0, %v11929_v32, 0 }
 0x3a9   : > { %21703 = vmatprep.subr.mxu0 %v22659_v17  ;;  %21697 = vmatpush3.msra.mxu1 %v22632_v4  ;;  %v23934_v42 = vand.u32 4294901760, %v13458_v29 }
 0x3aa   : > { %21698 = vmatprep.mubr.f32.mxu1 %v12005_v35  ;;  %21704 = vmatpush3.msra.mxu0 %v22659_v17 }
 0x3ab   : > { %21705 = vmatprep.mubr.f32.mxu0 %v23759_v18  ;;  %21699 = vmatmul.mubr.f32.vlgmr.msra.gmra.mxu1 %v12015_v34  ;;  %v13455_v34 = vsel %vm289_vm0, %v11928_v19, 0  ;;  %v13538_v45 = vsub.f32 %v13458_v29, %v23934_v42 }
 0x3ac   : > { %21706 = vmatmul.mubr.f32.vlgmr.msra.gmra.mxu0 %v23761_v20  ;;  %21708 = vmatprep.subr.mxu1 %v22630_v3  ;;  %v23930_v41 = vand.u32 4294901760, %v13455_v34 }
 0x3ad   : > { %21715 = vmatprep.subr.mxu0 %v22630_v3  ;;  %21709 = vmatpush3.msra.mxu1 %v22630_v3  ;;  %v13539_v40 = vand.u32 4294901760, %v13538_v45 }
 0x3ae   : > { %21716 = vmatpush3.msra.mxu0 %v22630_v3  ;;  %21710 = vmatprep.subr.mxu1 %v22632_v4  ;;  %v13528_v44 = vsub.f32 %v13455_v34, %v23930_v41 }
 0x3af   : > { %21717 = vmatprep.subr.mxu0 %v22632_v4  ;;  %21711 = vmatpush3.msra.mxu1 %v22632_v4 }
 0x3b0   : > { %21712 = vmatprep.mubr.f32.mxu1 %v23759_v18  ;;  %21718 = vmatpush3.msra.mxu0 %v22632_v4  ;;  %v23888_v18 = vsub.f32 %v12950_v13, %v23876_v24  ;;  %v13529_v47 = vand.u32 4294901760, %v13528_v44 }
 0x3b1   : > { %21719 = vmatprep.mubr.f32.mxu0 %v12515_v8  ;;  %21713 = vmatmul.mubr.f32.vlgmr.msra.gmra.mxu1 %v23761_v20  ;;  %v13021_v20 = vand.u32 4294901760, %v23883_v23 }
 0x3b2   : > { %21720 = vmatmul.mubr.f32.vlgmr.msra.gmra.mxu0 %v12525_v16  ;;  %21722 = vmatprep.subr.mxu1 %v22669_v25  ;;  %v13031_v26 = vand.u32 4294901760, %v23888_v18  ;;  %v13530_v48 = vsub.f32 %v13528_v44, %v13529_v47 }
 0x3b3   : > { %21729 = vmatprep.subr.mxu0 %v22640_v9  ;;  %21723 = vmatpush3.msra.mxu1 %v22669_v25  ;;  %v13022_v33 = vsub.f32 %v23883_v23, %v13021_v20 }
 0x3b4   : > { %21730 = vmatpush3.msra.mxu0 %v22640_v9  ;;  %21724 = vmatprep.subr.mxu1 %v22671_v27  ;;  %v13032_v35 = vsub.f32 %v23888_v18, %v13031_v26 }
 0x3b5   : > { %21731 = vmatprep.subr.mxu0 %v22643_v10  ;;  %21725 = vmatpush3.msra.mxu1 %v22671_v27  ;;  %v13023_v37 = vand.u32 4294901760, %v13022_v33 }
 0x3b6   : > { %21726 = vmatprep.mubr.f32.mxu1 %v23813_v50  ;;  %21732 = vmatpush3.msra.mxu0 %v22643_v10  ;;  %v13033_v39 = vand.u32 4294901760, %v13032_v35 }
 0x3b7   : > { %21733 = vmatprep.mubr.f32.mxu0 %v23825_v53  ;;  %21727 = vmatmul.mubr.f32.vlgmr.msra.gmra.mxu1 %v23818_v52 }
 0x3b8   : > { %21734 = vmatmul.mubr.f32.vlgmr.msra.gmra.mxu0 %v23830_v54  ;;  %21736 = vmatprep.subr.mxu1 %v22630_v3 }
 0x3b9   : > { %21743 = vmatprep.subr.mxu0 %v22655_v15  ;;  %21737 = vmatpush3.msra.mxu1 %v22630_v3 }
 0x3ba   : > { %21744 = vmatpush3.msra.mxu0 %v22655_v15  ;;  %21738 = vmatprep.subr.mxu1 %v22632_v4 }
 0x3bb   : > { %21745 = vmatprep.subr.mxu0 %v22659_v17  ;;  %21739 = vmatpush3.msra.mxu1 %v22632_v4 }
 0x3bc   : > { %21740 = vmatprep.mubr.f32.mxu1 %v12513_v55  ;;  %21746 = vmatpush3.msra.mxu0 %v22659_v17 }
 0x3bd   : > { %21747 = vmatprep.mubr.f32.mxu0 %v23813_v50  ;;  %21741 = vmatmul.mubr.f32.vlgmr.msra.gmra.mxu1 %v12523_v57 }
 0x3be   : > { %21748 = vmatmul.mubr.f32.vlgmr.msra.gmra.mxu0 %v23818_v52  ;;  %21750 = vmatprep.subr.mxu1 %v22630_v3 }
 0x3bf   : > { %21757 = vmatprep.subr.mxu0 %v22630_v3  ;;  %21751 = vmatpush3.msra.mxu1 %v22630_v3 }
 0x3c0   : > { %21758 = vmatpush3.msra.mxu0 %v22630_v3  ;;  %21752 = vmatprep.subr.mxu1 %v22632_v4 }
 0x3c1   : > { %21759 = vmatprep.subr.mxu0 %v22632_v4  ;;  %21753 = vmatpush3.msra.mxu1 %v22632_v4 }
 0x3c2   : > { %21754 = vmatprep.mubr.f32.mxu1 %v23813_v50  ;;  %21760 = vmatpush3.msra.mxu0 %v22632_v4  ;;  %v13540_v50 = vsub.f32 %v13538_v45, %v13539_v40 }
 0x3c3   : > { %21761 = vmatprep.mubr.f32.mxu0 %v13023_v37  ;;  %21755 = vmatmul.mubr.f32.vlgmr.msra.gmra.mxu1 %v23818_v52  ;;  %v13531_v52 = vand.u32 4294901760, %v13530_v48 }
 0x3c4   : > { %21762 = vmatmul.mubr.f32.vlgmr.msra.gmra.mxu0 %v13033_v39  ;;  %21764 = vmatprep.subr.mxu1 %v22669_v25  ;;  %v13541_v53 = vand.u32 4294901760, %v13540_v50 }
 0x3c5   : > { %21771 = vmatprep.subr.mxu0 %v22640_v9  ;;  %21765 = vmatpush3.msra.mxu1 %v22669_v25 }
 0x3c6   : > { %21772 = vmatpush3.msra.mxu0 %v22640_v9  ;;  %21766 = vmatprep.subr.mxu1 %v22671_v27 }
 0x3c7   : > { %21773 = vmatprep.subr.mxu0 %v22643_v10  ;;  %21767 = vmatpush3.msra.mxu1 %v22671_v27 }
 0x3c8   : > { %21768 = vmatprep.mubr.f32.mxu1 %v23872_v21  ;;  %21774 = vmatpush3.msra.mxu0 %v22643_v10 }
 0x3c9   : > { %21775 = vmatprep.mubr.f32.mxu0 %v23883_v23  ;;  %21769 = vmatmul.mubr.f32.vlgmr.msra.gmra.mxu1 %v23876_v24 }
 0x3ca   : > { %21776 = vmatmul.mubr.f32.vlgmr.msra.gmra.mxu0 %v23888_v18  ;;  %21778 = vmatprep.subr.mxu1 %v22630_v3 }
 0x3cb   : > { %21785 = vmatprep.subr.mxu0 %v22655_v15  ;;  %21779 = vmatpush3.msra.mxu1 %v22630_v3 }
 0x3cc   : > { %21786 = vmatpush3.msra.mxu0 %v22655_v15  ;;  %21780 = vmatprep.subr.mxu1 %v22632_v4 }
 0x3cd   : > { %21787 = vmatprep.subr.mxu0 %v22659_v17  ;;  %21781 = vmatpush3.msra.mxu1 %v22632_v4 }
 0x3ce   : > { %21782 = vmatprep.mubr.f32.mxu1 %v13021_v20  ;;  %21788 = vmatpush3.msra.mxu0 %v22659_v17 }
 0x3cf   : > { %21789 = vmatprep.mubr.f32.mxu0 %v23872_v21  ;;  %21783 = vmatmul.mubr.f32.vlgmr.msra.gmra.mxu1 %v13031_v26 }
 0x3d0   : > { %21790 = vmatmul.mubr.f32.vlgmr.msra.gmra.mxu0 %v23876_v24  ;;  %21792 = vmatprep.subr.mxu1 %v22630_v3 }
 0x3d1   : > { %21799 = vmatprep.subr.mxu0 %v22630_v3  ;;  %21793 = vmatpush3.msra.mxu1 %v22630_v3 }
 0x3d2   : > { %21800 = vmatpush3.msra.mxu0 %v22630_v3  ;;  %21794 = vmatprep.subr.mxu1 %v22632_v4 }
 0x3d3   : > { %21801 = vmatprep.subr.mxu0 %v22632_v4  ;;  %21795 = vmatpush3.msra.mxu1 %v22632_v4 }
 0x3d4   : > { %21796 = vmatprep.mubr.f32.mxu1 %v23872_v21  ;;  %21802 = vmatpush3.msra.mxu0 %v22632_v4 }
 0x3d5   : > { %21803 = vmatprep.mubr.f32.mxu0 %v13531_v52  ;;  %21797 = vmatmul.mubr.f32.vlgmr.msra.gmra.mxu1 %v23876_v24 }
 0x3d6   : > { %21804 = vmatmul.mubr.f32.vlgmr.msra.gmra.mxu0 %v13541_v53  ;;  %21806 = vmatprep.subr.mxu1 %v22669_v25 }
 0x3d7   : > { %21813 = vmatprep.subr.mxu0 %v22640_v9  ;;  %21807 = vmatpush3.msra.mxu1 %v22669_v25 }
 0x3d8   : > { %21814 = vmatpush3.msra.mxu0 %v22640_v9  ;;  %21808 = vmatprep.subr.mxu1 %v22671_v27 }
 0x3d9   : > { %21815 = vmatprep.subr.mxu0 %v22643_v10  ;;  %21809 = vmatpush3.msra.mxu1 %v22671_v27 }
 0x3da   : > { %21810 = vmatprep.mubr.f32.mxu1 %v23930_v41  ;;  %21816 = vmatpush3.msra.mxu0 %v22643_v10 }
 0x3db   : > { %21817 = vmatprep.mubr.f32.mxu0 %v13528_v44  ;;  %21811 = vmatmul.mubr.f32.vlgmr.msra.gmra.mxu1 %v23934_v42 }
 0x3dc   : > { %21818 = vmatmul.mubr.f32.vlgmr.msra.gmra.mxu0 %v13538_v45  ;;  %21820 = vmatprep.subr.mxu1 %v22630_v3 }
 0x3dd   : > { %21827 = vmatprep.subr.mxu0 %v22655_v15  ;;  %21821 = vmatpush3.msra.mxu1 %v22630_v3 }
 0x3de   : > { %21828 = vmatpush3.msra.mxu0 %v22655_v15  ;;  %21822 = vmatprep.subr.mxu1 %v22632_v4 }
 0x3df   : > { %21829 = vmatprep.subr.mxu0 %v22659_v17  ;;  %21823 = vmatpush3.msra.mxu1 %v22632_v4 }
 0x3e0   : > { %21824 = vmatprep.mubr.f32.mxu1 %v13529_v47  ;;  %21830 = vmatpush3.msra.mxu0 %v22659_v17 }
 0x3e1   : > { %21831 = vmatprep.mubr.f32.mxu0 %v23930_v41  ;;  %21825 = vmatmul.mubr.f32.vlgmr.msra.gmra.mxu1 %v13539_v40 }
 0x3e2   : > { %21832 = vmatmul.mubr.f32.vlgmr.msra.gmra.mxu0 %v23934_v42  ;;  %21834 = vmatprep.subr.mxu1 %v22630_v3 }
 0x3e3   : > { %21835 = vmatpush3.msra.mxu1 %v22630_v3  ;;  %21838 = vmatprep.mubr.f32.mxu1 %v23930_v41 }
 0x3e4   : > { %21836 = vmatprep.subr.mxu1 %v22632_v4  ;;  %21841 = vmatprep.subr.mxu0 %v22497_v6 }
 0x3e5   : > { %21837 = vmatpush3.msra.mxu1 %v22632_v4  ;;  %21845 = vmatprep.mubr.msk.f32.mxu0 %vm22498_vm1, %v22497_v6 }
 0x3e6   : > { %21839 = vmatmul.mubr.f32.vlgmr.msra.gmra.mxu1 %v23934_v42  ;;  %21848 = vmatprep.subr.mxu1 %v22497_v6 }
 0x3e7   : > { %21852 = vmatprep.mubr.msk.f32.mxu1 %vm22498_vm1, %v22497_v6 }
 0x418   : > { %v10142_v54 = vpop.f32.mrf.mxu0 }
 0x41a   : > { %v21511_v55 = vpop.f32.mrf.mxu0 }
 0x41c   : > { %v10299_v57 = vpop.f32.mrf.mxu0 }
 0x41e   : > { %v21525_v58 = vpop.f32.mrf.mxu0 }
 0x420   : > { %v10223_v60 = vpop.f32.mrf.mxu1 }
 0x421   : > { %v10224_v61 = vadd.f32 %v10223_v60, %v10142_v54 }
 0x422   : > { %v21518_v62 = vpop.f32.mrf.mxu1  ;;  %v10451_v63 = vpop.f32.mrf.mxu0 }
 0x423   : > { %v10300_v0 = vadd.f32 %v10299_v57, %v10224_v61 }
 0x424   : > { %v21539_v7 = vpop.f32.mrf.mxu0 }
 0x425   : > { %v10374_v8 = vpop.f32.mrf.mxu1 }
 0x426   : > { %v10375_v13 = vadd.f32 %v10374_v8, %v10300_v0 }
 0x427   : > { %v21532_v16 = vpop.f32.mrf.mxu1 }
 0x428   : > { %v10452_v21 = vadd.f32 %v10451_v63, %v10375_v13 }
 0x429   : > { %v10524_v24 = vpop.f32.mrf.mxu1 }
 0x42a   : > { %v24007_v23 = vadd.f32 %v10524_v24, %v10452_v21  ;;  %v10601_v18 = vpop.f32.mrf.mxu0 }
 0x42b   : > { %v21546_v20 = vpop.f32.mrf.mxu1 }
 0x42c   : > { %v11909_v26 = vsub.f32 %v24007_v23, %v23611_v49  ;;  %v21553_v12 = vpop.f32.mrf.mxu0 }
 0x42e   : > { %v10758_v19 = vpop.f32.mrf.mxu0 }
 0x430   : > { %v21567_v28 = vpop.f32.mrf.mxu0 }
 0x432   : > { %v10682_v32 = vpop.f32.mrf.mxu1 }
 0x433   : > { %v10683_v33 = vadd.f32 %v10682_v32, %v10601_v18 }
 0x434   : > { %v21560_v35 = vpop.f32.mrf.mxu1  ;;  %v10910_v34 = vpop.f32.mrf.mxu0 }
 0x435   : > { %v10759_v37 = vadd.f32 %v10758_v19, %v10683_v33 }
 0x436   : > { %v21581_v29 = vpop.f32.mrf.mxu0 }
 0x437   : > { %v10833_v39 = vpop.f32.mrf.mxu1 }
 0x438   : > { %v10834_v41 = vadd.f32 %v10833_v39, %v10759_v37 }
 0x439   : > { %v21574_v42 = vpop.f32.mrf.mxu1 }
 0x43a   : > { %v10911_v44 = vadd.f32 %v10910_v34, %v10834_v41 }
 0x43b   : > { %v10983_v45 = vpop.f32.mrf.mxu1 }
 0x43c   : > { %v24011_v47 = vadd.f32 %v10983_v45, %v10911_v44  ;;  %v11060_v40 = vpop.f32.mrf.mxu0 }
 0x43d   : > { %v21588_v48 = vpop.f32.mrf.mxu1 }
 0x43e   : > { %v11910_v50 = vsub.f32 %v24011_v47, %v23617_v11  ;;  %v21595_v52 = vpop.f32.mrf.mxu0 }
 0x440   : > { %v11217_v53 = vpop.f32.mrf.mxu0 }
 0x442   : > { %v21609_v54 = vpop.f32.mrf.mxu0 }
 0x444   : > { %v11141_v55 = vpop.f32.mrf.mxu1 }
 0x445   : > { %v11142_v57 = vadd.f32 %v11141_v55, %v11060_v40 }
 0x446   : > { %v21602_v58 = vpop.f32.mrf.mxu1  ;;  %v11369_v60 = vpop.f32.mrf.mxu0 }
 0x447   : > { %v11218_v61 = vadd.f32 %v11217_v53, %v11142_v57 }
 0x448   : > { %v21623_v62 = vpop.f32.mrf.mxu0 }
 0x449   : > { %v11292_v63 = vpop.f32.mrf.mxu1 }
 0x44a   : > { %v11293_v0 = vadd.f32 %v11292_v63, %v11218_v61 }
 0x44b   : > { %v21616_v7 = vpop.f32.mrf.mxu1 }
 0x44c   : > { %v11370_v8 = vadd.f32 %v11369_v60, %v11293_v0 }
 0x44d   : > { %v11519_v13 = vpop.f32.mrf.mxu0 }
 0x44f   : > { %v11442_v16 = vpop.f32.mrf.mxu1  ;;  %v21637_v21 = vpop.f32.mrf.mxu0 }
 0x450   : > { %v24015_v24 = vadd.f32 %v11442_v16, %v11370_v8 }
 0x451   : > { %v21630_v18 = vpop.f32.mrf.mxu1 }
 0x452   : > { %v11911_v20 = vsub.f32 %v24015_v24, %v23623_v38  ;;  %v11676_v12 = vpop.f32.mrf.mxu0 }
 0x454   : > { %v21651_v19 = vpop.f32.mrf.mxu0 }
 0x456   : > { %v11600_v28 = vpop.f32.mrf.mxu1 }
 0x457   : > { %v11601_v32 = vadd.f32 %v11600_v28, %v11519_v13 }
 0x458   : > { %v21644_v33 = vpop.f32.mrf.mxu1 }
 0x459   : > { %v11677_v35 = vadd.f32 %v11676_v12, %v11601_v32  ;;  %v11828_v34 = vpop.f32.mrf.mxu0 }
 0x45a   : > { %v11751_v37 = vpop.f32.mrf.mxu1 }
 0x45b   : > { %v11752_v29 = vadd.f32 %v11751_v37, %v11677_v35  ;;  %v21665_v39 = vpop.f32.mrf.mxu0 }
 0x45c   : > { %v21658_v41 = vpop.f32.mrf.mxu1 }
 0x45d   : > { %v11829_v42 = vadd.f32 %v11828_v34, %v11752_v29 }
 0x45f   : > { %v11901_v44 = vpop.f32.mrf.mxu1 }
 0x460   : > { %v24019_v45 = vadd.f32 %v11901_v44, %v11829_v42  ;;  %v21679_v40 = vpop.f32.mrf.mxu0 }
 0x461   : > { %v21672_v48 = vpop.f32.mrf.mxu1 }
 0x462   : > { %v11912_v52 = vsub.f32 %v24019_v45, %v23629_v59  ;;  %v12009_v53 = vpop.f32.mrf.mxu0 }
 0x465   : > { %v21686_v54 = vpop.f32.mrf.mxu1 }
 0x466   : > { %v12107_v55 = vadd.f32 %v21686_v54, %v21679_v40  ;;  %v21693_v57 = vpop.f32.mrf.mxu0 }
 0x467   : > { %v12100_v58 = vpop.f32.mrf.mxu1 }
 0x468   : > { %v12190_v60 = vadd.f32 %v21693_v57, %v12107_v55  ;;  %v12101_v61 = vadd.f32 %v12100_v58, %v12009_v53  ;;  %v12182_v62 = vpop.f32.mrf.mxu0 }
 0x46a   : > { %v12183_v63 = vadd.f32 %v12182_v62, %v12101_v61 }
 0x46b   : > { %v21700_v0 = vpop.f32.mrf.mxu1 }
 0x46c   : > { %v12273_v7 = vadd.f32 %v21700_v0, %v12190_v60  ;;  %v21707_v8 = vpop.f32.mrf.mxu0 }
 0x46d   : > { %v12264_v13 = vpop.f32.mrf.mxu1 }
 0x46e   : > { %v12356_v16 = vadd.f32 %v21707_v8, %v12273_v7  ;;  %v12265_v21 = vadd.f32 %v12264_v13, %v12183_v63  ;;  %v12349_v18 = vpop.f32.mrf.mxu0 }
 0x470   : > { %v12350_v12 = vadd.f32 %v12349_v18, %v12265_v21 }
 0x471   : > { %v21714_v19 = vpop.f32.mrf.mxu1 }
 0x472   : > { %v12435_v28 = vadd.f32 %v21714_v19, %v12356_v16  ;;  %v21721_v32 = vpop.f32.mrf.mxu0 }
 0x473   : > { %v12428_v33 = vpop.f32.mrf.mxu1 }
 0x474   : > { %v24023_v35 = vand.u32 4294901760, %v12435_v28  ;;  %v12429_v34 = vadd.f32 %v12428_v33, %v12350_v12  ;;  %v12517_v37 = vpop.f32.mrf.mxu0 }
 0x476   : > { %v14069_v29 = vsub.f32 %v12435_v28, %v24023_v35  ;;  %v24026_v39 = vand.u32 4294901760, %v12429_v34  ;;  %21842 = vmatpush3.msra.mxu0 %v24023_v35 }
 0x477   : > { %v21728_v41 = vpop.f32.mrf.mxu1  ;;  %21843 = vmatprep.subr.mxu0 %v22497_v6 }
 0x478   : > { %v14070_v42 = vand.u32 4294901760, %v14069_v29  ;;  %v14076_v44 = vsub.f32 %v12429_v34, %v24026_v39  ;;  %v12615_v40 = vadd.f32 %v21728_v41, %v21721_v32  ;;  %v21735_v48 = vpop.f32.mrf.mxu0  ;;  %21844 = vmatpush3.msra.mxu0 %v24026_v39 }
 0x479   : > { %v12608_v53 = vpop.f32.mrf.mxu1  ;;  %21855 = vmatprep.subr.mxu0 %v22497_v6  ;;  %21846 = vmatmul.mubr.f32.vlgmr.msra.gmra.mxu0 %v22855_v43 }
 0x47a   : > { %v14071_v54 = vsub.f32 %v14069_v29, %v14070_v42  ;;  %v14077_v55 = vand.u32 4294901760, %v14076_v44  ;;  %v12698_v57 = vadd.f32 %v21735_v48, %v12615_v40  ;;  %v12609_v58 = vadd.f32 %v12608_v53, %v12517_v37  ;;  %v12690_v60 = vpop.f32.mrf.mxu0  ;;  %21856 = vmatpush3.msra.mxu0 %v14069_v29  ;;  %21859 = vmatprep.mubr.msk.f32.mxu0 %vm22498_vm1, %v22497_v6 }
 0x47b   : > { %21857 = vmatprep.subr.mxu0 %v22497_v6 }
 0x47c   : > { %v14078_v61 = vsub.f32 %v14076_v44, %v14077_v55  ;;  %v12691_v62 = vadd.f32 %v12690_v60, %v12609_v58  ;;  %21858 = vmatpush3.msra.mxu0 %v14076_v44  ;;  %v14072_v63 = vand.u32 4294901760, %v14071_v54 }
 0x47d   : > { %v21742_v0 = vpop.f32.mrf.mxu1  ;;  %21869 = vmatprep.subr.mxu0 %v22497_v6  ;;  %21860 = vmatmul.mubr.f32.vlgmr.msra.gmra.mxu0 %v22846_v22 }
 0x47e   : > { %v12781_v7 = vadd.f32 %v21742_v0, %v12698_v57  ;;  %v21749_v8 = vpop.f32.mrf.mxu0  ;;  %21849 = vmatpush3.msra.mxu1 %v14072_v63  ;;  %21870 = vmatpush3.msra.mxu0 %v14070_v42  ;;  %v14079_v13 = vand.u32 4294901760, %v14078_v61 }
 0x47f   : > { %v12772_v16 = vpop.f32.mrf.mxu1  ;;  %21850 = vmatprep.subr.mxu1 %v22497_v6  ;;  %21871 = vmatprep.subr.mxu0 %v22497_v6 }
 0x480   : > { %v12864_v21 = vadd.f32 %v21749_v8, %v12781_v7  ;;  %v12773_v18 = vadd.f32 %v12772_v16, %v12691_v62  ;;  %v12857_v12 = vpop.f32.mrf.mxu0  ;;  %21851 = vmatpush3.msra.mxu1 %v14079_v13  ;;  %21872 = vmatpush3.msra.mxu0 %v14077_v55 }
 0x481   : > { %21853 = vmatmul.mubr.f32.vlgmr.msra.gmra.mxu1 %v22843_v14  ;;  %21862 = vmatprep.subr.mxu1 %v22497_v6 }
 0x482   : > { %v12858_v19 = vadd.f32 %v12857_v12, %v12773_v18  ;;  %21873 = vmatprep.mubr.msk.f32.mxu0 %vm22498_vm1, %v22497_v6  ;;  %21883 = vmatprep.subr.mxu0 %v22497_v6 }
 0x483   : > { %v21756_v28 = vpop.f32.mrf.mxu1  ;;  %21863 = vmatpush3.msra.mxu1 %v24023_v35  ;;  %21874 = vmatmul.mubr.f32.vlgmr.msra.gmra.mxu0 %v22843_v14 }
 0x484   : > { %v12943_v32 = vadd.f32 %v21756_v28, %v12864_v21  ;;  %v21763_v33 = vpop.f32.mrf.mxu0  ;;  %21864 = vmatprep.subr.mxu1 %v22497_v6  ;;  %21866 = vmatprep.mubr.msk.f32.mxu1 %vm22498_vm1, %v22497_v6 }
 0x485   : > { %v12936_v34 = vpop.f32.mrf.mxu1  ;;  %21865 = vmatpush3.msra.mxu1 %v24026_v39  ;;  %21887 = vmatprep.mubr.msk.f32.mxu0 %vm22498_vm1, %v22497_v6 }
 0x486   : > { %v24054_v37 = vand.u32 4294901760, %v12943_v32  ;;  %v12937_v29 = vadd.f32 %v12936_v34, %v12858_v19  ;;  %v13025_v41 = vpop.f32.mrf.mxu0  ;;  %21867 = vmatmul.mubr.f32.vlgmr.msra.gmra.mxu1 %v22849_v30  ;;  %21876 = vmatprep.subr.mxu1 %v22497_v6 }
 0x487   : > { %21877 = vmatpush3.msra.mxu1 %v24023_v35  ;;  %21880 = vmatprep.mubr.msk.f32.mxu1 %vm22498_vm1, %v22497_v6 }
 0x488   : > { %v14528_v42 = vsub.f32 %v12943_v32, %v24054_v37  ;;  %v24062_v44 = vand.u32 4294901760, %v12937_v29  ;;  %21884 = vmatpush3.msra.mxu0 %v24054_v37  ;;  %21878 = vmatprep.subr.mxu1 %v22497_v6 }
 0x489   : > { %v21770_v40 = vpop.f32.mrf.mxu1  ;;  %21885 = vmatprep.subr.mxu0 %v22497_v6  ;;  %21879 = vmatpush3.msra.mxu1 %v24026_v39 }
 0x48a   : > { %v14529_v48 = vand.u32 4294901760, %v14528_v42  ;;  %v14535_v53 = vsub.f32 %v12937_v29, %v24062_v44  ;;  %v13123_v35 = vadd.f32 %v21770_v40, %v21763_v33  ;;  %v21777_v54 = vpop.f32.mrf.mxu0  ;;  %21886 = vmatpush3.msra.mxu0 %v24062_v44  ;;  %21881 = vmatmul.mubr.f32.vlgmr.msra.gmra.mxu1 %v22843_v14 }
 0x48b   : > { %v13116_v55 = vpop.f32.mrf.mxu1  ;;  %21897 = vmatprep.subr.mxu0 %v22497_v6  ;;  %21888 = vmatmul.mubr.f32.vlgmr.msra.gmra.mxu0 %v22855_v43 }
 0x48c   : > { %v14530_v57 = vsub.f32 %v14528_v42, %v14529_v48  ;;  %v14536_v58 = vand.u32 4294901760, %v14535_v53  ;;  %v13206_v60 = vadd.f32 %v21777_v54, %v13123_v35  ;;  %v13117_v61 = vadd.f32 %v13116_v55, %v13025_v41  ;;  %v13198_v62 = vpop.f32.mrf.mxu0  ;;  %21898 = vmatpush3.msra.mxu0 %v14528_v42  ;;  %21890 = vmatprep.subr.mxu1 %v22497_v6 }
 0x48d   : > { %21899 = vmatprep.subr.mxu0 %v22497_v6  ;;  %21901 = vmatprep.mubr.msk.f32.mxu0 %vm22498_vm1, %v22497_v6 }
 0x48e   : > { %v14537_v39 = vsub.f32 %v14535_v53, %v14536_v58  ;;  %v13199_v63 = vadd.f32 %v13198_v62, %v13117_v61  ;;  %21900 = vmatpush3.msra.mxu0 %v14535_v53  ;;  %v14531_v0 = vand.u32 4294901760, %v14530_v57  ;;  %21894 = vmatprep.mubr.msk.f32.mxu1 %vm22498_vm1, %v22497_v6 }
 0x48f   : > { %v21784_v7 = vpop.f32.mrf.mxu1  ;;  %21911 = vmatprep.subr.mxu0 %v22497_v6  ;;  %21902 = vmatmul.mubr.f32.vlgmr.msra.gmra.mxu0 %v22846_v22 }
 0x490   : > { %v13289_v8 = vadd.f32 %v21784_v7, %v13206_v60  ;;  %v21791_v13 = vpop.f32.mrf.mxu0  ;;  %21891 = vmatpush3.msra.mxu1 %v14531_v0  ;;  %21912 = vmatpush3.msra.mxu0 %v14529_v48  ;;  %v14538_v16 = vand.u32 4294901760, %v14537_v39 }
 0x491   : > { %v13280_v21 = vpop.f32.mrf.mxu1  ;;  %21892 = vmatprep.subr.mxu1 %v22497_v6  ;;  %21913 = vmatprep.subr.mxu0 %v22497_v6 }
 0x492   : > { %v13372_v18 = vadd.f32 %v21791_v13, %v13289_v8  ;;  %v13281_v12 = vadd.f32 %v13280_v21, %v13199_v63  ;;  %v13365_v19 = vpop.f32.mrf.mxu0  ;;  %21893 = vmatpush3.msra.mxu1 %v14538_v16  ;;  %21914 = vmatpush3.msra.mxu0 %v14536_v58 }
 0x493   : > { %21895 = vmatmul.mubr.f32.vlgmr.msra.gmra.mxu1 %v22843_v14  ;;  %21904 = vmatprep.subr.mxu1 %v22497_v6 }
 0x494   : > { %v13366_v28 = vadd.f32 %v13365_v19, %v13281_v12  ;;  %21915 = vmatprep.mubr.msk.f32.mxu0 %vm22498_vm1, %v22497_v6  ;;  %21925 = vmatprep.subr.mxu0 %v22497_v6 }
 0x495   : > { %v21798_v32 = vpop.f32.mrf.mxu1  ;;  %21905 = vmatpush3.msra.mxu1 %v24054_v37  ;;  %21916 = vmatmul.mubr.f32.vlgmr.msra.gmra.mxu0 %v22843_v14 }
 0x496   : > { %v13451_v33 = vadd.f32 %v21798_v32, %v13372_v18  ;;  %v21805_v34 = vpop.f32.mrf.mxu0  ;;  %21906 = vmatprep.subr.mxu1 %v22497_v6  ;;  %21908 = vmatprep.mubr.msk.f32.mxu1 %vm22498_vm1, %v22497_v6  ;;  %v22422_v32 = vld [vmem:[%s22611_s14] sm:$0xff] }
 0x497   : > { %v13444_v29 = vpop.f32.mrf.mxu1  ;;  %21907 = vmatpush3.msra.mxu1 %v24062_v44  ;;  %21929 = vmatprep.mubr.msk.f32.mxu0 %vm22498_vm1, %v22497_v6 }
 0x498   : > { %v24096_v41 = vand.u32 4294901760, %v13451_v33  ;;  %v13445_v42 = vadd.f32 %v13444_v29, %v13366_v28  ;;  %v13533_v40 = vpop.f32.mrf.mxu0  ;;  %21909 = vmatmul.mubr.f32.vlgmr.msra.gmra.mxu1 %v22849_v30  ;;  %21918 = vmatprep.subr.mxu1 %v22497_v6 }
 0x499   : > { %21919 = vmatpush3.msra.mxu1 %v24054_v37  ;;  %21922 = vmatprep.mubr.msk.f32.mxu1 %vm22498_vm1, %v22497_v6 }
 0x49a   : > { %v14987_v48 = vsub.f32 %v13451_v33, %v24096_v41  ;;  %v24104_v53 = vand.u32 4294901760, %v13445_v42  ;;  %21926 = vmatpush3.msra.mxu0 %v24096_v41  ;;  %21920 = vmatprep.subr.mxu1 %v22497_v6  ;;  %v15806_v33 = vmul.f32 %v22422_v32, %v22422_v32 }
 0x49b   : > { %v21812_v35 = vpop.f32.mrf.mxu1  ;;  %21927 = vmatprep.subr.mxu0 %v22497_v6  ;;  %21921 = vmatpush3.msra.mxu1 %v24062_v44 }
 0x49c   : > { %v14988_v54 = vand.u32 4294901760, %v14987_v48  ;;  %v14994_v55 = vsub.f32 %v13445_v42, %v24104_v53  ;;  %v13631_v37 = vadd.f32 %v21812_v35, %v21805_v34  ;;  %v21819_v57 = vpop.f32.mrf.mxu0  ;;  %21928 = vmatpush3.msra.mxu0 %v24104_v53  ;;  %21923 = vmatmul.mubr.f32.vlgmr.msra.gmra.mxu1 %v22843_v14  ;;  %v22423_v34 = vld [vmem:[%s22611_s14 + $0x8] sm:$0xff] }
 0x49d   : > { %v13624_v58 = vpop.f32.mrf.mxu1  ;;  %21939 = vmatprep.subr.mxu0 %v22497_v6  ;;  %21930 = vmatmul.mubr.f32.vlgmr.msra.gmra.mxu0 %v22855_v43  ;;  %v15807_v29 = vmul.f32 %v22423_v34, %v22423_v34 }
 0x49e   : > { %v14989_v60 = vsub.f32 %v14987_v48, %v14988_v54  ;;  %v14995_v61 = vand.u32 4294901760, %v14994_v55  ;;  %v13714_v62 = vadd.f32 %v21819_v57, %v13631_v37  ;;  %v13625_v39 = vadd.f32 %v13624_v58, %v13533_v40  ;;  %v13706_v63 = vpop.f32.mrf.mxu0  ;;  %21940 = vmatpush3.msra.mxu0 %v14987_v48  ;;  %21932 = vmatprep.subr.mxu1 %v22497_v6 }
 0x49f   : > { %21941 = vmatprep.subr.mxu0 %v22497_v6  ;;  %21943 = vmatprep.mubr.msk.f32.mxu0 %vm22498_vm1, %v22497_v6  ;;  %v15815_v37 = vsel %vm289_vm0, %v15806_v33, 0  ;;  %v15818_v57 = vsel %vm289_vm0, %v15807_v29, 0 }
 0x4a0   : > { %v14996_v44 = vsub.f32 %v14994_v55, %v14995_v61  ;;  %v13707_v0 = vadd.f32 %v13706_v63, %v13625_v39  ;;  %21942 = vmatpush3.msra.mxu0 %v14994_v55  ;;  %v14990_v7 = vand.u32 4294901760, %v14989_v60  ;;  %21936 = vmatprep.mubr.msk.f32.mxu1 %vm22498_vm1, %v22497_v6  ;;  %v24154_v63 = vand.u32 4294901760, %v15818_v57 }
 0x4a1   : > { %v21826_v8 = vpop.f32.mrf.mxu1  ;;  %21953 = vmatprep.subr.mxu0 %v22497_v6  ;;  %21944 = vmatmul.mubr.f32.vlgmr.msra.gmra.mxu0 %v22846_v22 }
 0x4a2   : > { %v13797_v13 = vadd.f32 %v21826_v8, %v13714_v62  ;;  %v21833_v16 = vpop.f32.mrf.mxu0  ;;  %21933 = vmatpush3.msra.mxu1 %v14990_v7  ;;  %21954 = vmatpush3.msra.mxu0 %v14988_v54  ;;  %v14997_v21 = vand.u32 4294901760, %v14996_v44  ;;  %v24167_v8 = vsub.f32 %v15818_v57, %v24154_v63 }
 0x4a3   : > { %v13788_v18 = vpop.f32.mrf.mxu1  ;;  %21934 = vmatprep.subr.mxu1 %v22497_v6  ;;  %21955 = vmatprep.subr.mxu0 %v22497_v6 }
 0x4a4   : > { %v13880_v12 = vadd.f32 %v21833_v16, %v13797_v13  ;;  %v13789_v19 = vadd.f32 %v13788_v18, %v13707_v0  ;;  %21935 = vmatpush3.msra.mxu1 %v14997_v21  ;;  %21956 = vmatpush3.msra.mxu0 %v14995_v61  ;;  %v13873_v28 = vpop.f32.mrf.mxu0  ;;  %v24151_v61 = vand.u32 4294901760, %v15815_v37  ;;  %v15899_v21 = vand.u32 4294901760, %v24167_v8  ;;  %v22424_v18 = vld [vmem:[%s22611_s14 + $0x10] sm:$0xff] }
 0x4a5   : > { %21937 = vmatmul.mubr.f32.vlgmr.msra.gmra.mxu1 %v22843_v14  ;;  %21946 = vmatprep.subr.mxu1 %v22497_v6 }
 0x4a6   : > { %v13874_v42 = vadd.f32 %v13873_v28, %v13789_v19  ;;  %v21840_v40 = vpop.f32.mrf.mxu1  ;;  %21957 = vmatprep.mubr.msk.f32.mxu0 %vm22498_vm1, %v22497_v6  ;;  %21967 = vmatprep.subr.mxu0 %v22497_v6  ;;  %v22425_v19 = vld [vmem:[%s22611_s14 + $0x18] sm:$0xff]  ;;  %v15900_v33 = vsub.f32 %v24167_v8, %v15899_v21 }
 0x4a7   : > { %v13959_v48 = vadd.f32 %v21840_v40, %v13880_v12  ;;  %21947 = vmatpush3.msra.mxu1 %v24096_v41  ;;  %21958 = vmatmul.mubr.f32.vlgmr.msra.gmra.mxu0 %v22843_v14  ;;  %v15808_v12 = vmul.f32 %v22424_v18, %v22424_v18  ;;  %v15809_v28 = vmul.f32 %v22425_v19, %v22425_v19 }
 0x4a8   : > { %v13952_v35 = vpop.f32.mrf.mxu1  ;;  %21948 = vmatprep.subr.mxu1 %v22497_v6  ;;  %21950 = vmatprep.mubr.msk.f32.mxu1 %vm22498_vm1, %v22497_v6  ;;  %v15901_v40 = vand.u32 4294901760, %v15900_v33 }
 0x4a9   : > { %v24137_v54 = vand.u32 4294901760, %v13959_v48  ;;  %v13953_v55 = vadd.f32 %v13952_v35, %v13874_v42  ;;  %21949 = vmatpush3.msra.mxu1 %v24104_v53  ;;  %21971 = vmatprep.mubr.msk.f32.mxu0 %vm22498_vm1, %v22497_v6  ;;  %v16323_v34 = vsel %vm289_vm0, %v15808_v12, 0  ;;  %v16326_v42 = vsel %vm289_vm0, %v15809_v28, 0  ;;  %v22428_v12 = vld [vmem:[%s22611_s14 + $0x30] sm:$0xff]  ;;  %v22429_v28 = vld [vmem:[%s22611_s14 + $0x38] sm:$0xff] }
 0x4aa   : > { %21951 = vmatmul.mubr.f32.vlgmr.msra.gmra.mxu1 %v22849_v30  ;;  %21960 = vmatprep.subr.mxu1 %v22497_v6  ;;  %v24210_v35 = vand.u32 4294901760, %v16326_v42  ;;  %v15812_v19 = vmul.f32 %v22428_v12, %v22428_v12 }
 0x4ab   : > { %v15446_v58 = vsub.f32 %v13959_v48, %v24137_v54  ;;  %v15371_v60 = vand.u32 4294901760, %v13953_v55  ;;  %21968 = vmatpush3.msra.mxu0 %v24137_v54  ;;  %21961 = vmatpush3.msra.mxu1 %v24096_v41  ;;  %v24163_v41 = vsub.f32 %v15815_v37, %v24151_v61  ;;  %v24205_v48 = vand.u32 4294901760, %v16323_v34 }
 0x4ac   : > { %21969 = vmatprep.subr.mxu0 %v22497_v6  ;;  %21962 = vmatprep.subr.mxu1 %v22497_v6 }
 0x4ad   : > { %v15447_v62 = vand.u32 4294901760, %v15446_v58  ;;  %v15453_v39 = vsub.f32 %v13953_v55, %v15371_v60  ;;  %21970 = vmatpush3.msra.mxu0 %v15371_v60  ;;  %21963 = vmatpush3.msra.mxu1 %v24104_v53  ;;  %v15889_v16 = vand.u32 4294901760, %v24163_v41  ;;  %v24222_v55 = vsub.f32 %v16326_v42, %v24210_v35 }
 0x4ae   : > { %21981 = vmatprep.subr.mxu0 %v22497_v6  ;;  %21972 = vmatmul.mubr.f32.vlgmr.msra.gmra.mxu0 %v22855_v43 }
 0x4af   : > { %v15448_v44 = vsub.f32 %v15446_v58, %v15447_v62  ;;  %v15454_v0 = vand.u32 4294901760, %v15453_v39  ;;  %21982 = vmatpush3.msra.mxu0 %v15446_v58  ;;  %21964 = vmatprep.mubr.msk.f32.mxu1 %vm22498_vm1, %v22497_v6  ;;  %v15890_v32 = vsub.f32 %v24163_v41, %v15889_v16  ;;  %v16407_v57 = vand.u32 4294901760, %v24222_v55  ;;  %v22426_v58 = vld [vmem:[%s22611_s14 + $0x20] sm:$0xff] }
 0x4b0   : > { %21983 = vmatprep.subr.mxu0 %v22497_v6  ;;  %21965 = vmatmul.mubr.f32.vlgmr.msra.gmra.mxu1 %v22843_v14 }
 0x4b1   : > { %v15455_v53 = vsub.f32 %v15453_v39, %v15454_v0  ;;  %21984 = vmatpush3.msra.mxu0 %v15453_v39  ;;  %21974 = vmatprep.subr.mxu1 %v22497_v6  ;;  %v15449_v7 = vand.u32 4294901760, %v15448_v44  ;;  %v15891_v29 = vand.u32 4294901760, %v15890_v32  ;;  %v15813_v32 = vmul.f32 %v22429_v28, %v22429_v28 }
 0x4b2   : > { %21985 = vmatprep.mubr.msk.f32.mxu0 %vm22498_vm1, %v22497_v6  ;;  %21995 = vmatprep.subr.mxu0 %v22497_v6 }
 0x4b3   : > { %21975 = vmatpush3.msra.mxu1 %v15449_v7  ;;  %21986 = vmatmul.mubr.f32.vlgmr.msra.gmra.mxu0 %v22846_v22  ;;  %v15456_v13 = vand.u32 4294901760, %v15455_v53 }
 0x4b4   : > { %21996 = vmatpush3.msra.mxu0 %v15447_v62  ;;  %21976 = vmatprep.subr.mxu1 %v22497_v6  ;;  %v22427_v62 = vld [vmem:[%s22611_s14 + $0x28] sm:$0xff] }
 0x4b5   : > { %21997 = vmatprep.subr.mxu0 %v22497_v6  ;;  %21977 = vmatpush3.msra.mxu1 %v15456_v13  ;;  %v15811_v39 = vmul.f32 %v22427_v62, %v22427_v62 }
 0x4b6   : > { %21978 = vmatprep.mubr.msk.f32.mxu1 %vm22498_vm1, %v22497_v6  ;;  %21998 = vmatpush3.msra.mxu0 %v15454_v0  ;;  %v16408_v0 = vsub.f32 %v24222_v55, %v16407_v57 }
 0x4b7   : > { %21979 = vmatmul.mubr.f32.vlgmr.msra.gmra.mxu1 %v22843_v14  ;;  %21988 = vmatprep.subr.mxu1 %v22497_v6  ;;  %v16834_v7 = vsel %vm289_vm0, %v15811_v39, 0 }
 0x4b8   : > { %21989 = vmatpush3.msra.mxu1 %v24137_v54  ;;  %21992 = vmatprep.mubr.msk.f32.mxu1 %vm22498_vm1, %v22497_v6  ;;  %v16409_v13 = vand.u32 4294901760, %v16408_v0 }
 0x4b9   : > { %21990 = vmatprep.subr.mxu1 %v22497_v6  ;;  %21999 = vmatprep.mubr.msk.f32.mxu0 %vm22498_vm1, %v22497_v6 }
 0x4ba   : > { %21991 = vmatpush3.msra.mxu1 %v15371_v60  ;;  %22000 = vmatmul.mubr.f32.vlgmr.msra.gmra.mxu0 %v22843_v14 }
 0x4bb   : > { %21993 = vmatmul.mubr.f32.vlgmr.msra.gmra.mxu1 %v22849_v30  ;;  %22002 = vmatprep.subr.mxu1 %v22497_v6 }
 0x4bc   : > { %22009 = vmatprep.subr.mxu0 %v22630_v3  ;;  %22003 = vmatpush3.msra.mxu1 %v24137_v54  ;;  %v24217_v54 = vsub.f32 %v16323_v34, %v24205_v48 }
 0x4bd   : > { %22010 = vmatpush3.msra.mxu0 %v22630_v3  ;;  %22004 = vmatprep.subr.mxu1 %v22497_v6 }
 0x4be   : > { %22011 = vmatprep.subr.mxu0 %v22632_v4  ;;  %22005 = vmatpush3.msra.mxu1 %v15371_v60  ;;  %v16397_v37 = vand.u32 4294901760, %v24217_v54  ;;  %v15810_v60 = vmul.f32 %v22426_v58, %v22426_v58 }
 0x4bf   : > { %22006 = vmatprep.mubr.msk.f32.mxu1 %vm22498_vm1, %v22497_v6  ;;  %22012 = vmatpush3.msra.mxu0 %v22632_v4 }
 0x4c0   : > { %22013 = vmatprep.mubr.f32.mxu0 %v15891_v29  ;;  %22007 = vmatmul.mubr.f32.vlgmr.msra.gmra.mxu1 %v22843_v14  ;;  %v16398_v44 = vsub.f32 %v24217_v54, %v16397_v37  ;;  %v16831_v53 = vsel %vm289_vm0, %v15810_v60, 0  ;;  %v17339_v29 = vsel %vm289_vm0, %v15812_v19, 0 }
 0x4c1   : > { %22014 = vmatmul.mubr.f32.vlgmr.msra.gmra.mxu0 %v15901_v40  ;;  %22016 = vmatprep.subr.mxu1 %v22669_v25  ;;  %v17342_v40 = vsel %vm289_vm0, %v15813_v32, 0 }
 0x4c2   : > { %22023 = vmatprep.subr.mxu0 %v22640_v9  ;;  %22017 = vmatpush3.msra.mxu1 %v22669_v25 }
 0x4c3   : > { %22024 = vmatpush3.msra.mxu0 %v22640_v9  ;;  %22018 = vmatprep.subr.mxu1 %v22671_v27 }
 0x4c4   : > { %22025 = vmatprep.subr.mxu0 %v22643_v10  ;;  %22019 = vmatpush3.msra.mxu1 %v22671_v27 }
 0x4c5   : > { %22020 = vmatprep.mubr.f32.mxu1 %v24151_v61  ;;  %22026 = vmatpush3.msra.mxu0 %v22643_v10 }
 0x4c6   : > { %22027 = vmatprep.mubr.f32.mxu0 %v24163_v41  ;;  %22021 = vmatmul.mubr.f32.vlgmr.msra.gmra.mxu1 %v24154_v63  ;;  %v16399_v41 = vand.u32 4294901760, %v16398_v44 }
 0x4c7   : > { %22028 = vmatmul.mubr.f32.vlgmr.msra.gmra.mxu0 %v24167_v8  ;;  %22030 = vmatprep.subr.mxu1 %v22630_v3  ;;  %v24264_v8 = vand.u32 4294901760, %v16831_v53 }
 0x4c8   : > { %22037 = vmatprep.subr.mxu0 %v22655_v15  ;;  %22031 = vmatpush3.msra.mxu1 %v22630_v3 }
 0x4c9   : > { %22038 = vmatpush3.msra.mxu0 %v22655_v15  ;;  %22032 = vmatprep.subr.mxu1 %v22632_v4 }
 0x4ca   : > { %22039 = vmatprep.subr.mxu0 %v22659_v17  ;;  %22033 = vmatpush3.msra.mxu1 %v22632_v4 }
 0x4cb   : > { %22034 = vmatprep.mubr.f32.mxu1 %v15889_v16  ;;  %22040 = vmatpush3.msra.mxu0 %v22659_v17  ;;  %v24268_v16 = vand.u32 4294901760, %v16834_v7 }
 0x4cc   : > { %22041 = vmatprep.mubr.f32.mxu0 %v24151_v61  ;;  %22035 = vmatmul.mubr.f32.vlgmr.msra.gmra.mxu1 %v15899_v21  ;;  %v24275_v21 = vsub.f32 %v16831_v53, %v24264_v8 }
 0x4cd   : > { %22042 = vmatmul.mubr.f32.vlgmr.msra.gmra.mxu0 %v24154_v63  ;;  %22044 = vmatprep.subr.mxu1 %v22630_v3 }
 0x4ce   : > { %22051 = vmatprep.subr.mxu0 %v22630_v3  ;;  %22045 = vmatpush3.msra.mxu1 %v22630_v3 }
 0x4cf   : > { %22052 = vmatpush3.msra.mxu0 %v22630_v3  ;;  %22046 = vmatprep.subr.mxu1 %v22632_v4 }
 0x4d0   : > { %22053 = vmatprep.subr.mxu0 %v22632_v4  ;;  %22047 = vmatpush3.msra.mxu1 %v22632_v4 }
 0x4d1   : > { %22048 = vmatprep.mubr.f32.mxu1 %v24151_v61  ;;  %22054 = vmatpush3.msra.mxu0 %v22632_v4  ;;  %v24280_v61 = vsub.f32 %v16834_v7, %v24268_v16 }
 0x4d2   : > { %22055 = vmatprep.mubr.f32.mxu0 %v16399_v41  ;;  %22049 = vmatmul.mubr.f32.vlgmr.msra.gmra.mxu1 %v24154_v63  ;;  %v16905_v63 = vand.u32 4294901760, %v24275_v21 }
 0x4d3   : > { %22056 = vmatmul.mubr.f32.vlgmr.msra.gmra.mxu0 %v16409_v13  ;;  %22058 = vmatprep.subr.mxu1 %v22669_v25  ;;  %v16915_v18 = vand.u32 4294901760, %v24280_v61 }
 0x4d4   : > { %22065 = vmatprep.subr.mxu0 %v22640_v9  ;;  %22059 = vmatpush3.msra.mxu1 %v22669_v25  ;;  %v16906_v33 = vsub.f32 %v24275_v21, %v16905_v63 }
 0x4d5   : > { %22066 = vmatpush3.msra.mxu0 %v22640_v9  ;;  %22060 = vmatprep.subr.mxu1 %v22671_v27  ;;  %v16916_v34 = vsub.f32 %v24280_v61, %v16915_v18 }
 0x4d6   : > { %22067 = vmatprep.subr.mxu0 %v22643_v10  ;;  %22061 = vmatpush3.msra.mxu1 %v22671_v27  ;;  %v16907_v42 = vand.u32 4294901760, %v16906_v33 }
 0x4d7   : > { %22062 = vmatprep.mubr.f32.mxu1 %v24205_v48  ;;  %22068 = vmatpush3.msra.mxu0 %v22643_v10 }
 0x4d8   : > { %22069 = vmatprep.mubr.f32.mxu0 %v24217_v54  ;;  %22063 = vmatmul.mubr.f32.vlgmr.msra.gmra.mxu1 %v24210_v35  ;;  %v16917_v54 = vand.u32 4294901760, %v16916_v34 }
 0x4d9   : > { %22070 = vmatmul.mubr.f32.vlgmr.msra.gmra.mxu0 %v24222_v55  ;;  %22072 = vmatprep.subr.mxu1 %v22630_v3  ;;  %v24322_v55 = vand.u32 4294901760, %v17339_v29 }
 0x4da   : > { %22079 = vmatprep.subr.mxu0 %v22655_v15  ;;  %22073 = vmatpush3.msra.mxu1 %v22630_v3 }
 0x4db   : > { %22080 = vmatpush3.msra.mxu0 %v22655_v15  ;;  %22074 = vmatprep.subr.mxu1 %v22632_v4 }
 0x4dc   : > { %22081 = vmatprep.subr.mxu0 %v22659_v17  ;;  %22075 = vmatpush3.msra.mxu1 %v22632_v4 }
 0x4dd   : > { %22076 = vmatprep.mubr.f32.mxu1 %v16397_v37  ;;  %22082 = vmatpush3.msra.mxu0 %v22659_v17  ;;  %v24326_v37 = vand.u32 4294901760, %v17342_v40 }
 0x4de   : > { %22083 = vmatprep.mubr.f32.mxu0 %v24205_v48  ;;  %22077 = vmatmul.mubr.f32.vlgmr.msra.gmra.mxu1 %v16407_v57  ;;  %v17412_v57 = vsub.f32 %v17339_v29, %v24322_v55 }
 0x4df   : > { %22084 = vmatmul.mubr.f32.vlgmr.msra.gmra.mxu0 %v24210_v35  ;;  %22086 = vmatprep.subr.mxu1 %v22630_v3 }
 0x4e0   : > { %22093 = vmatprep.subr.mxu0 %v22630_v3  ;;  %22087 = vmatpush3.msra.mxu1 %v22630_v3 }
 0x4e1   : > { %22094 = vmatpush3.msra.mxu0 %v22630_v3  ;;  %22088 = vmatprep.subr.mxu1 %v22632_v4 }
 0x4e2   : > { %22095 = vmatprep.subr.mxu0 %v22632_v4  ;;  %22089 = vmatpush3.msra.mxu1 %v22632_v4 }
 0x4e3   : > { %22090 = vmatprep.mubr.f32.mxu1 %v24205_v48  ;;  %22096 = vmatpush3.msra.mxu0 %v22632_v4  ;;  %v17422_v48 = vsub.f32 %v17342_v40, %v24326_v37 }
 0x4e4   : > { %22097 = vmatprep.mubr.f32.mxu0 %v16907_v42  ;;  %22091 = vmatmul.mubr.f32.vlgmr.msra.gmra.mxu1 %v24210_v35  ;;  %v17413_v35 = vand.u32 4294901760, %v17412_v57 }
 0x4e5   : > { %22098 = vmatmul.mubr.f32.vlgmr.msra.gmra.mxu0 %v16917_v54  ;;  %22100 = vmatprep.subr.mxu1 %v22669_v25  ;;  %v17423_v58 = vand.u32 4294901760, %v17422_v48 }
 0x4e6   : > { %22107 = vmatprep.subr.mxu0 %v22640_v9  ;;  %22101 = vmatpush3.msra.mxu1 %v22669_v25  ;;  %v17414_v60 = vsub.f32 %v17412_v57, %v17413_v35 }
 0x4e7   : > { %22108 = vmatpush3.msra.mxu0 %v22640_v9  ;;  %22102 = vmatprep.subr.mxu1 %v22671_v27  ;;  %v17424_v62 = vsub.f32 %v17422_v48, %v17423_v58 }
 0x4e8   : > { %22109 = vmatprep.subr.mxu0 %v22643_v10  ;;  %22103 = vmatpush3.msra.mxu1 %v22671_v27  ;;  %v17415_v39 = vand.u32 4294901760, %v17414_v60 }
 0x4e9   : > { %22104 = vmatprep.mubr.f32.mxu1 %v24264_v8  ;;  %22110 = vmatpush3.msra.mxu0 %v22643_v10  ;;  %v17425_v44 = vand.u32 4294901760, %v17424_v62 }
 0x4ea   : > { %22111 = vmatprep.mubr.f32.mxu0 %v24275_v21  ;;  %22105 = vmatmul.mubr.f32.vlgmr.msra.gmra.mxu1 %v24268_v16  ;;  %v24401_v21 = vmul.f32 %v23209_v2, %v23209_v2 }
 0x4eb   : > { %22112 = vmatmul.mubr.f32.vlgmr.msra.gmra.mxu0 %v24280_v61  ;;  %22114 = vmatprep.subr.mxu1 %v22630_v3 }
 0x4ec   : > { %22121 = vmatprep.subr.mxu0 %v22655_v15  ;;  %22115 = vmatpush3.msra.mxu1 %v22630_v3 }
 0x4ed   : > { %22122 = vmatpush3.msra.mxu0 %v22655_v15  ;;  %22116 = vmatprep.subr.mxu1 %v22632_v4 }
 0x4ee   : > { %22123 = vmatprep.subr.mxu0 %v22659_v17  ;;  %22117 = vmatpush3.msra.mxu1 %v22632_v4 }
 0x4ef   : > { %22118 = vmatprep.mubr.f32.mxu1 %v16905_v63  ;;  %22124 = vmatpush3.msra.mxu0 %v22659_v17 }
 0x4f0   : > { %22125 = vmatprep.mubr.f32.mxu0 %v24264_v8  ;;  %22119 = vmatmul.mubr.f32.vlgmr.msra.gmra.mxu1 %v16915_v18 }
 0x4f1   : > { %22126 = vmatmul.mubr.f32.vlgmr.msra.gmra.mxu0 %v24268_v16  ;;  %22128 = vmatprep.subr.mxu1 %v22630_v3 }
 0x4f2   : > { %22135 = vmatprep.subr.mxu0 %v22630_v3  ;;  %22129 = vmatpush3.msra.mxu1 %v22630_v3 }
 0x4f3   : > { %22136 = vmatpush3.msra.mxu0 %v22630_v3  ;;  %22130 = vmatprep.subr.mxu1 %v22632_v4 }
 0x4f4   : > { %22137 = vmatprep.subr.mxu0 %v22632_v4  ;;  %22131 = vmatpush3.msra.mxu1 %v22632_v4 }
 0x4f5   : > { %22132 = vmatprep.mubr.f32.mxu1 %v24264_v8  ;;  %22138 = vmatpush3.msra.mxu0 %v22632_v4 }
 0x4f6   : > { %22139 = vmatprep.mubr.f32.mxu0 %v17415_v39  ;;  %22133 = vmatmul.mubr.f32.vlgmr.msra.gmra.mxu1 %v24268_v16 }
 0x4f7   : > { %22140 = vmatmul.mubr.f32.vlgmr.msra.gmra.mxu0 %v17425_v44  ;;  %22142 = vmatprep.subr.mxu1 %v22669_v25 }
 0x4f8   : > { %22149 = vmatprep.subr.mxu0 %v22640_v9  ;;  %22143 = vmatpush3.msra.mxu1 %v22669_v25 }
 0x4f9   : > { %22150 = vmatpush3.msra.mxu0 %v22640_v9  ;;  %22144 = vmatprep.subr.mxu1 %v22671_v27 }
 0x4fa   : > { %22151 = vmatprep.subr.mxu0 %v22643_v10  ;;  %22145 = vmatpush3.msra.mxu1 %v22671_v27 }
 0x4fb   : > { %22146 = vmatprep.mubr.f32.mxu1 %v24322_v55  ;;  %22152 = vmatpush3.msra.mxu0 %v22643_v10 }
 0x4fc   : > { %22153 = vmatprep.mubr.f32.mxu0 %v17412_v57  ;;  %22147 = vmatmul.mubr.f32.vlgmr.msra.gmra.mxu1 %v24326_v37 }
 0x4fd   : > { %22154 = vmatmul.mubr.f32.vlgmr.msra.gmra.mxu0 %v17422_v48  ;;  %22156 = vmatprep.subr.mxu1 %v22630_v3 }
 0x4fe   : > { %22163 = vmatprep.subr.mxu0 %v22655_v15  ;;  %22157 = vmatpush3.msra.mxu1 %v22630_v3 }
 0x4ff   : > { %22164 = vmatpush3.msra.mxu0 %v22655_v15  ;;  %22158 = vmatprep.subr.mxu1 %v22632_v4 }
 0x500   : > { %22165 = vmatprep.subr.mxu0 %v22659_v17  ;;  %22159 = vmatpush3.msra.mxu1 %v22632_v4 }
 0x501   : > { %22160 = vmatprep.mubr.f32.mxu1 %v17413_v35  ;;  %22166 = vmatpush3.msra.mxu0 %v22659_v17  ;;  %v24409_v35 = vmul.f32 %v23211_v31, %v23211_v31 }
 0x502   : > { %22167 = vmatprep.mubr.f32.mxu0 %v24322_v55  ;;  %22161 = vmatmul.mubr.f32.vlgmr.msra.gmra.mxu1 %v17423_v58 }
 0x503   : > { %22168 = vmatmul.mubr.f32.vlgmr.msra.gmra.mxu0 %v24326_v37  ;;  %22170 = vmatprep.subr.mxu1 %v22630_v3 }
 0x504   : > { %22171 = vmatpush3.msra.mxu1 %v22630_v3  ;;  %22174 = vmatprep.mubr.f32.mxu1 %v24322_v55 }
 0x505   : > { %22172 = vmatprep.subr.mxu1 %v22632_v4  ;;  %22177 = vmatprep.subr.mxu0 %v22497_v6 }
 0x506   : > { %22173 = vmatpush3.msra.mxu1 %v22632_v4  ;;  %22181 = vmatprep.mubr.msk.f32.mxu0 %vm22498_vm1, %v22497_v6 }
 0x507   : > { %22175 = vmatmul.mubr.f32.vlgmr.msra.gmra.mxu1 %v24326_v37  ;;  %22184 = vmatprep.subr.mxu1 %v22497_v6 }
 0x508   : > { %22188 = vmatprep.mubr.msk.f32.mxu1 %vm22498_vm1, %v22497_v6 }
 0x539   : > { %v14035_v9 = vpop.f32.mrf.mxu0 }
 0x53b   : > { %v21847_v3 = vpop.f32.mrf.mxu0 }
 0x53d   : > { %v14192_v10 = vpop.f32.mrf.mxu0 }
 0x53f   : > { %v21861_v15 = vpop.f32.mrf.mxu0 }
 0x541   : > { %v14116_v17 = vpop.f32.mrf.mxu1 }
 0x542   : > { %v14117_v25 = vadd.f32 %v14116_v17, %v14035_v9 }
 0x543   : > { %v21854_v27 = vpop.f32.mrf.mxu1  ;;  %v14344_v0 = vpop.f32.mrf.mxu0 }
 0x544   : > { %v14193_v53 = vadd.f32 %v14192_v10, %v14117_v25 }
 0x545   : > { %v21875_v4 = vpop.f32.mrf.mxu0 }
 0x546   : > { %v14267_v41 = vpop.f32.mrf.mxu1 }
 0x547   : > { %v14268_v7 = vadd.f32 %v14267_v41, %v14193_v53 }
 0x548   : > { %v21868_v13 = vpop.f32.mrf.mxu1 }
 0x549   : > { %v14345_v8 = vadd.f32 %v14344_v0, %v14268_v7 }
 0x54a   : > { %v14417_v16 = vpop.f32.mrf.mxu1 }
 0x54b   : > { %v24403_v61 = vadd.f32 %v14417_v16, %v14345_v8  ;;  %v14494_v63 = vpop.f32.mrf.mxu0  ;;  %v24417_v16 = vmul.f32 %v23213_v51, %v23213_v51 }
 0x54c   : > { %v21882_v18 = vpop.f32.mrf.mxu1 }
 0x54d   : > { %v15802_v12 = vsub.f32 %v24403_v61, %v24401_v21  ;;  %v21889_v19 = vpop.f32.mrf.mxu0  ;;  %v19683_v21 = vmul.f32 %v23613_v1, %v23613_v1 }
 0x54f   : > { %v14651_v28 = vpop.f32.mrf.mxu0 }
 0x551   : > { %v21903_v32 = vpop.f32.mrf.mxu0 }
 0x553   : > { %v14575_v33 = vpop.f32.mrf.mxu1 }
 0x554   : > { %v14576_v34 = vadd.f32 %v14575_v33, %v14494_v63 }
 0x555   : > { %v21896_v29 = vpop.f32.mrf.mxu1  ;;  %v14803_v42 = vpop.f32.mrf.mxu0 }
 0x556   : > { %v14652_v40 = vadd.f32 %v14651_v28, %v14576_v34 }
 0x557   : > { %v21917_v54 = vpop.f32.mrf.mxu0 }
 0x558   : > { %v14726_v55 = vpop.f32.mrf.mxu1 }
 0x559   : > { %v14727_v37 = vadd.f32 %v14726_v55, %v14652_v40 }
 0x55a   : > { %v21910_v2 = vpop.f32.mrf.mxu1 }
 0x55b   : > { %v14804_v57 = vadd.f32 %v14803_v42, %v14727_v37 }
 0x55c   : > { %v14876_v48 = vpop.f32.mrf.mxu1 }
 0x55d   : > { %v24411_v58 = vadd.f32 %v14876_v48, %v14804_v57  ;;  %v14953_v60 = vpop.f32.mrf.mxu0  ;;  %v24425_v48 = vmul.f32 %v23215_v5, %v23215_v5 }
 0x55e   : > { %v21924_v62 = vpop.f32.mrf.mxu1 }
 0x55f   : > { %v15803_v39 = vsub.f32 %v24411_v58, %v24409_v35  ;;  %v21931_v44 = vpop.f32.mrf.mxu0 }
 0x561   : > { %v15110_v9 = vpop.f32.mrf.mxu0 }
 0x563   : > { %v21945_v3 = vpop.f32.mrf.mxu0 }
 0x565   : > { %v15034_v10 = vpop.f32.mrf.mxu1 }
 0x566   : > { %v15035_v15 = vadd.f32 %v15034_v10, %v14953_v60 }
 0x567   : > { %v21938_v17 = vpop.f32.mrf.mxu1  ;;  %v15262_v25 = vpop.f32.mrf.mxu0 }
 0x568   : > { %v15111_v27 = vadd.f32 %v15110_v9, %v15035_v15 }
 0x569   : > { %v21959_v0 = vpop.f32.mrf.mxu0 }
 0x56a   : > { %v15185_v53 = vpop.f32.mrf.mxu1 }
 0x56b   : > { %v15186_v4 = vadd.f32 %v15185_v53, %v15111_v27 }
 0x56c   : > { %v21952_v31 = vpop.f32.mrf.mxu1 }
 0x56d   : > { %v15263_v41 = vadd.f32 %v15262_v25, %v15186_v4 }
 0x56e   : > { %v15412_v7 = vpop.f32.mrf.mxu0 }
 0x570   : > { %v15335_v13 = vpop.f32.mrf.mxu1  ;;  %v21973_v8 = vpop.f32.mrf.mxu0 }
 0x571   : > { %v24419_v63 = vadd.f32 %v15335_v13, %v15263_v41 }
 0x572   : > { %v21966_v18 = vpop.f32.mrf.mxu1 }
 0x573   : > { %v15804_v19 = vsub.f32 %v24419_v63, %v24417_v16  ;;  %v15569_v28 = vpop.f32.mrf.mxu0 }
 0x575   : > { %v21987_v32 = vpop.f32.mrf.mxu0 }
 0x577   : > { %v15493_v33 = vpop.f32.mrf.mxu1 }
 0x578   : > { %v15494_v34 = vadd.f32 %v15493_v33, %v15412_v7 }
 0x579   : > { %v21980_v29 = vpop.f32.mrf.mxu1 }
 0x57a   : > { %v15570_v42 = vadd.f32 %v15569_v28, %v15494_v34  ;;  %v15721_v40 = vpop.f32.mrf.mxu0 }
 0x57b   : > { %v15644_v54 = vpop.f32.mrf.mxu1 }
 0x57c   : > { %v15645_v55 = vadd.f32 %v15644_v54, %v15570_v42  ;;  %v22001_v37 = vpop.f32.mrf.mxu0 }
 0x57d   : > { %v21994_v2 = vpop.f32.mrf.mxu1 }
 0x57e   : > { %v15722_v57 = vadd.f32 %v15721_v40, %v15645_v55 }
 0x580   : > { %v15794_v51 = vpop.f32.mrf.mxu1 }
 0x581   : > { %v24427_v60 = vadd.f32 %v15794_v51, %v15722_v57  ;;  %v22015_v62 = vpop.f32.mrf.mxu0 }
 0x582   : > { %v22008_v44 = vpop.f32.mrf.mxu1 }
 0x583   : > { %v15805_v9 = vsub.f32 %v24427_v60, %v24425_v48  ;;  %v15893_v3 = vpop.f32.mrf.mxu0  ;;  %v11916_v48 = vmul.f32 2.0, %v11912_v52 }
 0x586   : > { %v22022_v10 = vpop.f32.mrf.mxu1 }
 0x587   : > { %v15991_v15 = vadd.f32 %v22022_v10, %v22015_v62  ;;  %v22029_v17 = vpop.f32.mrf.mxu0 }
 0x588   : > { %v15984_v25 = vpop.f32.mrf.mxu1 }
 0x589   : > { %v16074_v27 = vadd.f32 %v22029_v17, %v15991_v15  ;;  %v15985_v0 = vadd.f32 %v15984_v25, %v15893_v3  ;;  %v16066_v53 = vpop.f32.mrf.mxu0 }
 0x58b   : > { %v16067_v4 = vadd.f32 %v16066_v53, %v15985_v0 }
 0x58c   : > { %v22036_v31 = vpop.f32.mrf.mxu1 }
 0x58d   : > { %v16157_v41 = vadd.f32 %v22036_v31, %v16074_v27  ;;  %v22043_v5 = vpop.f32.mrf.mxu0 }
 0x58e   : > { %v16148_v7 = vpop.f32.mrf.mxu1 }
 0x58f   : > { %v16240_v13 = vadd.f32 %v22043_v5, %v16157_v41  ;;  %v16149_v8 = vadd.f32 %v16148_v7, %v16067_v4  ;;  %v16233_v18 = vpop.f32.mrf.mxu0 }
 0x591   : > { %v16234_v28 = vadd.f32 %v16233_v18, %v16149_v8 }
 0x592   : > { %v22050_v32 = vpop.f32.mrf.mxu1 }
 0x593   : > { %v16319_v33 = vadd.f32 %v22050_v32, %v16240_v13  ;;  %v22057_v34 = vpop.f32.mrf.mxu0 }
 0x594   : > { %v16312_v29 = vpop.f32.mrf.mxu1 }
 0x595   : > { %v24431_v42 = vand.u32 4294901760, %v16319_v33  ;;  %v16313_v40 = vadd.f32 %v16312_v29, %v16234_v28  ;;  %v16401_v54 = vpop.f32.mrf.mxu0 }
 0x597   : > { %v17953_v55 = vsub.f32 %v16319_v33, %v24431_v42  ;;  %v24434_v37 = vand.u32 4294901760, %v16313_v40  ;;  %22178 = vmatpush3.msra.mxu0 %v24431_v42 }
 0x598   : > { %v22064_v2 = vpop.f32.mrf.mxu1  ;;  %22179 = vmatprep.subr.mxu0 %v22497_v6 }
 0x599   : > { %v17954_v57 = vand.u32 4294901760, %v17953_v55  ;;  %v17960_v51 = vsub.f32 %v16313_v40, %v24434_v37  ;;  %v16499_v62 = vadd.f32 %v22064_v2, %v22057_v34  ;;  %v22071_v44 = vpop.f32.mrf.mxu0  ;;  %22180 = vmatpush3.msra.mxu0 %v24434_v37 }
 0x59a   : > { %v16492_v3 = vpop.f32.mrf.mxu1  ;;  %22191 = vmatprep.subr.mxu0 %v22497_v6  ;;  %22182 = vmatmul.mubr.f32.vlgmr.msra.gmra.mxu0 %v22855_v43 }
 0x59b   : > { %v17955_v10 = vsub.f32 %v17953_v55, %v17954_v57  ;;  %v17961_v15 = vand.u32 4294901760, %v17960_v51  ;;  %v16582_v17 = vadd.f32 %v22071_v44, %v16499_v62  ;;  %v16493_v25 = vadd.f32 %v16492_v3, %v16401_v54  ;;  %v16574_v27 = vpop.f32.mrf.mxu0  ;;  %22192 = vmatpush3.msra.mxu0 %v17953_v55  ;;  %22195 = vmatprep.mubr.msk.f32.mxu0 %vm22498_vm1, %v22497_v6 }
 0x59c   : > { %22193 = vmatprep.subr.mxu0 %v22497_v6 }
 0x59d   : > { %v17962_v0 = vsub.f32 %v17960_v51, %v17961_v15  ;;  %v16575_v53 = vadd.f32 %v16574_v27, %v16493_v25  ;;  %22194 = vmatpush3.msra.mxu0 %v17960_v51  ;;  %v17956_v4 = vand.u32 4294901760, %v17955_v10 }
 0x59e   : > { %v22078_v31 = vpop.f32.mrf.mxu1  ;;  %22205 = vmatprep.subr.mxu0 %v22497_v6  ;;  %22196 = vmatmul.mubr.f32.vlgmr.msra.gmra.mxu0 %v22846_v22 }
 0x59f   : > { %v16665_v41 = vadd.f32 %v22078_v31, %v16582_v17  ;;  %v22085_v5 = vpop.f32.mrf.mxu0  ;;  %22185 = vmatpush3.msra.mxu1 %v17956_v4  ;;  %22206 = vmatpush3.msra.mxu0 %v17954_v57  ;;  %v17963_v7 = vand.u32 4294901760, %v17962_v0 }
 0x5a0   : > { %v16656_v13 = vpop.f32.mrf.mxu1  ;;  %22186 = vmatprep.subr.mxu1 %v22497_v6  ;;  %22207 = vmatprep.subr.mxu0 %v22497_v6 }
 0x5a1   : > { %v16748_v8 = vadd.f32 %v22085_v5, %v16665_v41  ;;  %v16657_v18 = vadd.f32 %v16656_v13, %v16575_v53  ;;  %v16741_v28 = vpop.f32.mrf.mxu0  ;;  %22187 = vmatpush3.msra.mxu1 %v17963_v7  ;;  %22208 = vmatpush3.msra.mxu0 %v17961_v15 }
 0x5a2   : > { %22189 = vmatmul.mubr.f32.vlgmr.msra.gmra.mxu1 %v22843_v14  ;;  %22198 = vmatprep.subr.mxu1 %v22497_v6 }
 0x5a3   : > { %v16742_v32 = vadd.f32 %v16741_v28, %v16657_v18  ;;  %22209 = vmatprep.mubr.msk.f32.mxu0 %vm22498_vm1, %v22497_v6  ;;  %22219 = vmatprep.subr.mxu0 %v22497_v6 }
 0x5a4   : > { %v22092_v33 = vpop.f32.mrf.mxu1  ;;  %22199 = vmatpush3.msra.mxu1 %v24431_v42  ;;  %22210 = vmatmul.mubr.f32.vlgmr.msra.gmra.mxu0 %v22843_v14 }
 0x5a5   : > { %v16827_v34 = vadd.f32 %v22092_v33, %v16748_v8  ;;  %v22099_v29 = vpop.f32.mrf.mxu0  ;;  %22200 = vmatprep.subr.mxu1 %v22497_v6  ;;  %22202 = vmatprep.mubr.msk.f32.mxu1 %vm22498_vm1, %v22497_v6 }
 0x5a6   : > { %v16820_v40 = vpop.f32.mrf.mxu1  ;;  %22201 = vmatpush3.msra.mxu1 %v24434_v37  ;;  %22223 = vmatprep.mubr.msk.f32.mxu0 %vm22498_vm1, %v22497_v6 }
 0x5a7   : > { %v24462_v54 = vand.u32 4294901760, %v16827_v34  ;;  %v16821_v55 = vadd.f32 %v16820_v40, %v16742_v32  ;;  %v16909_v2 = vpop.f32.mrf.mxu0  ;;  %22203 = vmatmul.mubr.f32.vlgmr.msra.gmra.mxu1 %v22849_v30  ;;  %22212 = vmatprep.subr.mxu1 %v22497_v6 }
 0x5a8   : > { %22213 = vmatpush3.msra.mxu1 %v24431_v42  ;;  %22216 = vmatprep.mubr.msk.f32.mxu1 %vm22498_vm1, %v22497_v6 }
 0x5a9   : > { %v18412_v57 = vsub.f32 %v16827_v34, %v24462_v54  ;;  %v24470_v51 = vand.u32 4294901760, %v16821_v55  ;;  %22220 = vmatpush3.msra.mxu0 %v24462_v54  ;;  %22214 = vmatprep.subr.mxu1 %v22497_v6 }
 0x5aa   : > { %v22106_v62 = vpop.f32.mrf.mxu1  ;;  %22221 = vmatprep.subr.mxu0 %v22497_v6  ;;  %22215 = vmatpush3.msra.mxu1 %v24434_v37 }
 0x5ab   : > { %v18413_v44 = vand.u32 4294901760, %v18412_v57  ;;  %v18419_v3 = vsub.f32 %v16821_v55, %v24470_v51  ;;  %v17007_v42 = vadd.f32 %v22106_v62, %v22099_v29  ;;  %v22113_v10 = vpop.f32.mrf.mxu0  ;;  %22222 = vmatpush3.msra.mxu0 %v24470_v51  ;;  %22217 = vmatmul.mubr.f32.vlgmr.msra.gmra.mxu1 %v22843_v14 }
 0x5ac   : > { %v17000_v15 = vpop.f32.mrf.mxu1  ;;  %22233 = vmatprep.subr.mxu0 %v22497_v6  ;;  %22224 = vmatmul.mubr.f32.vlgmr.msra.gmra.mxu0 %v22855_v43 }
 0x5ad   : > { %v18414_v17 = vsub.f32 %v18412_v57, %v18413_v44  ;;  %v18420_v25 = vand.u32 4294901760, %v18419_v3  ;;  %v17090_v27 = vadd.f32 %v22113_v10, %v17007_v42  ;;  %v17001_v0 = vadd.f32 %v17000_v15, %v16909_v2  ;;  %v17082_v53 = vpop.f32.mrf.mxu0  ;;  %22234 = vmatpush3.msra.mxu0 %v18412_v57  ;;  %22226 = vmatprep.subr.mxu1 %v22497_v6 }
 0x5ae   : > { %22235 = vmatprep.subr.mxu0 %v22497_v6  ;;  %22237 = vmatprep.mubr.msk.f32.mxu0 %vm22498_vm1, %v22497_v6 }
 0x5af   : > { %v18421_v37 = vsub.f32 %v18419_v3, %v18420_v25  ;;  %v17083_v4 = vadd.f32 %v17082_v53, %v17001_v0  ;;  %22236 = vmatpush3.msra.mxu0 %v18419_v3  ;;  %v18415_v31 = vand.u32 4294901760, %v18414_v17  ;;  %22230 = vmatprep.mubr.msk.f32.mxu1 %vm22498_vm1, %v22497_v6 }
 0x5b0   : > { %v22120_v41 = vpop.f32.mrf.mxu1  ;;  %22247 = vmatprep.subr.mxu0 %v22497_v6  ;;  %22238 = vmatmul.mubr.f32.vlgmr.msra.gmra.mxu0 %v22846_v22 }
 0x5b1   : > { %v17173_v5 = vadd.f32 %v22120_v41, %v17090_v27  ;;  %v22127_v7 = vpop.f32.mrf.mxu0  ;;  %22227 = vmatpush3.msra.mxu1 %v18415_v31  ;;  %22248 = vmatpush3.msra.mxu0 %v18413_v44  ;;  %v18422_v13 = vand.u32 4294901760, %v18421_v37 }
 0x5b2   : > { %v17164_v8 = vpop.f32.mrf.mxu1  ;;  %22228 = vmatprep.subr.mxu1 %v22497_v6  ;;  %22249 = vmatprep.subr.mxu0 %v22497_v6 }
 0x5b3   : > { %v17256_v18 = vadd.f32 %v22127_v7, %v17173_v5  ;;  %v17165_v28 = vadd.f32 %v17164_v8, %v17083_v4  ;;  %v17249_v32 = vpop.f32.mrf.mxu0  ;;  %22229 = vmatpush3.msra.mxu1 %v18422_v13  ;;  %22250 = vmatpush3.msra.mxu0 %v18420_v25 }
 0x5b4   : > { %22231 = vmatmul.mubr.f32.vlgmr.msra.gmra.mxu1 %v22843_v14  ;;  %22240 = vmatprep.subr.mxu1 %v22497_v6 }
 0x5b5   : > { %v17250_v33 = vadd.f32 %v17249_v32, %v17165_v28  ;;  %22251 = vmatprep.mubr.msk.f32.mxu0 %vm22498_vm1, %v22497_v6  ;;  %22261 = vmatprep.subr.mxu0 %v22497_v6 }
 0x5b6   : > { %v22134_v34 = vpop.f32.mrf.mxu1  ;;  %22241 = vmatpush3.msra.mxu1 %v24462_v54  ;;  %22252 = vmatmul.mubr.f32.vlgmr.msra.gmra.mxu0 %v22843_v14 }
 0x5b7   : > { %v17335_v29 = vadd.f32 %v22134_v34, %v17256_v18  ;;  %v22141_v40 = vpop.f32.mrf.mxu0  ;;  %22242 = vmatprep.subr.mxu1 %v22497_v6  ;;  %22244 = vmatprep.mubr.msk.f32.mxu1 %vm22498_vm1, %v22497_v6 }
 0x5b8   : > { %v17328_v55 = vpop.f32.mrf.mxu1  ;;  %22243 = vmatpush3.msra.mxu1 %v24470_v51  ;;  %22265 = vmatprep.mubr.msk.f32.mxu0 %vm22498_vm1, %v22497_v6 }
 0x5b9   : > { %v24504_v2 = vand.u32 4294901760, %v17335_v29  ;;  %v17329_v57 = vadd.f32 %v17328_v55, %v17250_v33  ;;  %v17417_v62 = vpop.f32.mrf.mxu0  ;;  %22245 = vmatmul.mubr.f32.vlgmr.msra.gmra.mxu1 %v22849_v30  ;;  %22254 = vmatprep.subr.mxu1 %v22497_v6 }
 0x5ba   : > { %22255 = vmatpush3.msra.mxu1 %v24462_v54  ;;  %22258 = vmatprep.mubr.msk.f32.mxu1 %vm22498_vm1, %v22497_v6 }
 0x5bb   : > { %v18871_v44 = vsub.f32 %v17335_v29, %v24504_v2  ;;  %v24512_v3 = vand.u32 4294901760, %v17329_v57  ;;  %22262 = vmatpush3.msra.mxu0 %v24504_v2  ;;  %22256 = vmatprep.subr.mxu1 %v22497_v6 }
 0x5bc   : > { %v22148_v42 = vpop.f32.mrf.mxu1  ;;  %22263 = vmatprep.subr.mxu0 %v22497_v6  ;;  %22257 = vmatpush3.msra.mxu1 %v24470_v51 }
 0x5bd   : > { %v18872_v10 = vand.u32 4294901760, %v18871_v44  ;;  %v18878_v15 = vsub.f32 %v17329_v57, %v24512_v3  ;;  %v17515_v54 = vadd.f32 %v22148_v42, %v22141_v40  ;;  %v22155_v17 = vpop.f32.mrf.mxu0  ;;  %22264 = vmatpush3.msra.mxu0 %v24512_v3  ;;  %22259 = vmatmul.mubr.f32.vlgmr.msra.gmra.mxu1 %v22843_v14 }
 0x5be   : > { %v17508_v25 = vpop.f32.mrf.mxu1  ;;  %22275 = vmatprep.subr.mxu0 %v22497_v6  ;;  %22266 = vmatmul.mubr.f32.vlgmr.msra.gmra.mxu0 %v22855_v43 }
 0x5bf   : > { %v18873_v27 = vsub.f32 %v18871_v44, %v18872_v10  ;;  %v18879_v0 = vand.u32 4294901760, %v18878_v15  ;;  %v17598_v53 = vadd.f32 %v22155_v17, %v17515_v54  ;;  %v17509_v37 = vadd.f32 %v17508_v25, %v17417_v62  ;;  %v17590_v4 = vpop.f32.mrf.mxu0  ;;  %22276 = vmatpush3.msra.mxu0 %v18871_v44  ;;  %22268 = vmatprep.subr.mxu1 %v22497_v6 }
 0x5c0   : > { %22277 = vmatprep.subr.mxu0 %v22497_v6  ;;  %22279 = vmatprep.mubr.msk.f32.mxu0 %vm22498_vm1, %v22497_v6 }
 0x5c1   : > { %v18880_v51 = vsub.f32 %v18878_v15, %v18879_v0  ;;  %v17591_v31 = vadd.f32 %v17590_v4, %v17509_v37  ;;  %22278 = vmatpush3.msra.mxu0 %v18878_v15  ;;  %v18874_v41 = vand.u32 4294901760, %v18873_v27  ;;  %22272 = vmatprep.mubr.msk.f32.mxu1 %vm22498_vm1, %v22497_v6 }
 0x5c2   : > { %v22162_v5 = vpop.f32.mrf.mxu1  ;;  %22289 = vmatprep.subr.mxu0 %v22497_v6  ;;  %22280 = vmatmul.mubr.f32.vlgmr.msra.gmra.mxu0 %v22846_v22 }
 0x5c3   : > { %v17681_v7 = vadd.f32 %v22162_v5, %v17598_v53  ;;  %v22169_v13 = vpop.f32.mrf.mxu0  ;;  %22269 = vmatpush3.msra.mxu1 %v18874_v41  ;;  %22290 = vmatpush3.msra.mxu0 %v18872_v10  ;;  %v18881_v8 = vand.u32 4294901760, %v18880_v51 }
 0x5c4   : > { %v17672_v18 = vpop.f32.mrf.mxu1  ;;  %22270 = vmatprep.subr.mxu1 %v22497_v6  ;;  %22291 = vmatprep.subr.mxu0 %v22497_v6 }
 0x5c5   : > { %v17764_v28 = vadd.f32 %v22169_v13, %v17681_v7  ;;  %v17673_v32 = vadd.f32 %v17672_v18, %v17591_v31  ;;  %22271 = vmatpush3.msra.mxu1 %v18881_v8  ;;  %22292 = vmatpush3.msra.mxu0 %v18879_v0  ;;  %v17757_v33 = vpop.f32.mrf.mxu0 }
 0x5c6   : > { %22273 = vmatmul.mubr.f32.vlgmr.msra.gmra.mxu1 %v22843_v14  ;;  %22282 = vmatprep.subr.mxu1 %v22497_v6 }
 0x5c7   : > { %v17758_v34 = vadd.f32 %v17757_v33, %v17673_v32  ;;  %v22176_v29 = vpop.f32.mrf.mxu1  ;;  %22293 = vmatprep.mubr.msk.f32.mxu0 %vm22498_vm1, %v22497_v6  ;;  %22303 = vmatprep.subr.mxu0 %v22497_v6 }
 0x5c8   : > { %v17843_v40 = vadd.f32 %v22176_v29, %v17764_v28  ;;  %22283 = vmatpush3.msra.mxu1 %v24504_v2  ;;  %22294 = vmatmul.mubr.f32.vlgmr.msra.gmra.mxu0 %v22843_v14 }
 0x5c9   : > { %v17836_v55 = vpop.f32.mrf.mxu1  ;;  %22284 = vmatprep.subr.mxu1 %v22497_v6  ;;  %22286 = vmatprep.mubr.msk.f32.mxu1 %vm22498_vm1, %v22497_v6 }
 0x5ca   : > { %v19252_v57 = vand.u32 4294901760, %v17843_v40  ;;  %v17837_v62 = vadd.f32 %v17836_v55, %v17758_v34  ;;  %22285 = vmatpush3.msra.mxu1 %v24512_v3  ;;  %22307 = vmatprep.mubr.msk.f32.mxu0 %vm22498_vm1, %v22497_v6 }
 0x5cb   : > { %22287 = vmatmul.mubr.f32.vlgmr.msra.gmra.mxu1 %v22849_v30  ;;  %22296 = vmatprep.subr.mxu1 %v22497_v6 }
 0x5cc   : > { %v19330_v44 = vsub.f32 %v17843_v40, %v19252_v57  ;;  %v19255_v42 = vand.u32 4294901760, %v17837_v62  ;;  %22304 = vmatpush3.msra.mxu0 %v19252_v57  ;;  %22297 = vmatpush3.msra.mxu1 %v24504_v2  ;;  %v24586_v40 = vstv %s285_s20 }
 0x5cd   : > { %22305 = vmatprep.subr.mxu0 %v22497_v6  ;;  %22298 = vmatprep.subr.mxu1 %v22497_v6  ;;  %v11921_v38 = vadd.f32 %v24586_v40, %v11916_v48 }
 0x5ce   : > { %v19331_v10 = vand.u32 4294901760, %v19330_v44  ;;  %v19337_v15 = vsub.f32 %v17837_v62, %v19255_v42  ;;  %22306 = vmatpush3.msra.mxu0 %v19255_v42  ;;  %22299 = vmatpush3.msra.mxu1 %v24512_v3 }
 0x5cf   : > { %22317 = vmatprep.subr.mxu0 %v22497_v6  ;;  %22308 = vmatmul.mubr.f32.vlgmr.msra.gmra.mxu0 %v22855_v43 }
 0x5d0   : > { %v19332_v54 = vsub.f32 %v19330_v44, %v19331_v10  ;;  %v19338_v17 = vand.u32 4294901760, %v19337_v15  ;;  %22318 = vmatpush3.msra.mxu0 %v19330_v44  ;;  %22300 = vmatprep.mubr.msk.f32.mxu1 %vm22498_vm1, %v22497_v6 }
 0x5d1   : > { %22319 = vmatprep.subr.mxu0 %v22497_v6  ;;  %22301 = vmatmul.mubr.f32.vlgmr.msra.gmra.mxu1 %v22843_v14 }
 0x5d2   : > { %v19339_v2 = vsub.f32 %v19337_v15, %v19338_v17  ;;  %22320 = vmatpush3.msra.mxu0 %v19337_v15  ;;  %22310 = vmatprep.subr.mxu1 %v22497_v6  ;;  %v19333_v25 = vand.u32 4294901760, %v19332_v54 }
 0x5d3   : > { %22321 = vmatprep.mubr.msk.f32.mxu0 %vm22498_vm1, %v22497_v6  ;;  %22331 = vmatprep.subr.mxu0 %v22497_v6 }
 0x5d4   : > { %22311 = vmatpush3.msra.mxu1 %v19333_v25  ;;  %22322 = vmatmul.mubr.f32.vlgmr.msra.gmra.mxu0 %v22846_v22  ;;  %v19340_v43 = vand.u32 4294901760, %v19339_v2 }
 0x5d5   : > { %22332 = vmatpush3.msra.mxu0 %v19331_v10  ;;  %22312 = vmatprep.subr.mxu1 %v22497_v6 }
 0x5d6   : > { %22333 = vmatprep.subr.mxu0 %v22497_v6  ;;  %22313 = vmatpush3.msra.mxu1 %v19340_v43 }
 0x5d7   : > { %22314 = vmatprep.mubr.msk.f32.mxu1 %vm22498_vm1, %v22497_v6  ;;  %22334 = vmatpush3.msra.mxu0 %v19338_v17 }
 0x5d8   : > { %22315 = vmatmul.mubr.f32.vlgmr.msra.gmra.mxu1 %v22843_v14  ;;  %22324 = vmatprep.subr.mxu1 %v22497_v6 }
 0x5d9   : > { %22325 = vmatpush3.msra.mxu1 %v19252_v57  ;;  %22328 = vmatprep.mubr.msk.f32.mxu1 %vm22498_vm1, %v22497_v6 }
 0x5da   : > { %22326 = vmatprep.subr.mxu1 %v22497_v6  ;;  %22335 = vmatprep.mubr.msk.f32.mxu0 %vm22498_vm1, %v22497_v6 }
 0x5db   : > { %22327 = vmatpush3.msra.mxu1 %v19255_v42  ;;  %22336 = vmatmul.mubr.f32.vlgmr.msra.gmra.mxu0 %v22843_v14 }
 0x5dc   : > { %22329 = vmatmul.mubr.f32.vlgmr.msra.gmra.mxu1 %v22849_v30  ;;  %22338 = vmatprep.subr.mxu1 %v22497_v6 }
 0x5dd   : > { %22339 = vmatpush3.msra.mxu1 %v19252_v57  ;;  %22342 = vmatprep.mubr.msk.f32.mxu1 %vm22498_vm1, %v22497_v6 }
 0x5de   : > { %22340 = vmatprep.subr.mxu1 %v22497_v6  ;;  %v19682_v6 = vmul.f32 %v23607_v46, %v23607_v46 }
 0x5df   : > { %22341 = vmatpush3.msra.mxu1 %v19255_v42 }
 0x5e0   : > { %22343 = vmatmul.mubr.f32.vlgmr.msra.gmra.mxu1 %v22843_v14 }
 0x65a   : > { %v17919_v22 = vpop.f32.mrf.mxu0 }
 0x65c   : > { %v22183_v3 = vpop.f32.mrf.mxu0 }
 0x65e   : > { %v18076_v27 = vpop.f32.mrf.mxu0 }
 0x660   : > { %v22197_v0 = vpop.f32.mrf.mxu0 }
 0x662   : > { %v18000_v53 = vpop.f32.mrf.mxu1 }
 0x663   : > { %v18001_v37 = vadd.f32 %v18000_v53, %v17919_v22  ;;  %v11913_v53 = vmul.f32 2.0, %v11909_v26 }
 0x664   : > { %v22190_v4 = vpop.f32.mrf.mxu1  ;;  %v18228_v51 = vpop.f32.mrf.mxu0 }
 0x665   : > { %v18077_v30 = vadd.f32 %v18076_v27, %v18001_v37 }
 0x666   : > { %v22211_v31 = vpop.f32.mrf.mxu0 }
 0x667   : > { %v18151_v41 = vpop.f32.mrf.mxu1 }
 0x668   : > { %v18152_v5 = vadd.f32 %v18151_v41, %v18077_v30  ;;  %v11918_v41 = vadd.f32 %v24586_v40, %v11913_v53 }
 0x669   : > { %v22204_v7 = vpop.f32.mrf.mxu1 }
 0x66a   : > { %v18229_v13 = vadd.f32 %v18228_v51, %v18152_v5 }
 0x66b   : > { %v18301_v8 = vpop.f32.mrf.mxu1 }
 0x66c   : > { %v18302_v14 = vadd.f32 %v18301_v8, %v18229_v13  ;;  %v18378_v18 = vpop.f32.mrf.mxu0 }
 0x66d   : > { %v22218_v28 = vpop.f32.mrf.mxu1 }
 0x66e   : > { %v19686_v32 = vsub.f32 %v18302_v14, %v19682_v6  ;;  %v22225_v33 = vpop.f32.mrf.mxu0 }
 0x66f   : > { %v19684_v33 = vmul.f32 %v23619_v36, %v23619_v36 }
 0x670   : > { %v19690_v34 = vadd.f32 %v19686_v32, %v15802_v12  ;;  %v18535_v29 = vpop.f32.mrf.mxu0 }
 0x672   : > { %v19694_v55 = vadd.f32 %v19690_v34, %v24586_v40  ;;  %v22239_v57 = vpop.f32.mrf.mxu0 }
 0x673   : > { %v11914_v57 = vmul.f32 2.0, %v11910_v50 }
 0x674   : > { %22390 = vrcp.f32 %v19694_v55  ;;  %v18459_v62 = vpop.f32.mrf.mxu1 }
 0x675   : > { %v18460_v44 = vadd.f32 %v18459_v62, %v18378_v18 }
 0x676   : > { %v22232_v42 = vpop.f32.mrf.mxu1  ;;  %v18687_v46 = vpop.f32.mrf.mxu0 }
 0x677   : > { %v18536_v10 = vadd.f32 %v18535_v29, %v18460_v44 }
 0x678   : > { %v22253_v15 = vpop.f32.mrf.mxu0 }
 0x679   : > { %v18610_v54 = vpop.f32.mrf.mxu1 }
 0x67a   : > { %v18611_v17 = vadd.f32 %v18610_v54, %v18536_v10  ;;  %v11919_v54 = vadd.f32 %v24586_v40, %v11914_v57 }
 0x67b   : > { %v22246_v2 = vpop.f32.mrf.mxu1 }
 0x67c   : > { %v18688_v25 = vadd.f32 %v18687_v46, %v18611_v17 }
 0x67d   : > { %v18760_v43 = vpop.f32.mrf.mxu1 }
 0x67e   : > { %v18761_v61 = vadd.f32 %v18760_v43, %v18688_v25  ;;  %v18837_v12 = vpop.f32.mrf.mxu0 }
 0x67f   : > { %v22260_v22 = vpop.f32.mrf.mxu1 }
 0x680   : > { %v19687_v3 = vsub.f32 %v18761_v61, %v19683_v21  ;;  %v22267_v27 = vpop.f32.mrf.mxu0 }
 0x681   : > { %v22391_v0 = vpop.eup %22390 }
 0x682   : > { %v19702_v37 = vmul.f32 %v22391_v0, %v19694_v55  ;;  %v19691_v4 = vadd.f32 %v19687_v3, %v15803_v39  ;;  %v18994_v51 = vpop.f32.mrf.mxu0 }
 0x684   : > { %v19706_v30 = vsub.f32 2.0, %v19702_v37  ;;  %v19695_v31 = vadd.f32 %v19691_v4, %v24586_v40  ;;  %v22281_v1 = vpop.f32.mrf.mxu0 }
 0x685   : > { %v11915_v1 = vmul.f32 2.0, %v11911_v20 }
 0x686   : > { %22392 = vrcp.f32 %v19695_v31  ;;  %v18918_v5 = vpop.f32.mrf.mxu1  ;;  %v19710_v7 = vmul.f32 %v22391_v0, %v19706_v30  ;;  %v19685_v0 = vmul.f32 %v23625_v56, %v23625_v56 }
 0x687   : > { %v18919_v13 = vadd.f32 %v18918_v5, %v18837_v12 }
 0x688   : > { %v22274_v8 = vpop.f32.mrf.mxu1  ;;  %v19146_v6 = vpop.f32.mrf.mxu0  ;;  %v19714_v49 = vmul.f32 %v19710_v7, %v11918_v41  ;;  %v11920_v7 = vadd.f32 %v24586_v40, %v11915_v1 }
 0x689   : > { %v18995_v23 = vadd.f32 %v18994_v51, %v18919_v13 }
 0x68a   : > { %v22295_v26 = vpop.f32.mrf.mxu0  ;;  %v19719_v61 = vsel %vm19718_vm2, %v19714_v49, 0.0 }
 0x68b   : > { %v19069_v14 = vpop.f32.mrf.mxu1 }
 0x68c   : > { %v19070_v18 = vadd.f32 %v19069_v14, %v18995_v23 }
 0x68d   : > { %v22288_v35 = vpop.f32.mrf.mxu1 }
 0x68e   : > { %v19147_v58 = vadd.f32 %v19146_v6, %v19070_v18 }
 0x68f   : > { %v19296_v39 = vpop.f32.mrf.mxu0 }
 0x691   : > { %v19219_v28 = vpop.f32.mrf.mxu1  ;;  %v22309_v32 = vpop.f32.mrf.mxu0 }
 0x692   : > { %v19220_v34 = vadd.f32 %v19219_v28, %v19147_v58 }
 0x693   : > { %v22393_v29 = vpop.eup %22392  ;;  %v22302_v55 = vpop.f32.mrf.mxu1 }
 0x694   : > { %v19703_v62 = vmul.f32 %v22393_v29, %v19695_v31  ;;  %v19688_v44 = vsub.f32 %v19220_v34, %v19684_v33  ;;  %v19453_v42 = vpop.f32.mrf.mxu0 }
 0x696   : > { %v19707_v46 = vsub.f32 2.0, %v19703_v62  ;;  %v19692_v10 = vadd.f32 %v19688_v44, %v15804_v19  ;;  %v22323_v15 = vpop.f32.mrf.mxu0 }
 0x698   : > { %v19696_v36 = vadd.f32 %v19692_v10, %v24586_v40  ;;  %v19377_v17 = vpop.f32.mrf.mxu1  ;;  %v19711_v2 = vmul.f32 %v22393_v29, %v19707_v46 }
 0x699   : > { %v19378_v25 = vadd.f32 %v19377_v17, %v19296_v39 }
 0x69a   : > { %22394 = vrcp.f32 %v19696_v36  ;;  %v22316_v11 = vpop.f32.mrf.mxu1  ;;  %v19715_v47 = vmul.f32 %v19711_v2, %v11919_v54 }
 0x69b   : > { %v19454_v50 = vadd.f32 %v19453_v42, %v19378_v25  ;;  %v19605_v43 = vpop.f32.mrf.mxu0 }
 0x69c   : > { %v19528_v21 = vpop.f32.mrf.mxu1  ;;  %v19720_v16 = vsel %vm19718_vm2, %v19715_v47, 0.0 }
 0x69d   : > { %v19529_v63 = vadd.f32 %v19528_v21, %v19454_v50  ;;  %v22337_v19 = vpop.f32.mrf.mxu0  ;;  %v19721_v12 = vadd.f32 %v19720_v16, %v19719_v61 }
 0x69e   : > { %v22330_v22 = vpop.f32.mrf.mxu1 }
 0x69f   : > { %v19606_v3 = vadd.f32 %v19605_v43, %v19529_v63 }
 0x6a0   : > { %v19678_v27 = vpop.f32.mrf.mxu1 }
 0x6a1   : > { %v19679_v53 = vadd.f32 %v19678_v27, %v19606_v3 }
 0x6a2   : > { %v22344_v37 = vpop.f32.mrf.mxu1 }
 0x6a3   : > { %v19689_v4 = vsub.f32 %v19679_v53, %v19685_v0 }
 0x6a5   : > { %v19693_v51 = vadd.f32 %v19689_v4, %v15805_v9 }
 0x6a7   : > { %v22395_v30 = vpop.eup %22394  ;;  %v19697_v31 = vadd.f32 %v19693_v51, %v24586_v40 }
 0x6a8   : > { %v19704_v41 = vmul.f32 %v22395_v30, %v19696_v36 }
 0x6a9   : > { %22396 = vrcp.f32 %v19697_v31 }
 0x6aa   : > { %v19708_v5 = vsub.f32 2.0, %v19704_v41 }
 0x6ac   : > { %v19712_v56 = vmul.f32 %v22395_v30, %v19708_v5 }
 0x6ae   : > { %v19716_v13 = vmul.f32 %v19712_v56, %v11920_v7 }
 0x6b0   : > { %v19722_v8 = vsel %vm19718_vm2, %v19716_v13, 0.0 }
 0x6b1   : > { %v19723_v6 = vadd.f32 %v19722_v8, %v19721_v12 }
 0x6b6   : > { %v22397_v49 = vpop.eup %22396 }
 0x6b7   : > { %v19705_v60 = vmul.f32 %v22397_v49, %v19697_v31 }
 0x6b9   : > { %v19709_v9 = vsub.f32 2.0, %v19705_v60 }
 0x6bb   : > { %v19713_v24 = vmul.f32 %v22397_v49, %v19709_v9 }
 0x6bd   : > { %v19717_v20 = vmul.f32 %v19713_v24, %v11921_v38 }
 0x6bf   : > { %v19724_v23 = vsel %vm19718_vm2, %v19717_v20, 0.0 }
 0x6c0   : > { %v19725_v26 = vadd.f32 %v19724_v23, %v19723_v6 }
 0x6c2   : > { %19726 = vadd.xlane.f32.xlu0 %v19725_v26 }
 0x74b   : > { %v19727_v14 = vpop.xlane.xlu0 %19726 }
 0x74c   : > { %v19728_v18 = vrot.slane %v19727_v14, 4 }
 0x74e   : > { %v19729_v35 = vadd.f32 %v19728_v18, %v19727_v14 }
 0x750   : > { %v19730_v58 = vrot.slane %v19729_v35, 2 }
 0x752   : > { %v19731_v39 = vadd.f32 %v19730_v58, %v19729_v35 }
 0x754   : > { %v19732_v28 = vrot.slane %v19731_v39, 1 }
 0x756   : > { %v19733_v59 = vadd.f32 %v19732_v28, %v19731_v39 }
 0x758   : > { %22345 = vpush %v19733_v59 }
 0x789   : > { %s22346_s30 = spop %22345 }
 0x78a   : > { %v19735_v45 = vstv %s22346_s30 }
 0x78b   : > { %19736 = vst [vmem:[%s268_s29] sm:$0x1] %v19735_v45 }
 0x78c PF: > { %p16_p1 = scmp.ge.s32.totalorder %s22554_s24, 4   ;;  %s24656_s20 = smov %s22484_s21 }
 0x78d   : > { %s24657_s21 = smov %s22488_s22  ;;  %s24658_s22 = smov %s22564_s27 }
 0x78e   : > { %s24659_s23 = smov %s22554_s24  ;;  %18 = sbr.rel (!%p16_p1) target bundleno = 5 (0x5), region = 83 }
 0x793   :  { %19754 = vsyncpa [#allocation4], 1 }
 0x794   :  { %19756 = vsyncpa [#allocation4 + $0x1], 1 }

</bundles_post_ra>
